<compile_context>
chip_gen: v7x
topology: tpu7x:2x2x1
jax: 0.10.0
libtpu: 0.0.40
codegen_flags: <defaults>
</compile_context>

<pallas_src>
import functools

import jax
import jax.numpy as jnp
from jax.experimental import pallas as pl
from jax.experimental.pallas import tpu as pltpu


# ----------------------------------------------------------------------------
# Fused Pallas kernel: all GRU layers/directions + BatchNorm1d + Linear
# ----------------------------------------------------------------------------
def _make_fused_kernel(num_layers, num_dir, T, B, H, eps=1e-5):
    """Build the fused kernel body for static (num_layers, num_dir, T, B, H).

    Kernel ref layout (all whole-array VMEM blocks, no grid):
      x_ref                               : (T*B, Din0)   time-major flattened input
      per (layer, dir): wih (Din_l, 3H), whh (H, 3H), bx (1, 3H), bhn (1, H)
      gamma (1, C), beta (1, C), w_out (C, OPAD), b_out (1, OPAD)
      out_ref                             : (T*B, OPAD)
      scratch: act_a (T*B, C), act_b (T*B, C), gxs (T*B, 3H)
    """

    def kernel(*refs):
        idx = 0
        x_ref = refs[idx]; idx += 1
        gru_refs = []
        for _ in range(num_layers * num_dir):
            gru_refs.append(refs[idx:idx + 4]); idx += 4
        gamma_ref, beta_ref, w_ref, b_ref = refs[idx:idx + 4]; idx += 4
        out_ref = refs[idx]; idx += 1
        act_a, act_b, gxs = refs[idx:idx + 3]

        layer_scr = [act_a, act_b]
        layer_in = x_ref
        for layer in range(num_layers):
            layer_out = layer_scr[layer % 2]
            x_all = layer_in[...]                               # (T*B, Din_l)
            for d in range(num_dir):
                wih_ref, whh_ref, bx_ref, bhn_ref = gru_refs[layer * num_dir + d]

                # Hoisted input projection for ALL timesteps: one wide MXU matmul,
                # biases (b_ih + folded b_hh_{r,z}) added once.
                gxs[...] = (jnp.dot(x_all, wih_ref[...],
                                    preferred_element_type=jnp.float32)
                            + bx_ref[...])

                whh = whh_ref[...]                              # (H, 3H)
                bhn = bhn_ref[...]                              # (1, H)
                c0 = d * H

                # Sequential recurrence, fully unrolled (T is small & static).
                h = jnp.zeros((B, H), jnp.float32)
                for t in range(T):
                    t_eff = (T - 1 - t) if d == 1 else t        # backward = index math
                    r0 = t_eff * B
                    gx = gxs[r0:r0 + B, :]                      # (B, 3H)
                    gh = jnp.dot(h, whh,                        # only matmul on the
                                 preferred_element_type=jnp.float32)  # serial path
                    r = jax.nn.sigmoid(gx[:, 0:H] + gh[:, 0:H])
                    z = jax.nn.sigmoid(gx[:, H:2 * H] + gh[:, H:2 * H])
                    n = jnp.tanh(gx[:, 2 * H:3 * H]
                                 + r * (gh[:, 2 * H:3 * H] + bhn))
                    h = (1.0 - z) * n + z * h
                    layer_out[r0:r0 + B, c0:c0 + H] = h
            layer_in = layer_out

        # ---- BatchNorm1d (batch statistics over N = T*B rows) + Linear ----
        a = layer_in[...]                                       # (T*B, C)
        nrows = a.shape[0]
        mean = jnp.sum(a, axis=0, keepdims=True) / nrows
        ac = a - mean
        var = jnp.sum(ac * ac, axis=0, keepdims=True) / nrows   # biased variance
        y = ac * jax.lax.rsqrt(var + eps) * gamma_ref[...] + beta_ref[...]
        out_ref[...] = (jnp.dot(y, w_ref[...],
                                preferred_element_type=jnp.float32)
                        + b_ref[...])                           # lane-dense store

    return kernel


# ----------------------------------------------------------------------------
# Wrapper
# ----------------------------------------------------------------------------
def gru_classifier_forward(x_btd, params, num_layers, bidirectional, output_size):
    """Full forward pass of GRUClassifier (dropouts are identity)."""
    num_dir = 2 if bidirectional else 1
    B, T, Din = x_btd.shape
    H = params["gru"][(0, 0)][1].shape[0]          # whh is (H, 3H)
    C = num_dir * H
    OPAD = pl.cdiv(output_size, 128) * 128         # lane-dense output width

    # Time-major flattening so timestep t occupies rows [t*B, (t+1)*B).
    x_flat = jnp.transpose(x_btd, (1, 0, 2)).reshape(T * B, Din)
    w_pad = jnp.pad(params["w_out"], ((0, 0), (0, OPAD - output_size)))
    b_pad = jnp.pad(params["b_out"], ((0, 0), (0, OPAD - output_size)))

    args = [x_flat]
    for layer in range(num_layers):
        for d in range(num_dir):
            args.extend(params["gru"][(layer, d)])
    args.extend([params["bn_gamma"], params["bn_beta"], w_pad, b_pad])

    kernel = _make_fused_kernel(num_layers, num_dir, T, B, H)
    out = pl.pallas_call(
        kernel,
        out_shape=jax.ShapeDtypeStruct((T * B, OPAD), jnp.float32),
        scratch_shapes=[
            pltpu.VMEM((T * B, C), jnp.float32),   # layer activations (ping)
            pltpu.VMEM((T * B, C), jnp.float32),   # layer activations (pong)
            pltpu.VMEM((T * B, 3 * H), jnp.float32),  # hoisted input gates
        ],
    )(*args)

    out = out.reshape(T, B, OPAD).transpose(1, 0, 2)     # (B, T, OPAD)
    return out[:, :, :output_size]


# ----------------------------------------------------------------------------
# Pure-JAX reference (for correctness check)
# ----------------------------------------------------------------------------
def _ref_gru_layer(x_tbd, wih, whh, bx, bhn):
    H = whh.shape[0]
    B = x_tbd.shape[1]

    def step(h, x_t):
        gx = x_t @ wih + bx
        gh = h @ whh
        r = jax.nn.sigmoid(gx[:, 0:H] + gh[:, 0:H])
        z = jax.nn.sigmoid(gx[:, H:2 * H] + gh[:, H:2 * H])
        n = jnp.tanh(gx[:, 2 * H:] + r * (gh[:, 2 * H:] + bhn))
        h_new = (1.0 - z) * n + z * h
        return h_new, h_new

    h0 = jnp.zeros((B, H), jnp.float32)
    _, ys = jax.lax.scan(step, h0, x_tbd)
    return ys


def _ref_forward(x_btd, params, num_layers, bidirectional):
    num_dir = 2 if bidirectional else 1
    x = jnp.transpose(x_btd, (1, 0, 2))            # (T, B, D)
    for layer in range(num_layers):
        outs = []
        for d in range(num_dir):
            wih, whh, bx, bhn = params["gru"][(layer, d)]
            xin = x if d == 0 else x[::-1]
            o = _ref_gru_layer(xin, wih, whh, bx, bhn)
            if d == 1:
                o = o[::-1]
            outs.append(o)
        x = jnp.concatenate(outs, axis=-1) if num_dir == 2 else outs[0]
    out = jnp.transpose(x, (1, 0, 2))              # (B, T, C)
    mean = jnp.mean(out, axis=(0, 1), keepdims=True)
    var = jnp.mean((out - mean) ** 2, axis=(0, 1), keepdims=True)
    out = (out - mean) * jax.lax.rsqrt(var + 1e-5)
    out = out * params["bn_gamma"][0] + params["bn_beta"][0]
    return out @ params["w_out"] + params["b_out"][0]


# ----------------------------------------------------------------------------
# Deterministic parameter init (mirrors PyTorch shapes / init ranges),
# stored pre-packed for the fused kernel: Wih (Din, 3H), Whh (H, 3H),
# bx = [b_ir+b_hr, b_iz+b_hz, b_in] (1, 3H), bhn = b_hn (1, H).
# ----------------------------------------------------------------------------
def init_params(key, input_size, hidden_dim, output_size, num_layers,
                bidirectional):
    num_dir = 2 if bidirectional else 1
    H = hidden_dim
    C = H * num_dir
    k_gru = 1.0 / float(H) ** 0.5
    k_lin = 1.0 / float(C) ** 0.5

    params = {"gru": {}}
    n_keys = num_layers * num_dir * 4 + 2
    keys = list(jax.random.split(key, n_keys))
    i = 0
    for layer in range(num_layers):
        din = input_size if layer == 0 else C
        for d in range(num_dir):
            wih = jax.random.uniform(keys[i], (din, 3 * H), jnp.float32,
                                     -k_gru, k_gru); i += 1
            whh = jax.random.uniform(keys[i], (H, 3 * H), jnp.float32,
                                     -k_gru, k_gru); i += 1
            bih = jax.random.uniform(keys[i], (1, 3 * H), jnp.float32,
                                     -k_gru, k_gru); i += 1
            bhh = jax.random.uniform(keys[i], (1, 3 * H), jnp.float32,
                                     -k_gru, k_gru); i += 1
            bx = bih.at[:, :2 * H].add(bhh[:, :2 * H])   # fold b_hh_{r,z}
            bhn = bhh[:, 2 * H:]                          # keep b_hh_n separate
            params["gru"][(layer, d)] = (wih, whh, bx, bhn)

    params["bn_gamma"] = jnp.ones((1, C), jnp.float32)    # nn.BatchNorm1d default
    params["bn_beta"] = jnp.zeros((1, C), jnp.float32)
    params["w_out"] = jax.random.uniform(keys[i], (C, output_size), jnp.float32,
                                         -k_lin, k_lin); i += 1
    params["b_out"] = jax.random.uniform(keys[i], (1, output_size), jnp.float32,
                                         -k_lin, k_lin)
    return params


# ----------------------------------------------------------------------------
if __name__ == "__main__":
    INPUT_SIZE = 16
    HIDDEN_DIM = 32
    OUTPUT_SIZE = 8
    NUM_LAYERS = 2
    BIDIRECTIONAL = True
    B, T = 2, 8

    key = jax.random.PRNGKey(0)
    k_x, k_p = jax.random.split(key)
    x = jax.random.normal(k_x, (B, T, INPUT_SIZE), jnp.float32)   # batch-first
    params = init_params(k_p, INPUT_SIZE, HIDDEN_DIM, OUTPUT_SIZE,
                         NUM_LAYERS, BIDIRECTIONAL)

    fwd = jax.jit(functools.partial(gru_classifier_forward,
                                    num_layers=NUM_LAYERS,
                                    bidirectional=BIDIRECTIONAL,
                                    output_size=OUTPUT_SIZE))
    out = jax.block_until_ready(fwd(x, params))
    assert out.shape == (B, T, OUTPUT_SIZE), out.shape

    ref = jax.block_until_ready(
        _ref_forward(x, params, NUM_LAYERS, BIDIRECTIONAL))
    err = float(jnp.max(jnp.abs(out - ref)))
    assert jnp.allclose(out, ref, atol=2e-4, rtol=2e-4), err

    print("KERNEL_OK")
</pallas_src>

<mosaic_0001>
module attributes {stable_mosaic.version = 11 : i64} {
  func.func @kernel(%arg0: memref<16x16xf32, #tpu.memory_space<vmem>>, %arg1: memref<16x96xf32, #tpu.memory_space<vmem>>, %arg2: memref<32x96xf32, #tpu.memory_space<vmem>>, %arg3: memref<1x96xf32, #tpu.memory_space<vmem>>, %arg4: memref<1x32xf32, #tpu.memory_space<vmem>>, %arg5: memref<16x96xf32, #tpu.memory_space<vmem>>, %arg6: memref<32x96xf32, #tpu.memory_space<vmem>>, %arg7: memref<1x96xf32, #tpu.memory_space<vmem>>, %arg8: memref<1x32xf32, #tpu.memory_space<vmem>>, %arg9: memref<64x96xf32, #tpu.memory_space<vmem>>, %arg10: memref<32x96xf32, #tpu.memory_space<vmem>>, %arg11: memref<1x96xf32, #tpu.memory_space<vmem>>, %arg12: memref<1x32xf32, #tpu.memory_space<vmem>>, %arg13: memref<64x96xf32, #tpu.memory_space<vmem>>, %arg14: memref<32x96xf32, #tpu.memory_space<vmem>>, %arg15: memref<1x96xf32, #tpu.memory_space<vmem>>, %arg16: memref<1x32xf32, #tpu.memory_space<vmem>>, %arg17: memref<1x64xf32, #tpu.memory_space<vmem>>, %arg18: memref<1x64xf32, #tpu.memory_space<vmem>>, %arg19: memref<64x128xf32, #tpu.memory_space<vmem>>, %arg20: memref<1x128xf32, #tpu.memory_space<vmem>>, %arg21: memref<16x128xf32, #tpu.memory_space<vmem>>, %arg22: memref<16x64xf32, #tpu.memory_space<vmem>>, %arg23: memref<16x64xf32, #tpu.memory_space<vmem>>, %arg24: memref<16x96xf32, #tpu.memory_space<vmem>>) attributes {dimension_semantics = [], scalar_prefetch = 0 : i64, scratch_operands = 3 : i64, tpu.core_type = #tpu.core_type<tc>} {
    %c0 = arith.constant 0 : index
    %c0_0 = arith.constant 0 : index
    %0 = vector.load %arg0[%c0, %c0_0] : memref<16x16xf32, #tpu.memory_space<vmem>>, vector<16x16xf32>
    %c0_1 = arith.constant 0 : index
    %c0_2 = arith.constant 0 : index
    %1 = vector.load %arg1[%c0_1, %c0_2] : memref<16x96xf32, #tpu.memory_space<vmem>>, vector<16x96xf32>
    %cst = arith.constant dense<0.000000e+00> : vector<16x96xf32>
    %2 = tpu.matmul %0, %1, %cst {dimension_numbers = #tpu.dot_dimension_numbers<[1], [0], [0], [1], [0, 0, 1, 1], [], []>} : vector<16x16xf32>, vector<16x96xf32>, vector<16x96xf32> -> vector<16x96xf32>
    %c0_3 = arith.constant 0 : index
    %c0_4 = arith.constant 0 : index
    %3 = vector.load %arg3[%c0_3, %c0_4] : memref<1x96xf32, #tpu.memory_space<vmem>>, vector<1x96xf32>
    %4 = vector.broadcast %3 : vector<1x96xf32> to vector<16x96xf32>
    %5 = arith.addf %2, %4 : vector<16x96xf32>
    %c0_5 = arith.constant 0 : index
    %c0_6 = arith.constant 0 : index
    %6 = vector.load %arg24[%c0_5, %c0_6] : memref<16x96xf32, #tpu.memory_space<vmem>>, vector<16x96xf32>
    tpu.vector_store %arg24[%c0_5, %c0_6], %5 {strides = array<i32>} : memref<16x96xf32, #tpu.memory_space<vmem>>, vector<16x96xf32>,
    %c0_7 = arith.constant 0 : index
    %c0_8 = arith.constant 0 : index
    %7 = vector.load %arg2[%c0_7, %c0_8] : memref<32x96xf32, #tpu.memory_space<vmem>>, vector<32x96xf32>
    %c0_9 = arith.constant 0 : index
    %c0_10 = arith.constant 0 : index
    %8 = vector.load %arg4[%c0_9, %c0_10] : memref<1x32xf32, #tpu.memory_space<vmem>>, vector<1x32xf32>
    %cst_11 = arith.constant 0.000000e+00 : f32
    %9 = vector.broadcast %cst_11 : f32 to vector<2x32xf32>
    %c0_12 = arith.constant 0 : index
    %c0_13 = arith.constant 0 : index
    %10 = vector.load %arg24[%c0_12, %c0_13] : memref<16x96xf32, #tpu.memory_space<vmem>>, vector<2x96xf32>
    %cst_14 = arith.constant dense<0.000000e+00> : vector<2x96xf32>
    %11 = tpu.matmul %9, %7, %cst_14 {dimension_numbers = #tpu.dot_dimension_numbers<[1], [0], [0], [1], [0, 0, 1, 1], [], []>} : vector<2x32xf32>, vector<32x96xf32>, vector<2x96xf32> -> vector<2x96xf32>
    %12 = vector.extract_strided_slice %10 {offsets = [0, 0], sizes = [2, 32], strides = [1, 1]} : vector<2x96xf32> to vector<2x32xf32>
    %13 = vector.extract_strided_slice %11 {offsets = [0, 0], sizes = [2, 32], strides = [1, 1]} : vector<2x96xf32> to vector<2x32xf32>
    %14 = arith.addf %12, %13 : vector<2x32xf32>
    %15 = arith.negf %14 : vector<2x32xf32>
    %16 = math.exp %15 : vector<2x32xf32>
    %cst_15 = arith.constant 1.000000e+00 : f32
    %17 = vector.broadcast %cst_15 : f32 to vector<2x32xf32>
    %18 = arith.addf %17, %16 : vector<2x32xf32>
    %19 = arith.divf %17, %18 : vector<2x32xf32>
    %20 = vector.extract_strided_slice %10 {offsets = [0, 32], sizes = [2, 32], strides = [1, 1]} : vector<2x96xf32> to vector<2x32xf32>
    %21 = vector.extract_strided_slice %11 {offsets = [0, 32], sizes = [2, 32], strides = [1, 1]} : vector<2x96xf32> to vector<2x32xf32>
    %22 = arith.addf %20, %21 : vector<2x32xf32>
    %23 = arith.negf %22 : vector<2x32xf32>
    %24 = math.exp %23 : vector<2x32xf32>
    %cst_16 = arith.constant 1.000000e+00 : f32
    %25 = vector.broadcast %cst_16 : f32 to vector<2x32xf32>
    %26 = arith.addf %25, %24 : vector<2x32xf32>
    %27 = arith.divf %25, %26 : vector<2x32xf32>
    %28 = vector.extract_strided_slice %10 {offsets = [0, 64], sizes = [2, 32], strides = [1, 1]} : vector<2x96xf32> to vector<2x32xf32>
    %29 = vector.extract_strided_slice %11 {offsets = [0, 64], sizes = [2, 32], strides = [1, 1]} : vector<2x96xf32> to vector<2x32xf32>
    %30 = vector.broadcast %8 : vector<1x32xf32> to vector<2x32xf32>
    %31 = arith.addf %29, %30 : vector<2x32xf32>
    %32 = arith.mulf %19, %31 : vector<2x32xf32>
    %33 = arith.addf %28, %32 : vector<2x32xf32>
    %34 = math.tanh %33 : vector<2x32xf32>
    %cst_17 = arith.constant 1.000000e+00 : f32
    %35 = vector.broadcast %cst_17 : f32 to vector<2x32xf32>
    %36 = arith.subf %35, %27 : vector<2x32xf32>
    %37 = arith.mulf %36, %34 : vector<2x32xf32>
    %38 = arith.mulf %27, %9 : vector<2x32xf32>
    %39 = arith.addf %37, %38 : vector<2x32xf32>
    %c0_18 = arith.constant 0 : index
    %c0_19 = arith.constant 0 : index
    %40 = vector.load %arg22[%c0_18, %c0_19] : memref<16x64xf32, #tpu.memory_space<vmem>>, vector<2x32xf32>
    tpu.vector_store %arg22[%c0_18, %c0_19], %39 {strides = array<i32>} : memref<16x64xf32, #tpu.memory_space<vmem>>, vector<2x32xf32>,
    %c2 = arith.constant 2 : index
    %c0_20 = arith.constant 0 : index
    %41 = vector.load %arg24[%c2, %c0_20] : memref<16x96xf32, #tpu.memory_space<vmem>>, vector<2x96xf32>
    %cst_21 = arith.constant dense<0.000000e+00> : vector<2x96xf32>
    %42 = tpu.matmul %39, %7, %cst_21 {dimension_numbers = #tpu.dot_dimension_numbers<[1], [0], [0], [1], [0, 0, 1, 1], [], []>} : vector<2x32xf32>, vector<32x96xf32>, vector<2x96xf32> -> vector<2x96xf32>
    %43 = vector.extract_strided_slice %41 {offsets = [0, 0], sizes = [2, 32], strides = [1, 1]} : vector<2x96xf32> to vector<2x32xf32>
    %44 = vector.extract_strided_slice %42 {offsets = [0, 0], sizes = [2, 32], strides = [1, 1]} : vector<2x96xf32> to vector<2x32xf32>
    %45 = arith.addf %43, %44 : vector<2x32xf32>
    %46 = arith.negf %45 : vector<2x32xf32>
    %47 = math.exp %46 : vector<2x32xf32>
    %cst_22 = arith.constant 1.000000e+00 : f32
    %48 = vector.broadcast %cst_22 : f32 to vector<2x32xf32>
    %49 = arith.addf %48, %47 : vector<2x32xf32>
    %50 = arith.divf %48, %49 : vector<2x32xf32>
    %51 = vector.extract_strided_slice %41 {offsets = [0, 32], sizes = [2, 32], strides = [1, 1]} : vector<2x96xf32> to vector<2x32xf32>
    %52 = vector.extract_strided_slice %42 {offsets = [0, 32], sizes = [2, 32], strides = [1, 1]} : vector<2x96xf32> to vector<2x32xf32>
    %53 = arith.addf %51, %52 : vector<2x32xf32>
    %54 = arith.negf %53 : vector<2x32xf32>
    %55 = math.exp %54 : vector<2x32xf32>
    %cst_23 = arith.constant 1.000000e+00 : f32
    %56 = vector.broadcast %cst_23 : f32 to vector<2x32xf32>
    %57 = arith.addf %56, %55 : vector<2x32xf32>
    %58 = arith.divf %56, %57 : vector<2x32xf32>
    %59 = vector.extract_strided_slice %41 {offsets = [0, 64], sizes = [2, 32], strides = [1, 1]} : vector<2x96xf32> to vector<2x32xf32>
    %60 = vector.extract_strided_slice %42 {offsets = [0, 64], sizes = [2, 32], strides = [1, 1]} : vector<2x96xf32> to vector<2x32xf32>
    %61 = vector.broadcast %8 : vector<1x32xf32> to vector<2x32xf32>
    %62 = arith.addf %60, %61 : vector<2x32xf32>
    %63 = arith.mulf %50, %62 : vector<2x32xf32>
    %64 = arith.addf %59, %63 : vector<2x32xf32>
    %65 = math.tanh %64 : vector<2x32xf32>
    %cst_24 = arith.constant 1.000000e+00 : f32
    %66 = vector.broadcast %cst_24 : f32 to vector<2x32xf32>
    %67 = arith.subf %66, %58 : vector<2x32xf32>
    %68 = arith.mulf %67, %65 : vector<2x32xf32>
    %69 = arith.mulf %58, %39 : vector<2x32xf32>
    %70 = arith.addf %68, %69 : vector<2x32xf32>
    %c2_25 = arith.constant 2 : index
    %c0_26 = arith.constant 0 : index
    %71 = vector.load %arg22[%c2_25, %c0_26] : memref<16x64xf32, #tpu.memory_space<vmem>>, vector<2x32xf32>
    tpu.vector_store %arg22[%c2_25, %c0_26], %70 {strides = array<i32>} : memref<16x64xf32, #tpu.memory_space<vmem>>, vector<2x32xf32>,
    %c4 = arith.constant 4 : index
    %c0_27 = arith.constant 0 : index
    %72 = vector.load %arg24[%c4, %c0_27] : memref<16x96xf32, #tpu.memory_space<vmem>>, vector<2x96xf32>
    %cst_28 = arith.constant dense<0.000000e+00> : vector<2x96xf32>
    %73 = tpu.matmul %70, %7, %cst_28 {dimension_numbers = #tpu.dot_dimension_numbers<[1], [0], [0], [1], [0, 0, 1, 1], [], []>} : vector<2x32xf32>, vector<32x96xf32>, vector<2x96xf32> -> vector<2x96xf32>
    %74 = vector.extract_strided_slice %72 {offsets = [0, 0], sizes = [2, 32], strides = [1, 1]} : vector<2x96xf32> to vector<2x32xf32>
    %75 = vector.extract_strided_slice %73 {offsets = [0, 0], sizes = [2, 32], strides = [1, 1]} : vector<2x96xf32> to vector<2x32xf32>
    %76 = arith.addf %74, %75 : vector<2x32xf32>
    %77 = arith.negf %76 : vector<2x32xf32>
    %78 = math.exp %77 : vector<2x32xf32>
    %cst_29 = arith.constant 1.000000e+00 : f32
    %79 = vector.broadcast %cst_29 : f32 to vector<2x32xf32>
    %80 = arith.addf %79, %78 : vector<2x32xf32>
    %81 = arith.divf %79, %80 : vector<2x32xf32>
    %82 = vector.extract_strided_slice %72 {offsets = [0, 32], sizes = [2, 32], strides = [1, 1]} : vector<2x96xf32> to vector<2x32xf32>
    %83 = vector.extract_strided_slice %73 {offsets = [0, 32], sizes = [2, 32], strides = [1, 1]} : vector<2x96xf32> to vector<2x32xf32>
    %84 = arith.addf %82, %83 : vector<2x32xf32>
    %85 = arith.negf %84 : vector<2x32xf32>
    %86 = math.exp %85 : vector<2x32xf32>
    %cst_30 = arith.constant 1.000000e+00 : f32
    %87 = vector.broadcast %cst_30 : f32 to vector<2x32xf32>
    %88 = arith.addf %87, %86 : vector<2x32xf32>
    %89 = arith.divf %87, %88 : vector<2x32xf32>
    %90 = vector.extract_strided_slice %72 {offsets = [0, 64], sizes = [2, 32], strides = [1, 1]} : vector<2x96xf32> to vector<2x32xf32>
    %91 = vector.extract_strided_slice %73 {offsets = [0, 64], sizes = [2, 32], strides = [1, 1]} : vector<2x96xf32> to vector<2x32xf32>
    %92 = vector.broadcast %8 : vector<1x32xf32> to vector<2x32xf32>
    %93 = arith.addf %91, %92 : vector<2x32xf32>
    %94 = arith.mulf %81, %93 : vector<2x32xf32>
    %95 = arith.addf %90, %94 : vector<2x32xf32>
    %96 = math.tanh %95 : vector<2x32xf32>
    %cst_31 = arith.constant 1.000000e+00 : f32
    %97 = vector.broadcast %cst_31 : f32 to vector<2x32xf32>
    %98 = arith.subf %97, %89 : vector<2x32xf32>
    %99 = arith.mulf %98, %96 : vector<2x32xf32>
    %100 = arith.mulf %89, %70 : vector<2x32xf32>
    %101 = arith.addf %99, %100 : vector<2x32xf32>
    %c4_32 = arith.constant 4 : index
    %c0_33 = arith.constant 0 : index
    %102 = vector.load %arg22[%c4_32, %c0_33] : memref<16x64xf32, #tpu.memory_space<vmem>>, vector<2x32xf32>
    tpu.vector_store %arg22[%c4_32, %c0_33], %101 {strides = array<i32>} : memref<16x64xf32, #tpu.memory_space<vmem>>, vector<2x32xf32>,
    %c6 = arith.constant 6 : index
    %c0_34 = arith.constant 0 : index
    %103 = vector.load %arg24[%c6, %c0_34] : memref<16x96xf32, #tpu.memory_space<vmem>>, vector<2x96xf32>
    %cst_35 = arith.constant dense<0.000000e+00> : vector<2x96xf32>
    %104 = tpu.matmul %101, %7, %cst_35 {dimension_numbers = #tpu.dot_dimension_numbers<[1], [0], [0], [1], [0, 0, 1, 1], [], []>} : vector<2x32xf32>, vector<32x96xf32>, vector<2x96xf32> -> vector<2x96xf32>
    %105 = vector.extract_strided_slice %103 {offsets = [0, 0], sizes = [2, 32], strides = [1, 1]} : vector<2x96xf32> to vector<2x32xf32>
    %106 = vector.extract_strided_slice %104 {offsets = [0, 0], sizes = [2, 32], strides = [1, 1]} : vector<2x96xf32> to vector<2x32xf32>
    %107 = arith.addf %105, %106 : vector<2x32xf32>
    %108 = arith.negf %107 : vector<2x32xf32>
    %109 = math.exp %108 : vector<2x32xf32>
    %cst_36 = arith.constant 1.000000e+00 : f32
    %110 = vector.broadcast %cst_36 : f32 to vector<2x32xf32>
    %111 = arith.addf %110, %109 : vector<2x32xf32>
    %112 = arith.divf %110, %111 : vector<2x32xf32>
    %113 = vector.extract_strided_slice %103 {offsets = [0, 32], sizes = [2, 32], strides = [1, 1]} : vector<2x96xf32> to vector<2x32xf32>
    %114 = vector.extract_strided_slice %104 {offsets = [0, 32], sizes = [2, 32], strides = [1, 1]} : vector<2x96xf32> to vector<2x32xf32>
    %115 = arith.addf %113, %114 : vector<2x32xf32>
    %116 = arith.negf %115 : vector<2x32xf32>
    %117 = math.exp %116 : vector<2x32xf32>
    %cst_37 = arith.constant 1.000000e+00 : f32
    %118 = vector.broadcast %cst_37 : f32 to vector<2x32xf32>
    %119 = arith.addf %118, %117 : vector<2x32xf32>
    %120 = arith.divf %118, %119 : vector<2x32xf32>
    %121 = vector.extract_strided_slice %103 {offsets = [0, 64], sizes = [2, 32], strides = [1, 1]} : vector<2x96xf32> to vector<2x32xf32>
    %122 = vector.extract_strided_slice %104 {offsets = [0, 64], sizes = [2, 32], strides = [1, 1]} : vector<2x96xf32> to vector<2x32xf32>
    %123 = vector.broadcast %8 : vector<1x32xf32> to vector<2x32xf32>
    %124 = arith.addf %122, %123 : vector<2x32xf32>
    %125 = arith.mulf %112, %124 : vector<2x32xf32>
    %126 = arith.addf %121, %125 : vector<2x32xf32>
    %127 = math.tanh %126 : vector<2x32xf32>
    %cst_38 = arith.constant 1.000000e+00 : f32
    %128 = vector.broadcast %cst_38 : f32 to vector<2x32xf32>
    %129 = arith.subf %128, %120 : vector<2x32xf32>
    %130 = arith.mulf %129, %127 : vector<2x32xf32>
    %131 = arith.mulf %120, %101 : vector<2x32xf32>
    %132 = arith.addf %130, %131 : vector<2x32xf32>
    %c6_39 = arith.constant 6 : index
    %c0_40 = arith.constant 0 : index
    %133 = vector.load %arg22[%c6_39, %c0_40] : memref<16x64xf32, #tpu.memory_space<vmem>>, vector<2x32xf32>
    tpu.vector_store %arg22[%c6_39, %c0_40], %132 {strides = array<i32>} : memref<16x64xf32, #tpu.memory_space<vmem>>, vector<2x32xf32>,
    %c8 = arith.constant 8 : index
    %c0_41 = arith.constant 0 : index
    %134 = vector.load %arg24[%c8, %c0_41] : memref<16x96xf32, #tpu.memory_space<vmem>>, vector<2x96xf32>
    %cst_42 = arith.constant dense<0.000000e+00> : vector<2x96xf32>
    %135 = tpu.matmul %132, %7, %cst_42 {dimension_numbers = #tpu.dot_dimension_numbers<[1], [0], [0], [1], [0, 0, 1, 1], [], []>} : vector<2x32xf32>, vector<32x96xf32>, vector<2x96xf32> -> vector<2x96xf32>
    %136 = vector.extract_strided_slice %134 {offsets = [0, 0], sizes = [2, 32], strides = [1, 1]} : vector<2x96xf32> to vector<2x32xf32>
    %137 = vector.extract_strided_slice %135 {offsets = [0, 0], sizes = [2, 32], strides = [1, 1]} : vector<2x96xf32> to vector<2x32xf32>
    %138 = arith.addf %136, %137 : vector<2x32xf32>
    %139 = arith.negf %138 : vector<2x32xf32>
    %140 = math.exp %139 : vector<2x32xf32>
    %cst_43 = arith.constant 1.000000e+00 : f32
    %141 = vector.broadcast %cst_43 : f32 to vector<2x32xf32>
    %142 = arith.addf %141, %140 : vector<2x32xf32>
    %143 = arith.divf %141, %142 : vector<2x32xf32>
    %144 = vector.extract_strided_slice %134 {offsets = [0, 32], sizes = [2, 32], strides = [1, 1]} : vector<2x96xf32> to vector<2x32xf32>
    %145 = vector.extract_strided_slice %135 {offsets = [0, 32], sizes = [2, 32], strides = [1, 1]} : vector<2x96xf32> to vector<2x32xf32>
    %146 = arith.addf %144, %145 : vector<2x32xf32>
    %147 = arith.negf %146 : vector<2x32xf32>
    %148 = math.exp %147 : vector<2x32xf32>
    %cst_44 = arith.constant 1.000000e+00 : f32
    %149 = vector.broadcast %cst_44 : f32 to vector<2x32xf32>
    %150 = arith.addf %149, %148 : vector<2x32xf32>
    %151 = arith.divf %149, %150 : vector<2x32xf32>
    %152 = vector.extract_strided_slice %134 {offsets = [0, 64], sizes = [2, 32], strides = [1, 1]} : vector<2x96xf32> to vector<2x32xf32>
    %153 = vector.extract_strided_slice %135 {offsets = [0, 64], sizes = [2, 32], strides = [1, 1]} : vector<2x96xf32> to vector<2x32xf32>
    %154 = vector.broadcast %8 : vector<1x32xf32> to vector<2x32xf32>
    %155 = arith.addf %153, %154 : vector<2x32xf32>
    %156 = arith.mulf %143, %155 : vector<2x32xf32>
    %157 = arith.addf %152, %156 : vector<2x32xf32>
    %158 = math.tanh %157 : vector<2x32xf32>
    %cst_45 = arith.constant 1.000000e+00 : f32
    %159 = vector.broadcast %cst_45 : f32 to vector<2x32xf32>
    %160 = arith.subf %159, %151 : vector<2x32xf32>
    %161 = arith.mulf %160, %158 : vector<2x32xf32>
    %162 = arith.mulf %151, %132 : vector<2x32xf32>
    %163 = arith.addf %161, %162 : vector<2x32xf32>
    %c8_46 = arith.constant 8 : index
    %c0_47 = arith.constant 0 : index
    %164 = vector.load %arg22[%c8_46, %c0_47] : memref<16x64xf32, #tpu.memory_space<vmem>>, vector<2x32xf32>
    tpu.vector_store %arg22[%c8_46, %c0_47], %163 {strides = array<i32>} : memref<16x64xf32, #tpu.memory_space<vmem>>, vector<2x32xf32>,
    %c10 = arith.constant 10 : index
    %c0_48 = arith.constant 0 : index
    %165 = vector.load %arg24[%c10, %c0_48] : memref<16x96xf32, #tpu.memory_space<vmem>>, vector<2x96xf32>
    %cst_49 = arith.constant dense<0.000000e+00> : vector<2x96xf32>
    %166 = tpu.matmul %163, %7, %cst_49 {dimension_numbers = #tpu.dot_dimension_numbers<[1], [0], [0], [1], [0, 0, 1, 1], [], []>} : vector<2x32xf32>, vector<32x96xf32>, vector<2x96xf32> -> vector<2x96xf32>
    %167 = vector.extract_strided_slice %165 {offsets = [0, 0], sizes = [2, 32], strides = [1, 1]} : vector<2x96xf32> to vector<2x32xf32>
    %168 = vector.extract_strided_slice %166 {offsets = [0, 0], sizes = [2, 32], strides = [1, 1]} : vector<2x96xf32> to vector<2x32xf32>
    %169 = arith.addf %167, %168 : vector<2x32xf32>
    %170 = arith.negf %169 : vector<2x32xf32>
    %171 = math.exp %170 : vector<2x32xf32>
    %cst_50 = arith.constant 1.000000e+00 : f32
    %172 = vector.broadcast %cst_50 : f32 to vector<2x32xf32>
    %173 = arith.addf %172, %171 : vector<2x32xf32>
    %174 = arith.divf %172, %173 : vector<2x32xf32>
    %175 = vector.extract_strided_slice %165 {offsets = [0, 32], sizes = [2, 32], strides = [1, 1]} : vector<2x96xf32> to vector<2x32xf32>
    %176 = vector.extract_strided_slice %166 {offsets = [0, 32], sizes = [2, 32], strides = [1, 1]} : vector<2x96xf32> to vector<2x32xf32>
    %177 = arith.addf %175, %176 : vector<2x32xf32>
    %178 = arith.negf %177 : vector<2x32xf32>
    %179 = math.exp %178 : vector<2x32xf32>
    %cst_51 = arith.constant 1.000000e+00 : f32
    %180 = vector.broadcast %cst_51 : f32 to vector<2x32xf32>
    %181 = arith.addf %180, %179 : vector<2x32xf32>
    %182 = arith.divf %180, %181 : vector<2x32xf32>
    %183 = vector.extract_strided_slice %165 {offsets = [0, 64], sizes = [2, 32], strides = [1, 1]} : vector<2x96xf32> to vector<2x32xf32>
    %184 = vector.extract_strided_slice %166 {offsets = [0, 64], sizes = [2, 32], strides = [1, 1]} : vector<2x96xf32> to vector<2x32xf32>
    %185 = vector.broadcast %8 : vector<1x32xf32> to vector<2x32xf32>
    %186 = arith.addf %184, %185 : vector<2x32xf32>
    %187 = arith.mulf %174, %186 : vector<2x32xf32>
    %188 = arith.addf %183, %187 : vector<2x32xf32>
    %189 = math.tanh %188 : vector<2x32xf32>
    %cst_52 = arith.constant 1.000000e+00 : f32
    %190 = vector.broadcast %cst_52 : f32 to vector<2x32xf32>
    %191 = arith.subf %190, %182 : vector<2x32xf32>
    %192 = arith.mulf %191, %189 : vector<2x32xf32>
    %193 = arith.mulf %182, %163 : vector<2x32xf32>
    %194 = arith.addf %192, %193 : vector<2x32xf32>
    %c10_53 = arith.constant 10 : index
    %c0_54 = arith.constant 0 : index
    %195 = vector.load %arg22[%c10_53, %c0_54] : memref<16x64xf32, #tpu.memory_space<vmem>>, vector<2x32xf32>
    tpu.vector_store %arg22[%c10_53, %c0_54], %194 {strides = array<i32>} : memref<16x64xf32, #tpu.memory_space<vmem>>, vector<2x32xf32>,
    %c12 = arith.constant 12 : index
    %c0_55 = arith.constant 0 : index
    %196 = vector.load %arg24[%c12, %c0_55] : memref<16x96xf32, #tpu.memory_space<vmem>>, vector<2x96xf32>
    %cst_56 = arith.constant dense<0.000000e+00> : vector<2x96xf32>
    %197 = tpu.matmul %194, %7, %cst_56 {dimension_numbers = #tpu.dot_dimension_numbers<[1], [0], [0], [1], [0, 0, 1, 1], [], []>} : vector<2x32xf32>, vector<32x96xf32>, vector<2x96xf32> -> vector<2x96xf32>
    %198 = vector.extract_strided_slice %196 {offsets = [0, 0], sizes = [2, 32], strides = [1, 1]} : vector<2x96xf32> to vector<2x32xf32>
    %199 = vector.extract_strided_slice %197 {offsets = [0, 0], sizes = [2, 32], strides = [1, 1]} : vector<2x96xf32> to vector<2x32xf32>
    %200 = arith.addf %198, %199 : vector<2x32xf32>
    %201 = arith.negf %200 : vector<2x32xf32>
    %202 = math.exp %201 : vector<2x32xf32>
    %cst_57 = arith.constant 1.000000e+00 : f32
    %203 = vector.broadcast %cst_57 : f32 to vector<2x32xf32>
    %204 = arith.addf %203, %202 : vector<2x32xf32>
    %205 = arith.divf %203, %204 : vector<2x32xf32>
    %206 = vector.extract_strided_slice %196 {offsets = [0, 32], sizes = [2, 32], strides = [1, 1]} : vector<2x96xf32> to vector<2x32xf32>
    %207 = vector.extract_strided_slice %197 {offsets = [0, 32], sizes = [2, 32], strides = [1, 1]} : vector<2x96xf32> to vector<2x32xf32>
    %208 = arith.addf %206, %207 : vector<2x32xf32>
    %209 = arith.negf %208 : vector<2x32xf32>
    %210 = math.exp %209 : vector<2x32xf32>
    %cst_58 = arith.constant 1.000000e+00 : f32
    %211 = vector.broadcast %cst_58 : f32 to vector<2x32xf32>
    %212 = arith.addf %211, %210 : vector<2x32xf32>
    %213 = arith.divf %211, %212 : vector<2x32xf32>
    %214 = vector.extract_strided_slice %196 {offsets = [0, 64], sizes = [2, 32], strides = [1, 1]} : vector<2x96xf32> to vector<2x32xf32>
    %215 = vector.extract_strided_slice %197 {offsets = [0, 64], sizes = [2, 32], strides = [1, 1]} : vector<2x96xf32> to vector<2x32xf32>
    %216 = vector.broadcast %8 : vector<1x32xf32> to vector<2x32xf32>
    %217 = arith.addf %215, %216 : vector<2x32xf32>
    %218 = arith.mulf %205, %217 : vector<2x32xf32>
    %219 = arith.addf %214, %218 : vector<2x32xf32>
    %220 = math.tanh %219 : vector<2x32xf32>
    %cst_59 = arith.constant 1.000000e+00 : f32
    %221 = vector.broadcast %cst_59 : f32 to vector<2x32xf32>
    %222 = arith.subf %221, %213 : vector<2x32xf32>
    %223 = arith.mulf %222, %220 : vector<2x32xf32>
    %224 = arith.mulf %213, %194 : vector<2x32xf32>
    %225 = arith.addf %223, %224 : vector<2x32xf32>
    %c12_60 = arith.constant 12 : index
    %c0_61 = arith.constant 0 : index
    %226 = vector.load %arg22[%c12_60, %c0_61] : memref<16x64xf32, #tpu.memory_space<vmem>>, vector<2x32xf32>
    tpu.vector_store %arg22[%c12_60, %c0_61], %225 {strides = array<i32>} : memref<16x64xf32, #tpu.memory_space<vmem>>, vector<2x32xf32>,
    %c14 = arith.constant 14 : index
    %c0_62 = arith.constant 0 : index
    %227 = vector.load %arg24[%c14, %c0_62] : memref<16x96xf32, #tpu.memory_space<vmem>>, vector<2x96xf32>
    %cst_63 = arith.constant dense<0.000000e+00> : vector<2x96xf32>
    %228 = tpu.matmul %225, %7, %cst_63 {dimension_numbers = #tpu.dot_dimension_numbers<[1], [0], [0], [1], [0, 0, 1, 1], [], []>} : vector<2x32xf32>, vector<32x96xf32>, vector<2x96xf32> -> vector<2x96xf32>
    %229 = vector.extract_strided_slice %227 {offsets = [0, 0], sizes = [2, 32], strides = [1, 1]} : vector<2x96xf32> to vector<2x32xf32>
    %230 = vector.extract_strided_slice %228 {offsets = [0, 0], sizes = [2, 32], strides = [1, 1]} : vector<2x96xf32> to vector<2x32xf32>
    %231 = arith.addf %229, %230 : vector<2x32xf32>
    %232 = arith.negf %231 : vector<2x32xf32>
    %233 = math.exp %232 : vector<2x32xf32>
    %cst_64 = arith.constant 1.000000e+00 : f32
    %234 = vector.broadcast %cst_64 : f32 to vector<2x32xf32>
    %235 = arith.addf %234, %233 : vector<2x32xf32>
    %236 = arith.divf %234, %235 : vector<2x32xf32>
    %237 = vector.extract_strided_slice %227 {offsets = [0, 32], sizes = [2, 32], strides = [1, 1]} : vector<2x96xf32> to vector<2x32xf32>
    %238 = vector.extract_strided_slice %228 {offsets = [0, 32], sizes = [2, 32], strides = [1, 1]} : vector<2x96xf32> to vector<2x32xf32>
    %239 = arith.addf %237, %238 : vector<2x32xf32>
    %240 = arith.negf %239 : vector<2x32xf32>
    %241 = math.exp %240 : vector<2x32xf32>
    %cst_65 = arith.constant 1.000000e+00 : f32
    %242 = vector.broadcast %cst_65 : f32 to vector<2x32xf32>
    %243 = arith.addf %242, %241 : vector<2x32xf32>
    %244 = arith.divf %242, %243 : vector<2x32xf32>
    %245 = vector.extract_strided_slice %227 {offsets = [0, 64], sizes = [2, 32], strides = [1, 1]} : vector<2x96xf32> to vector<2x32xf32>
    %246 = vector.extract_strided_slice %228 {offsets = [0, 64], sizes = [2, 32], strides = [1, 1]} : vector<2x96xf32> to vector<2x32xf32>
    %247 = vector.broadcast %8 : vector<1x32xf32> to vector<2x32xf32>
    %248 = arith.addf %246, %247 : vector<2x32xf32>
    %249 = arith.mulf %236, %248 : vector<2x32xf32>
    %250 = arith.addf %245, %249 : vector<2x32xf32>
    %251 = math.tanh %250 : vector<2x32xf32>
    %cst_66 = arith.constant 1.000000e+00 : f32
    %252 = vector.broadcast %cst_66 : f32 to vector<2x32xf32>
    %253 = arith.subf %252, %244 : vector<2x32xf32>
    %254 = arith.mulf %253, %251 : vector<2x32xf32>
    %255 = arith.mulf %244, %225 : vector<2x32xf32>
    %256 = arith.addf %254, %255 : vector<2x32xf32>
    %c14_67 = arith.constant 14 : index
    %c0_68 = arith.constant 0 : index
    %257 = vector.load %arg22[%c14_67, %c0_68] : memref<16x64xf32, #tpu.memory_space<vmem>>, vector<2x32xf32>
    tpu.vector_store %arg22[%c14_67, %c0_68], %256 {strides = array<i32>} : memref<16x64xf32, #tpu.memory_space<vmem>>, vector<2x32xf32>,
    %c0_69 = arith.constant 0 : index
    %c0_70 = arith.constant 0 : index
    %258 = vector.load %arg5[%c0_69, %c0_70] : memref<16x96xf32, #tpu.memory_space<vmem>>, vector<16x96xf32>
    %cst_71 = arith.constant dense<0.000000e+00> : vector<16x96xf32>
    %259 = tpu.matmul %0, %258, %cst_71 {dimension_numbers = #tpu.dot_dimension_numbers<[1], [0], [0], [1], [0, 0, 1, 1], [], []>} : vector<16x16xf32>, vector<16x96xf32>, vector<16x96xf32> -> vector<16x96xf32>
    %c0_72 = arith.constant 0 : index
    %c0_73 = arith.constant 0 : index
    %260 = vector.load %arg7[%c0_72, %c0_73] : memref<1x96xf32, #tpu.memory_space<vmem>>, vector<1x96xf32>
    %261 = vector.broadcast %260 : vector<1x96xf32> to vector<16x96xf32>
    %262 = arith.addf %259, %261 : vector<16x96xf32>
    %c0_74 = arith.constant 0 : index
    %c0_75 = arith.constant 0 : index
    %263 = vector.load %arg24[%c0_74, %c0_75] : memref<16x96xf32, #tpu.memory_space<vmem>>, vector<16x96xf32>
    tpu.vector_store %arg24[%c0_74, %c0_75], %262 {strides = array<i32>} : memref<16x96xf32, #tpu.memory_space<vmem>>, vector<16x96xf32>,
    %c0_76 = arith.constant 0 : index
    %c0_77 = arith.constant 0 : index
    %264 = vector.load %arg6[%c0_76, %c0_77] : memref<32x96xf32, #tpu.memory_space<vmem>>, vector<32x96xf32>
    %c0_78 = arith.constant 0 : index
    %c0_79 = arith.constant 0 : index
    %265 = vector.load %arg8[%c0_78, %c0_79] : memref<1x32xf32, #tpu.memory_space<vmem>>, vector<1x32xf32>
    %cst_80 = arith.constant 0.000000e+00 : f32
    %266 = vector.broadcast %cst_80 : f32 to vector<2x32xf32>
    %c14_81 = arith.constant 14 : index
    %c0_82 = arith.constant 0 : index
    %267 = vector.load %arg24[%c14_81, %c0_82] : memref<16x96xf32, #tpu.memory_space<vmem>>, vector<2x96xf32>
    %cst_83 = arith.constant dense<0.000000e+00> : vector<2x96xf32>
    %268 = tpu.matmul %266, %264, %cst_83 {dimension_numbers = #tpu.dot_dimension_numbers<[1], [0], [0], [1], [0, 0, 1, 1], [], []>} : vector<2x32xf32>, vector<32x96xf32>, vector<2x96xf32> -> vector<2x96xf32>
    %269 = vector.extract_strided_slice %267 {offsets = [0, 0], sizes = [2, 32], strides = [1, 1]} : vector<2x96xf32> to vector<2x32xf32>
    %270 = vector.extract_strided_slice %268 {offsets = [0, 0], sizes = [2, 32], strides = [1, 1]} : vector<2x96xf32> to vector<2x32xf32>
    %271 = arith.addf %269, %270 : vector<2x32xf32>
    %272 = arith.negf %271 : vector<2x32xf32>
    %273 = math.exp %272 : vector<2x32xf32>
    %cst_84 = arith.constant 1.000000e+00 : f32
    %274 = vector.broadcast %cst_84 : f32 to vector<2x32xf32>
    %275 = arith.addf %274, %273 : vector<2x32xf32>
    %276 = arith.divf %274, %275 : vector<2x32xf32>
    %277 = vector.extract_strided_slice %267 {offsets = [0, 32], sizes = [2, 32], strides = [1, 1]} : vector<2x96xf32> to vector<2x32xf32>
    %278 = vector.extract_strided_slice %268 {offsets = [0, 32], sizes = [2, 32], strides = [1, 1]} : vector<2x96xf32> to vector<2x32xf32>
    %279 = arith.addf %277, %278 : vector<2x32xf32>
    %280 = arith.negf %279 : vector<2x32xf32>
    %281 = math.exp %280 : vector<2x32xf32>
    %cst_85 = arith.constant 1.000000e+00 : f32
    %282 = vector.broadcast %cst_85 : f32 to vector<2x32xf32>
    %283 = arith.addf %282, %281 : vector<2x32xf32>
    %284 = arith.divf %282, %283 : vector<2x32xf32>
    %285 = vector.extract_strided_slice %267 {offsets = [0, 64], sizes = [2, 32], strides = [1, 1]} : vector<2x96xf32> to vector<2x32xf32>
    %286 = vector.extract_strided_slice %268 {offsets = [0, 64], sizes = [2, 32], strides = [1, 1]} : vector<2x96xf32> to vector<2x32xf32>
    %287 = vector.broadcast %265 : vector<1x32xf32> to vector<2x32xf32>
    %288 = arith.addf %286, %287 : vector<2x32xf32>
    %289 = arith.mulf %276, %288 : vector<2x32xf32>
    %290 = arith.addf %285, %289 : vector<2x32xf32>
    %291 = math.tanh %290 : vector<2x32xf32>
    %cst_86 = arith.constant 1.000000e+00 : f32
    %292 = vector.broadcast %cst_86 : f32 to vector<2x32xf32>
    %293 = arith.subf %292, %284 : vector<2x32xf32>
    %294 = arith.mulf %293, %291 : vector<2x32xf32>
    %295 = arith.mulf %284, %266 : vector<2x32xf32>
    %296 = arith.addf %294, %295 : vector<2x32xf32>
    %c14_87 = arith.constant 14 : index
    %c32 = arith.constant 32 : index
    %297 = vector.load %arg22[%c14_87, %c32] : memref<16x64xf32, #tpu.memory_space<vmem>>, vector<2x32xf32>
    tpu.vector_store %arg22[%c14_87, %c32], %296 {strides = array<i32>} : memref<16x64xf32, #tpu.memory_space<vmem>>, vector<2x32xf32>,
    %c12_88 = arith.constant 12 : index
    %c0_89 = arith.constant 0 : index
    %298 = vector.load %arg24[%c12_88, %c0_89] : memref<16x96xf32, #tpu.memory_space<vmem>>, vector<2x96xf32>
    %cst_90 = arith.constant dense<0.000000e+00> : vector<2x96xf32>
    %299 = tpu.matmul %296, %264, %cst_90 {dimension_numbers = #tpu.dot_dimension_numbers<[1], [0], [0], [1], [0, 0, 1, 1], [], []>} : vector<2x32xf32>, vector<32x96xf32>, vector<2x96xf32> -> vector<2x96xf32>
    %300 = vector.extract_strided_slice %298 {offsets = [0, 0], sizes = [2, 32], strides = [1, 1]} : vector<2x96xf32> to vector<2x32xf32>
    %301 = vector.extract_strided_slice %299 {offsets = [0, 0], sizes = [2, 32], strides = [1, 1]} : vector<2x96xf32> to vector<2x32xf32>
    %302 = arith.addf %300, %301 : vector<2x32xf32>
    %303 = arith.negf %302 : vector<2x32xf32>
    %304 = math.exp %303 : vector<2x32xf32>
    %cst_91 = arith.constant 1.000000e+00 : f32
    %305 = vector.broadcast %cst_91 : f32 to vector<2x32xf32>
    %306 = arith.addf %305, %304 : vector<2x32xf32>
    %307 = arith.divf %305, %306 : vector<2x32xf32>
    %308 = vector.extract_strided_slice %298 {offsets = [0, 32], sizes = [2, 32], strides = [1, 1]} : vector<2x96xf32> to vector<2x32xf32>
    %309 = vector.extract_strided_slice %299 {offsets = [0, 32], sizes = [2, 32], strides = [1, 1]} : vector<2x96xf32> to vector<2x32xf32>
    %310 = arith.addf %308, %309 : vector<2x32xf32>
    %311 = arith.negf %310 : vector<2x32xf32>
    %312 = math.exp %311 : vector<2x32xf32>
    %cst_92 = arith.constant 1.000000e+00 : f32
    %313 = vector.broadcast %cst_92 : f32 to vector<2x32xf32>
    %314 = arith.addf %313, %312 : vector<2x32xf32>
    %315 = arith.divf %313, %314 : vector<2x32xf32>
    %316 = vector.extract_strided_slice %298 {offsets = [0, 64], sizes = [2, 32], strides = [1, 1]} : vector<2x96xf32> to vector<2x32xf32>
    %317 = vector.extract_strided_slice %299 {offsets = [0, 64], sizes = [2, 32], strides = [1, 1]} : vector<2x96xf32> to vector<2x32xf32>
    %318 = vector.broadcast %265 : vector<1x32xf32> to vector<2x32xf32>
    %319 = arith.addf %317, %318 : vector<2x32xf32>
    %320 = arith.mulf %307, %319 : vector<2x32xf32>
    %321 = arith.addf %316, %320 : vector<2x32xf32>
    %322 = math.tanh %321 : vector<2x32xf32>
    %cst_93 = arith.constant 1.000000e+00 : f32
    %323 = vector.broadcast %cst_93 : f32 to vector<2x32xf32>
    %324 = arith.subf %323, %315 : vector<2x32xf32>
    %325 = arith.mulf %324, %322 : vector<2x32xf32>
    %326 = arith.mulf %315, %296 : vector<2x32xf32>
    %327 = arith.addf %325, %326 : vector<2x32xf32>
    %c12_94 = arith.constant 12 : index
    %c32_95 = arith.constant 32 : index
    %328 = vector.load %arg22[%c12_94, %c32_95] : memref<16x64xf32, #tpu.memory_space<vmem>>, vector<2x32xf32>
    tpu.vector_store %arg22[%c12_94, %c32_95], %327 {strides = array<i32>} : memref<16x64xf32, #tpu.memory_space<vmem>>, vector<2x32xf32>,
    %c10_96 = arith.constant 10 : index
    %c0_97 = arith.constant 0 : index
    %329 = vector.load %arg24[%c10_96, %c0_97] : memref<16x96xf32, #tpu.memory_space<vmem>>, vector<2x96xf32>
    %cst_98 = arith.constant dense<0.000000e+00> : vector<2x96xf32>
    %330 = tpu.matmul %327, %264, %cst_98 {dimension_numbers = #tpu.dot_dimension_numbers<[1], [0], [0], [1], [0, 0, 1, 1], [], []>} : vector<2x32xf32>, vector<32x96xf32>, vector<2x96xf32> -> vector<2x96xf32>
    %331 = vector.extract_strided_slice %329 {offsets = [0, 0], sizes = [2, 32], strides = [1, 1]} : vector<2x96xf32> to vector<2x32xf32>
    %332 = vector.extract_strided_slice %330 {offsets = [0, 0], sizes = [2, 32], strides = [1, 1]} : vector<2x96xf32> to vector<2x32xf32>
    %333 = arith.addf %331, %332 : vector<2x32xf32>
    %334 = arith.negf %333 : vector<2x32xf32>
    %335 = math.exp %334 : vector<2x32xf32>
    %cst_99 = arith.constant 1.000000e+00 : f32
    %336 = vector.broadcast %cst_99 : f32 to vector<2x32xf32>
    %337 = arith.addf %336, %335 : vector<2x32xf32>
    %338 = arith.divf %336, %337 : vector<2x32xf32>
    %339 = vector.extract_strided_slice %329 {offsets = [0, 32], sizes = [2, 32], strides = [1, 1]} : vector<2x96xf32> to vector<2x32xf32>
    %340 = vector.extract_strided_slice %330 {offsets = [0, 32], sizes = [2, 32], strides = [1, 1]} : vector<2x96xf32> to vector<2x32xf32>
    %341 = arith.addf %339, %340 : vector<2x32xf32>
    %342 = arith.negf %341 : vector<2x32xf32>
    %343 = math.exp %342 : vector<2x32xf32>
    %cst_100 = arith.constant 1.000000e+00 : f32
    %344 = vector.broadcast %cst_100 : f32 to vector<2x32xf32>
    %345 = arith.addf %344, %343 : vector<2x32xf32>
    %346 = arith.divf %344, %345 : vector<2x32xf32>
    %347 = vector.extract_strided_slice %329 {offsets = [0, 64], sizes = [2, 32], strides = [1, 1]} : vector<2x96xf32> to vector<2x32xf32>
    %348 = vector.extract_strided_slice %330 {offsets = [0, 64], sizes = [2, 32], strides = [1, 1]} : vector<2x96xf32> to vector<2x32xf32>
    %349 = vector.broadcast %265 : vector<1x32xf32> to vector<2x32xf32>
    %350 = arith.addf %348, %349 : vector<2x32xf32>
    %351 = arith.mulf %338, %350 : vector<2x32xf32>
    %352 = arith.addf %347, %351 : vector<2x32xf32>
    %353 = math.tanh %352 : vector<2x32xf32>
    %cst_101 = arith.constant 1.000000e+00 : f32
    %354 = vector.broadcast %cst_101 : f32 to vector<2x32xf32>
    %355 = arith.subf %354, %346 : vector<2x32xf32>
    %356 = arith.mulf %355, %353 : vector<2x32xf32>
    %357 = arith.mulf %346, %327 : vector<2x32xf32>
    %358 = arith.addf %356, %357 : vector<2x32xf32>
    %c10_102 = arith.constant 10 : index
    %c32_103 = arith.constant 32 : index
    %359 = vector.load %arg22[%c10_102, %c32_103] : memref<16x64xf32, #tpu.memory_space<vmem>>, vector<2x32xf32>
    tpu.vector_store %arg22[%c10_102, %c32_103], %358 {strides = array<i32>} : memref<16x64xf32, #tpu.memory_space<vmem>>, vector<2x32xf32>,
    %c8_104 = arith.constant 8 : index
    %c0_105 = arith.constant 0 : index
    %360 = vector.load %arg24[%c8_104, %c0_105] : memref<16x96xf32, #tpu.memory_space<vmem>>, vector<2x96xf32>
    %cst_106 = arith.constant dense<0.000000e+00> : vector<2x96xf32>
    %361 = tpu.matmul %358, %264, %cst_106 {dimension_numbers = #tpu.dot_dimension_numbers<[1], [0], [0], [1], [0, 0, 1, 1], [], []>} : vector<2x32xf32>, vector<32x96xf32>, vector<2x96xf32> -> vector<2x96xf32>
    %362 = vector.extract_strided_slice %360 {offsets = [0, 0], sizes = [2, 32], strides = [1, 1]} : vector<2x96xf32> to vector<2x32xf32>
    %363 = vector.extract_strided_slice %361 {offsets = [0, 0], sizes = [2, 32], strides = [1, 1]} : vector<2x96xf32> to vector<2x32xf32>
    %364 = arith.addf %362, %363 : vector<2x32xf32>
    %365 = arith.negf %364 : vector<2x32xf32>
    %366 = math.exp %365 : vector<2x32xf32>
    %cst_107 = arith.constant 1.000000e+00 : f32
    %367 = vector.broadcast %cst_107 : f32 to vector<2x32xf32>
    %368 = arith.addf %367, %366 : vector<2x32xf32>
    %369 = arith.divf %367, %368 : vector<2x32xf32>
    %370 = vector.extract_strided_slice %360 {offsets = [0, 32], sizes = [2, 32], strides = [1, 1]} : vector<2x96xf32> to vector<2x32xf32>
    %371 = vector.extract_strided_slice %361 {offsets = [0, 32], sizes = [2, 32], strides = [1, 1]} : vector<2x96xf32> to vector<2x32xf32>
    %372 = arith.addf %370, %371 : vector<2x32xf32>
    %373 = arith.negf %372 : vector<2x32xf32>
    %374 = math.exp %373 : vector<2x32xf32>
    %cst_108 = arith.constant 1.000000e+00 : f32
    %375 = vector.broadcast %cst_108 : f32 to vector<2x32xf32>
    %376 = arith.addf %375, %374 : vector<2x32xf32>
    %377 = arith.divf %375, %376 : vector<2x32xf32>
    %378 = vector.extract_strided_slice %360 {offsets = [0, 64], sizes = [2, 32], strides = [1, 1]} : vector<2x96xf32> to vector<2x32xf32>
    %379 = vector.extract_strided_slice %361 {offsets = [0, 64], sizes = [2, 32], strides = [1, 1]} : vector<2x96xf32> to vector<2x32xf32>
    %380 = vector.broadcast %265 : vector<1x32xf32> to vector<2x32xf32>
    %381 = arith.addf %379, %380 : vector<2x32xf32>
    %382 = arith.mulf %369, %381 : vector<2x32xf32>
    %383 = arith.addf %378, %382 : vector<2x32xf32>
    %384 = math.tanh %383 : vector<2x32xf32>
    %cst_109 = arith.constant 1.000000e+00 : f32
    %385 = vector.broadcast %cst_109 : f32 to vector<2x32xf32>
    %386 = arith.subf %385, %377 : vector<2x32xf32>
    %387 = arith.mulf %386, %384 : vector<2x32xf32>
    %388 = arith.mulf %377, %358 : vector<2x32xf32>
    %389 = arith.addf %387, %388 : vector<2x32xf32>
    %c8_110 = arith.constant 8 : index
    %c32_111 = arith.constant 32 : index
    %390 = vector.load %arg22[%c8_110, %c32_111] : memref<16x64xf32, #tpu.memory_space<vmem>>, vector<2x32xf32>
    tpu.vector_store %arg22[%c8_110, %c32_111], %389 {strides = array<i32>} : memref<16x64xf32, #tpu.memory_space<vmem>>, vector<2x32xf32>,
    %c6_112 = arith.constant 6 : index
    %c0_113 = arith.constant 0 : index
    %391 = vector.load %arg24[%c6_112, %c0_113] : memref<16x96xf32, #tpu.memory_space<vmem>>, vector<2x96xf32>
    %cst_114 = arith.constant dense<0.000000e+00> : vector<2x96xf32>
    %392 = tpu.matmul %389, %264, %cst_114 {dimension_numbers = #tpu.dot_dimension_numbers<[1], [0], [0], [1], [0, 0, 1, 1], [], []>} : vector<2x32xf32>, vector<32x96xf32>, vector<2x96xf32> -> vector<2x96xf32>
    %393 = vector.extract_strided_slice %391 {offsets = [0, 0], sizes = [2, 32], strides = [1, 1]} : vector<2x96xf32> to vector<2x32xf32>
    %394 = vector.extract_strided_slice %392 {offsets = [0, 0], sizes = [2, 32], strides = [1, 1]} : vector<2x96xf32> to vector<2x32xf32>
    %395 = arith.addf %393, %394 : vector<2x32xf32>
    %396 = arith.negf %395 : vector<2x32xf32>
    %397 = math.exp %396 : vector<2x32xf32>
    %cst_115 = arith.constant 1.000000e+00 : f32
    %398 = vector.broadcast %cst_115 : f32 to vector<2x32xf32>
    %399 = arith.addf %398, %397 : vector<2x32xf32>
    %400 = arith.divf %398, %399 : vector<2x32xf32>
    %401 = vector.extract_strided_slice %391 {offsets = [0, 32], sizes = [2, 32], strides = [1, 1]} : vector<2x96xf32> to vector<2x32xf32>
    %402 = vector.extract_strided_slice %392 {offsets = [0, 32], sizes = [2, 32], strides = [1, 1]} : vector<2x96xf32> to vector<2x32xf32>
    %403 = arith.addf %401, %402 : vector<2x32xf32>
    %404 = arith.negf %403 : vector<2x32xf32>
    %405 = math.exp %404 : vector<2x32xf32>
    %cst_116 = arith.constant 1.000000e+00 : f32
    %406 = vector.broadcast %cst_116 : f32 to vector<2x32xf32>
    %407 = arith.addf %406, %405 : vector<2x32xf32>
    %408 = arith.divf %406, %407 : vector<2x32xf32>
    %409 = vector.extract_strided_slice %391 {offsets = [0, 64], sizes = [2, 32], strides = [1, 1]} : vector<2x96xf32> to vector<2x32xf32>
    %410 = vector.extract_strided_slice %392 {offsets = [0, 64], sizes = [2, 32], strides = [1, 1]} : vector<2x96xf32> to vector<2x32xf32>
    %411 = vector.broadcast %265 : vector<1x32xf32> to vector<2x32xf32>
    %412 = arith.addf %410, %411 : vector<2x32xf32>
    %413 = arith.mulf %400, %412 : vector<2x32xf32>
    %414 = arith.addf %409, %413 : vector<2x32xf32>
    %415 = math.tanh %414 : vector<2x32xf32>
    %cst_117 = arith.constant 1.000000e+00 : f32
    %416 = vector.broadcast %cst_117 : f32 to vector<2x32xf32>
    %417 = arith.subf %416, %408 : vector<2x32xf32>
    %418 = arith.mulf %417, %415 : vector<2x32xf32>
    %419 = arith.mulf %408, %389 : vector<2x32xf32>
    %420 = arith.addf %418, %419 : vector<2x32xf32>
    %c6_118 = arith.constant 6 : index
    %c32_119 = arith.constant 32 : index
    %421 = vector.load %arg22[%c6_118, %c32_119] : memref<16x64xf32, #tpu.memory_space<vmem>>, vector<2x32xf32>
    tpu.vector_store %arg22[%c6_118, %c32_119], %420 {strides = array<i32>} : memref<16x64xf32, #tpu.memory_space<vmem>>, vector<2x32xf32>,
    %c4_120 = arith.constant 4 : index
    %c0_121 = arith.constant 0 : index
    %422 = vector.load %arg24[%c4_120, %c0_121] : memref<16x96xf32, #tpu.memory_space<vmem>>, vector<2x96xf32>
    %cst_122 = arith.constant dense<0.000000e+00> : vector<2x96xf32>
    %423 = tpu.matmul %420, %264, %cst_122 {dimension_numbers = #tpu.dot_dimension_numbers<[1], [0], [0], [1], [0, 0, 1, 1], [], []>} : vector<2x32xf32>, vector<32x96xf32>, vector<2x96xf32> -> vector<2x96xf32>
    %424 = vector.extract_strided_slice %422 {offsets = [0, 0], sizes = [2, 32], strides = [1, 1]} : vector<2x96xf32> to vector<2x32xf32>
    %425 = vector.extract_strided_slice %423 {offsets = [0, 0], sizes = [2, 32], strides = [1, 1]} : vector<2x96xf32> to vector<2x32xf32>
    %426 = arith.addf %424, %425 : vector<2x32xf32>
    %427 = arith.negf %426 : vector<2x32xf32>
    %428 = math.exp %427 : vector<2x32xf32>
    %cst_123 = arith.constant 1.000000e+00 : f32
    %429 = vector.broadcast %cst_123 : f32 to vector<2x32xf32>
    %430 = arith.addf %429, %428 : vector<2x32xf32>
    %431 = arith.divf %429, %430 : vector<2x32xf32>
    %432 = vector.extract_strided_slice %422 {offsets = [0, 32], sizes = [2, 32], strides = [1, 1]} : vector<2x96xf32> to vector<2x32xf32>
    %433 = vector.extract_strided_slice %423 {offsets = [0, 32], sizes = [2, 32], strides = [1, 1]} : vector<2x96xf32> to vector<2x32xf32>
    %434 = arith.addf %432, %433 : vector<2x32xf32>
    %435 = arith.negf %434 : vector<2x32xf32>
    %436 = math.exp %435 : vector<2x32xf32>
    %cst_124 = arith.constant 1.000000e+00 : f32
    %437 = vector.broadcast %cst_124 : f32 to vector<2x32xf32>
    %438 = arith.addf %437, %436 : vector<2x32xf32>
    %439 = arith.divf %437, %438 : vector<2x32xf32>
    %440 = vector.extract_strided_slice %422 {offsets = [0, 64], sizes = [2, 32], strides = [1, 1]} : vector<2x96xf32> to vector<2x32xf32>
    %441 = vector.extract_strided_slice %423 {offsets = [0, 64], sizes = [2, 32], strides = [1, 1]} : vector<2x96xf32> to vector<2x32xf32>
    %442 = vector.broadcast %265 : vector<1x32xf32> to vector<2x32xf32>
    %443 = arith.addf %441, %442 : vector<2x32xf32>
    %444 = arith.mulf %431, %443 : vector<2x32xf32>
    %445 = arith.addf %440, %444 : vector<2x32xf32>
    %446 = math.tanh %445 : vector<2x32xf32>
    %cst_125 = arith.constant 1.000000e+00 : f32
    %447 = vector.broadcast %cst_125 : f32 to vector<2x32xf32>
    %448 = arith.subf %447, %439 : vector<2x32xf32>
    %449 = arith.mulf %448, %446 : vector<2x32xf32>
    %450 = arith.mulf %439, %420 : vector<2x32xf32>
    %451 = arith.addf %449, %450 : vector<2x32xf32>
    %c4_126 = arith.constant 4 : index
    %c32_127 = arith.constant 32 : index
    %452 = vector.load %arg22[%c4_126, %c32_127] : memref<16x64xf32, #tpu.memory_space<vmem>>, vector<2x32xf32>
    tpu.vector_store %arg22[%c4_126, %c32_127], %451 {strides = array<i32>} : memref<16x64xf32, #tpu.memory_space<vmem>>, vector<2x32xf32>,
    %c2_128 = arith.constant 2 : index
    %c0_129 = arith.constant 0 : index
    %453 = vector.load %arg24[%c2_128, %c0_129] : memref<16x96xf32, #tpu.memory_space<vmem>>, vector<2x96xf32>
    %cst_130 = arith.constant dense<0.000000e+00> : vector<2x96xf32>
    %454 = tpu.matmul %451, %264, %cst_130 {dimension_numbers = #tpu.dot_dimension_numbers<[1], [0], [0], [1], [0, 0, 1, 1], [], []>} : vector<2x32xf32>, vector<32x96xf32>, vector<2x96xf32> -> vector<2x96xf32>
    %455 = vector.extract_strided_slice %453 {offsets = [0, 0], sizes = [2, 32], strides = [1, 1]} : vector<2x96xf32> to vector<2x32xf32>
    %456 = vector.extract_strided_slice %454 {offsets = [0, 0], sizes = [2, 32], strides = [1, 1]} : vector<2x96xf32> to vector<2x32xf32>
    %457 = arith.addf %455, %456 : vector<2x32xf32>
    %458 = arith.negf %457 : vector<2x32xf32>
    %459 = math.exp %458 : vector<2x32xf32>
    %cst_131 = arith.constant 1.000000e+00 : f32
    %460 = vector.broadcast %cst_131 : f32 to vector<2x32xf32>
    %461 = arith.addf %460, %459 : vector<2x32xf32>
    %462 = arith.divf %460, %461 : vector<2x32xf32>
    %463 = vector.extract_strided_slice %453 {offsets = [0, 32], sizes = [2, 32], strides = [1, 1]} : vector<2x96xf32> to vector<2x32xf32>
    %464 = vector.extract_strided_slice %454 {offsets = [0, 32], sizes = [2, 32], strides = [1, 1]} : vector<2x96xf32> to vector<2x32xf32>
    %465 = arith.addf %463, %464 : vector<2x32xf32>
    %466 = arith.negf %465 : vector<2x32xf32>
    %467 = math.exp %466 : vector<2x32xf32>
    %cst_132 = arith.constant 1.000000e+00 : f32
    %468 = vector.broadcast %cst_132 : f32 to vector<2x32xf32>
    %469 = arith.addf %468, %467 : vector<2x32xf32>
    %470 = arith.divf %468, %469 : vector<2x32xf32>
    %471 = vector.extract_strided_slice %453 {offsets = [0, 64], sizes = [2, 32], strides = [1, 1]} : vector<2x96xf32> to vector<2x32xf32>
    %472 = vector.extract_strided_slice %454 {offsets = [0, 64], sizes = [2, 32], strides = [1, 1]} : vector<2x96xf32> to vector<2x32xf32>
    %473 = vector.broadcast %265 : vector<1x32xf32> to vector<2x32xf32>
    %474 = arith.addf %472, %473 : vector<2x32xf32>
    %475 = arith.mulf %462, %474 : vector<2x32xf32>
    %476 = arith.addf %471, %475 : vector<2x32xf32>
    %477 = math.tanh %476 : vector<2x32xf32>
    %cst_133 = arith.constant 1.000000e+00 : f32
    %478 = vector.broadcast %cst_133 : f32 to vector<2x32xf32>
    %479 = arith.subf %478, %470 : vector<2x32xf32>
    %480 = arith.mulf %479, %477 : vector<2x32xf32>
    %481 = arith.mulf %470, %451 : vector<2x32xf32>
    %482 = arith.addf %480, %481 : vector<2x32xf32>
    %c2_134 = arith.constant 2 : index
    %c32_135 = arith.constant 32 : index
    %483 = vector.load %arg22[%c2_134, %c32_135] : memref<16x64xf32, #tpu.memory_space<vmem>>, vector<2x32xf32>
    tpu.vector_store %arg22[%c2_134, %c32_135], %482 {strides = array<i32>} : memref<16x64xf32, #tpu.memory_space<vmem>>, vector<2x32xf32>,
    %c0_136 = arith.constant 0 : index
    %c0_137 = arith.constant 0 : index
    %484 = vector.load %arg24[%c0_136, %c0_137] : memref<16x96xf32, #tpu.memory_space<vmem>>, vector<2x96xf32>
    %cst_138 = arith.constant dense<0.000000e+00> : vector<2x96xf32>
    %485 = tpu.matmul %482, %264, %cst_138 {dimension_numbers = #tpu.dot_dimension_numbers<[1], [0], [0], [1], [0, 0, 1, 1], [], []>} : vector<2x32xf32>, vector<32x96xf32>, vector<2x96xf32> -> vector<2x96xf32>
    %486 = vector.extract_strided_slice %484 {offsets = [0, 0], sizes = [2, 32], strides = [1, 1]} : vector<2x96xf32> to vector<2x32xf32>
    %487 = vector.extract_strided_slice %485 {offsets = [0, 0], sizes = [2, 32], strides = [1, 1]} : vector<2x96xf32> to vector<2x32xf32>
    %488 = arith.addf %486, %487 : vector<2x32xf32>
    %489 = arith.negf %488 : vector<2x32xf32>
    %490 = math.exp %489 : vector<2x32xf32>
    %cst_139 = arith.constant 1.000000e+00 : f32
    %491 = vector.broadcast %cst_139 : f32 to vector<2x32xf32>
    %492 = arith.addf %491, %490 : vector<2x32xf32>
    %493 = arith.divf %491, %492 : vector<2x32xf32>
    %494 = vector.extract_strided_slice %484 {offsets = [0, 32], sizes = [2, 32], strides = [1, 1]} : vector<2x96xf32> to vector<2x32xf32>
    %495 = vector.extract_strided_slice %485 {offsets = [0, 32], sizes = [2, 32], strides = [1, 1]} : vector<2x96xf32> to vector<2x32xf32>
    %496 = arith.addf %494, %495 : vector<2x32xf32>
    %497 = arith.negf %496 : vector<2x32xf32>
    %498 = math.exp %497 : vector<2x32xf32>
    %cst_140 = arith.constant 1.000000e+00 : f32
    %499 = vector.broadcast %cst_140 : f32 to vector<2x32xf32>
    %500 = arith.addf %499, %498 : vector<2x32xf32>
    %501 = arith.divf %499, %500 : vector<2x32xf32>
    %502 = vector.extract_strided_slice %484 {offsets = [0, 64], sizes = [2, 32], strides = [1, 1]} : vector<2x96xf32> to vector<2x32xf32>
    %503 = vector.extract_strided_slice %485 {offsets = [0, 64], sizes = [2, 32], strides = [1, 1]} : vector<2x96xf32> to vector<2x32xf32>
    %504 = vector.broadcast %265 : vector<1x32xf32> to vector<2x32xf32>
    %505 = arith.addf %503, %504 : vector<2x32xf32>
    %506 = arith.mulf %493, %505 : vector<2x32xf32>
    %507 = arith.addf %502, %506 : vector<2x32xf32>
    %508 = math.tanh %507 : vector<2x32xf32>
    %cst_141 = arith.constant 1.000000e+00 : f32
    %509 = vector.broadcast %cst_141 : f32 to vector<2x32xf32>
    %510 = arith.subf %509, %501 : vector<2x32xf32>
    %511 = arith.mulf %510, %508 : vector<2x32xf32>
    %512 = arith.mulf %501, %482 : vector<2x32xf32>
    %513 = arith.addf %511, %512 : vector<2x32xf32>
    %c0_142 = arith.constant 0 : index
    %c32_143 = arith.constant 32 : index
    %514 = vector.load %arg22[%c0_142, %c32_143] : memref<16x64xf32, #tpu.memory_space<vmem>>, vector<2x32xf32>
    tpu.vector_store %arg22[%c0_142, %c32_143], %513 {strides = array<i32>} : memref<16x64xf32, #tpu.memory_space<vmem>>, vector<2x32xf32>,
    %c0_144 = arith.constant 0 : index
    %c0_145 = arith.constant 0 : index
    %515 = vector.load %arg22[%c0_144, %c0_145] : memref<16x64xf32, #tpu.memory_space<vmem>>, vector<16x64xf32>
    %c0_146 = arith.constant 0 : index
    %c0_147 = arith.constant 0 : index
    %516 = vector.load %arg9[%c0_146, %c0_147] : memref<64x96xf32, #tpu.memory_space<vmem>>, vector<64x96xf32>
    %cst_148 = arith.constant dense<0.000000e+00> : vector<16x96xf32>
    %517 = tpu.matmul %515, %516, %cst_148 {dimension_numbers = #tpu.dot_dimension_numbers<[1], [0], [0], [1], [0, 0, 1, 1], [], []>} : vector<16x64xf32>, vector<64x96xf32>, vector<16x96xf32> -> vector<16x96xf32>
    %c0_149 = arith.constant 0 : index
    %c0_150 = arith.constant 0 : index
    %518 = vector.load %arg11[%c0_149, %c0_150] : memref<1x96xf32, #tpu.memory_space<vmem>>, vector<1x96xf32>
    %519 = vector.broadcast %518 : vector<1x96xf32> to vector<16x96xf32>
    %520 = arith.addf %517, %519 : vector<16x96xf32>
    %c0_151 = arith.constant 0 : index
    %c0_152 = arith.constant 0 : index
    %521 = vector.load %arg24[%c0_151, %c0_152] : memref<16x96xf32, #tpu.memory_space<vmem>>, vector<16x96xf32>
    tpu.vector_store %arg24[%c0_151, %c0_152], %520 {strides = array<i32>} : memref<16x96xf32, #tpu.memory_space<vmem>>, vector<16x96xf32>,
    %c0_153 = arith.constant 0 : index
    %c0_154 = arith.constant 0 : index
    %522 = vector.load %arg10[%c0_153, %c0_154] : memref<32x96xf32, #tpu.memory_space<vmem>>, vector<32x96xf32>
    %c0_155 = arith.constant 0 : index
    %c0_156 = arith.constant 0 : index
    %523 = vector.load %arg12[%c0_155, %c0_156] : memref<1x32xf32, #tpu.memory_space<vmem>>, vector<1x32xf32>
    %cst_157 = arith.constant 0.000000e+00 : f32
    %524 = vector.broadcast %cst_157 : f32 to vector<2x32xf32>
    %c0_158 = arith.constant 0 : index
    %c0_159 = arith.constant 0 : index
    %525 = vector.load %arg24[%c0_158, %c0_159] : memref<16x96xf32, #tpu.memory_space<vmem>>, vector<2x96xf32>
    %cst_160 = arith.constant dense<0.000000e+00> : vector<2x96xf32>
    %526 = tpu.matmul %524, %522, %cst_160 {dimension_numbers = #tpu.dot_dimension_numbers<[1], [0], [0], [1], [0, 0, 1, 1], [], []>} : vector<2x32xf32>, vector<32x96xf32>, vector<2x96xf32> -> vector<2x96xf32>
    %527 = vector.extract_strided_slice %525 {offsets = [0, 0], sizes = [2, 32], strides = [1, 1]} : vector<2x96xf32> to vector<2x32xf32>
    %528 = vector.extract_strided_slice %526 {offsets = [0, 0], sizes = [2, 32], strides = [1, 1]} : vector<2x96xf32> to vector<2x32xf32>
    %529 = arith.addf %527, %528 : vector<2x32xf32>
    %530 = arith.negf %529 : vector<2x32xf32>
    %531 = math.exp %530 : vector<2x32xf32>
    %cst_161 = arith.constant 1.000000e+00 : f32
    %532 = vector.broadcast %cst_161 : f32 to vector<2x32xf32>
    %533 = arith.addf %532, %531 : vector<2x32xf32>
    %534 = arith.divf %532, %533 : vector<2x32xf32>
    %535 = vector.extract_strided_slice %525 {offsets = [0, 32], sizes = [2, 32], strides = [1, 1]} : vector<2x96xf32> to vector<2x32xf32>
    %536 = vector.extract_strided_slice %526 {offsets = [0, 32], sizes = [2, 32], strides = [1, 1]} : vector<2x96xf32> to vector<2x32xf32>
    %537 = arith.addf %535, %536 : vector<2x32xf32>
    %538 = arith.negf %537 : vector<2x32xf32>
    %539 = math.exp %538 : vector<2x32xf32>
    %cst_162 = arith.constant 1.000000e+00 : f32
    %540 = vector.broadcast %cst_162 : f32 to vector<2x32xf32>
    %541 = arith.addf %540, %539 : vector<2x32xf32>
    %542 = arith.divf %540, %541 : vector<2x32xf32>
    %543 = vector.extract_strided_slice %525 {offsets = [0, 64], sizes = [2, 32], strides = [1, 1]} : vector<2x96xf32> to vector<2x32xf32>
    %544 = vector.extract_strided_slice %526 {offsets = [0, 64], sizes = [2, 32], strides = [1, 1]} : vector<2x96xf32> to vector<2x32xf32>
    %545 = vector.broadcast %523 : vector<1x32xf32> to vector<2x32xf32>
    %546 = arith.addf %544, %545 : vector<2x32xf32>
    %547 = arith.mulf %534, %546 : vector<2x32xf32>
    %548 = arith.addf %543, %547 : vector<2x32xf32>
    %549 = math.tanh %548 : vector<2x32xf32>
    %cst_163 = arith.constant 1.000000e+00 : f32
    %550 = vector.broadcast %cst_163 : f32 to vector<2x32xf32>
    %551 = arith.subf %550, %542 : vector<2x32xf32>
    %552 = arith.mulf %551, %549 : vector<2x32xf32>
    %553 = arith.mulf %542, %524 : vector<2x32xf32>
    %554 = arith.addf %552, %553 : vector<2x32xf32>
    %c0_164 = arith.constant 0 : index
    %c0_165 = arith.constant 0 : index
    %555 = vector.load %arg23[%c0_164, %c0_165] : memref<16x64xf32, #tpu.memory_space<vmem>>, vector<2x32xf32>
    tpu.vector_store %arg23[%c0_164, %c0_165], %554 {strides = array<i32>} : memref<16x64xf32, #tpu.memory_space<vmem>>, vector<2x32xf32>,
    %c2_166 = arith.constant 2 : index
    %c0_167 = arith.constant 0 : index
    %556 = vector.load %arg24[%c2_166, %c0_167] : memref<16x96xf32, #tpu.memory_space<vmem>>, vector<2x96xf32>
    %cst_168 = arith.constant dense<0.000000e+00> : vector<2x96xf32>
    %557 = tpu.matmul %554, %522, %cst_168 {dimension_numbers = #tpu.dot_dimension_numbers<[1], [0], [0], [1], [0, 0, 1, 1], [], []>} : vector<2x32xf32>, vector<32x96xf32>, vector<2x96xf32> -> vector<2x96xf32>
    %558 = vector.extract_strided_slice %556 {offsets = [0, 0], sizes = [2, 32], strides = [1, 1]} : vector<2x96xf32> to vector<2x32xf32>
    %559 = vector.extract_strided_slice %557 {offsets = [0, 0], sizes = [2, 32], strides = [1, 1]} : vector<2x96xf32> to vector<2x32xf32>
    %560 = arith.addf %558, %559 : vector<2x32xf32>
    %561 = arith.negf %560 : vector<2x32xf32>
    %562 = math.exp %561 : vector<2x32xf32>
    %cst_169 = arith.constant 1.000000e+00 : f32
    %563 = vector.broadcast %cst_169 : f32 to vector<2x32xf32>
    %564 = arith.addf %563, %562 : vector<2x32xf32>
    %565 = arith.divf %563, %564 : vector<2x32xf32>
    %566 = vector.extract_strided_slice %556 {offsets = [0, 32], sizes = [2, 32], strides = [1, 1]} : vector<2x96xf32> to vector<2x32xf32>
    %567 = vector.extract_strided_slice %557 {offsets = [0, 32], sizes = [2, 32], strides = [1, 1]} : vector<2x96xf32> to vector<2x32xf32>
    %568 = arith.addf %566, %567 : vector<2x32xf32>
    %569 = arith.negf %568 : vector<2x32xf32>
    %570 = math.exp %569 : vector<2x32xf32>
    %cst_170 = arith.constant 1.000000e+00 : f32
    %571 = vector.broadcast %cst_170 : f32 to vector<2x32xf32>
    %572 = arith.addf %571, %570 : vector<2x32xf32>
    %573 = arith.divf %571, %572 : vector<2x32xf32>
    %574 = vector.extract_strided_slice %556 {offsets = [0, 64], sizes = [2, 32], strides = [1, 1]} : vector<2x96xf32> to vector<2x32xf32>
    %575 = vector.extract_strided_slice %557 {offsets = [0, 64], sizes = [2, 32], strides = [1, 1]} : vector<2x96xf32> to vector<2x32xf32>
    %576 = vector.broadcast %523 : vector<1x32xf32> to vector<2x32xf32>
    %577 = arith.addf %575, %576 : vector<2x32xf32>
    %578 = arith.mulf %565, %577 : vector<2x32xf32>
    %579 = arith.addf %574, %578 : vector<2x32xf32>
    %580 = math.tanh %579 : vector<2x32xf32>
    %cst_171 = arith.constant 1.000000e+00 : f32
    %581 = vector.broadcast %cst_171 : f32 to vector<2x32xf32>
    %582 = arith.subf %581, %573 : vector<2x32xf32>
    %583 = arith.mulf %582, %580 : vector<2x32xf32>
    %584 = arith.mulf %573, %554 : vector<2x32xf32>
    %585 = arith.addf %583, %584 : vector<2x32xf32>
    %c2_172 = arith.constant 2 : index
    %c0_173 = arith.constant 0 : index
    %586 = vector.load %arg23[%c2_172, %c0_173] : memref<16x64xf32, #tpu.memory_space<vmem>>, vector<2x32xf32>
    tpu.vector_store %arg23[%c2_172, %c0_173], %585 {strides = array<i32>} : memref<16x64xf32, #tpu.memory_space<vmem>>, vector<2x32xf32>,
    %c4_174 = arith.constant 4 : index
    %c0_175 = arith.constant 0 : index
    %587 = vector.load %arg24[%c4_174, %c0_175] : memref<16x96xf32, #tpu.memory_space<vmem>>, vector<2x96xf32>
    %cst_176 = arith.constant dense<0.000000e+00> : vector<2x96xf32>
    %588 = tpu.matmul %585, %522, %cst_176 {dimension_numbers = #tpu.dot_dimension_numbers<[1], [0], [0], [1], [0, 0, 1, 1], [], []>} : vector<2x32xf32>, vector<32x96xf32>, vector<2x96xf32> -> vector<2x96xf32>
    %589 = vector.extract_strided_slice %587 {offsets = [0, 0], sizes = [2, 32], strides = [1, 1]} : vector<2x96xf32> to vector<2x32xf32>
    %590 = vector.extract_strided_slice %588 {offsets = [0, 0], sizes = [2, 32], strides = [1, 1]} : vector<2x96xf32> to vector<2x32xf32>
    %591 = arith.addf %589, %590 : vector<2x32xf32>
    %592 = arith.negf %591 : vector<2x32xf32>
    %593 = math.exp %592 : vector<2x32xf32>
    %cst_177 = arith.constant 1.000000e+00 : f32
    %594 = vector.broadcast %cst_177 : f32 to vector<2x32xf32>
    %595 = arith.addf %594, %593 : vector<2x32xf32>
    %596 = arith.divf %594, %595 : vector<2x32xf32>
    %597 = vector.extract_strided_slice %587 {offsets = [0, 32], sizes = [2, 32], strides = [1, 1]} : vector<2x96xf32> to vector<2x32xf32>
    %598 = vector.extract_strided_slice %588 {offsets = [0, 32], sizes = [2, 32], strides = [1, 1]} : vector<2x96xf32> to vector<2x32xf32>
    %599 = arith.addf %597, %598 : vector<2x32xf32>
    %600 = arith.negf %599 : vector<2x32xf32>
    %601 = math.exp %600 : vector<2x32xf32>
    %cst_178 = arith.constant 1.000000e+00 : f32
    %602 = vector.broadcast %cst_178 : f32 to vector<2x32xf32>
    %603 = arith.addf %602, %601 : vector<2x32xf32>
    %604 = arith.divf %602, %603 : vector<2x32xf32>
    %605 = vector.extract_strided_slice %587 {offsets = [0, 64], sizes = [2, 32], strides = [1, 1]} : vector<2x96xf32> to vector<2x32xf32>
    %606 = vector.extract_strided_slice %588 {offsets = [0, 64], sizes = [2, 32], strides = [1, 1]} : vector<2x96xf32> to vector<2x32xf32>
    %607 = vector.broadcast %523 : vector<1x32xf32> to vector<2x32xf32>
    %608 = arith.addf %606, %607 : vector<2x32xf32>
    %609 = arith.mulf %596, %608 : vector<2x32xf32>
    %610 = arith.addf %605, %609 : vector<2x32xf32>
    %611 = math.tanh %610 : vector<2x32xf32>
    %cst_179 = arith.constant 1.000000e+00 : f32
    %612 = vector.broadcast %cst_179 : f32 to vector<2x32xf32>
    %613 = arith.subf %612, %604 : vector<2x32xf32>
    %614 = arith.mulf %613, %611 : vector<2x32xf32>
    %615 = arith.mulf %604, %585 : vector<2x32xf32>
    %616 = arith.addf %614, %615 : vector<2x32xf32>
    %c4_180 = arith.constant 4 : index
    %c0_181 = arith.constant 0 : index
    %617 = vector.load %arg23[%c4_180, %c0_181] : memref<16x64xf32, #tpu.memory_space<vmem>>, vector<2x32xf32>
    tpu.vector_store %arg23[%c4_180, %c0_181], %616 {strides = array<i32>} : memref<16x64xf32, #tpu.memory_space<vmem>>, vector<2x32xf32>,
    %c6_182 = arith.constant 6 : index
    %c0_183 = arith.constant 0 : index
    %618 = vector.load %arg24[%c6_182, %c0_183] : memref<16x96xf32, #tpu.memory_space<vmem>>, vector<2x96xf32>
    %cst_184 = arith.constant dense<0.000000e+00> : vector<2x96xf32>
    %619 = tpu.matmul %616, %522, %cst_184 {dimension_numbers = #tpu.dot_dimension_numbers<[1], [0], [0], [1], [0, 0, 1, 1], [], []>} : vector<2x32xf32>, vector<32x96xf32>, vector<2x96xf32> -> vector<2x96xf32>
    %620 = vector.extract_strided_slice %618 {offsets = [0, 0], sizes = [2, 32], strides = [1, 1]} : vector<2x96xf32> to vector<2x32xf32>
    %621 = vector.extract_strided_slice %619 {offsets = [0, 0], sizes = [2, 32], strides = [1, 1]} : vector<2x96xf32> to vector<2x32xf32>
    %622 = arith.addf %620, %621 : vector<2x32xf32>
    %623 = arith.negf %622 : vector<2x32xf32>
    %624 = math.exp %623 : vector<2x32xf32>
    %cst_185 = arith.constant 1.000000e+00 : f32
    %625 = vector.broadcast %cst_185 : f32 to vector<2x32xf32>
    %626 = arith.addf %625, %624 : vector<2x32xf32>
    %627 = arith.divf %625, %626 : vector<2x32xf32>
    %628 = vector.extract_strided_slice %618 {offsets = [0, 32], sizes = [2, 32], strides = [1, 1]} : vector<2x96xf32> to vector<2x32xf32>
    %629 = vector.extract_strided_slice %619 {offsets = [0, 32], sizes = [2, 32], strides = [1, 1]} : vector<2x96xf32> to vector<2x32xf32>
    %630 = arith.addf %628, %629 : vector<2x32xf32>
    %631 = arith.negf %630 : vector<2x32xf32>
    %632 = math.exp %631 : vector<2x32xf32>
    %cst_186 = arith.constant 1.000000e+00 : f32
    %633 = vector.broadcast %cst_186 : f32 to vector<2x32xf32>
    %634 = arith.addf %633, %632 : vector<2x32xf32>
    %635 = arith.divf %633, %634 : vector<2x32xf32>
    %636 = vector.extract_strided_slice %618 {offsets = [0, 64], sizes = [2, 32], strides = [1, 1]} : vector<2x96xf32> to vector<2x32xf32>
    %637 = vector.extract_strided_slice %619 {offsets = [0, 64], sizes = [2, 32], strides = [1, 1]} : vector<2x96xf32> to vector<2x32xf32>
    %638 = vector.broadcast %523 : vector<1x32xf32> to vector<2x32xf32>
    %639 = arith.addf %637, %638 : vector<2x32xf32>
    %640 = arith.mulf %627, %639 : vector<2x32xf32>
    %641 = arith.addf %636, %640 : vector<2x32xf32>
    %642 = math.tanh %641 : vector<2x32xf32>
    %cst_187 = arith.constant 1.000000e+00 : f32
    %643 = vector.broadcast %cst_187 : f32 to vector<2x32xf32>
    %644 = arith.subf %643, %635 : vector<2x32xf32>
    %645 = arith.mulf %644, %642 : vector<2x32xf32>
    %646 = arith.mulf %635, %616 : vector<2x32xf32>
    %647 = arith.addf %645, %646 : vector<2x32xf32>
    %c6_188 = arith.constant 6 : index
    %c0_189 = arith.constant 0 : index
    %648 = vector.load %arg23[%c6_188, %c0_189] : memref<16x64xf32, #tpu.memory_space<vmem>>, vector<2x32xf32>
    tpu.vector_store %arg23[%c6_188, %c0_189], %647 {strides = array<i32>} : memref<16x64xf32, #tpu.memory_space<vmem>>, vector<2x32xf32>,
    %c8_190 = arith.constant 8 : index
    %c0_191 = arith.constant 0 : index
    %649 = vector.load %arg24[%c8_190, %c0_191] : memref<16x96xf32, #tpu.memory_space<vmem>>, vector<2x96xf32>
    %cst_192 = arith.constant dense<0.000000e+00> : vector<2x96xf32>
    %650 = tpu.matmul %647, %522, %cst_192 {dimension_numbers = #tpu.dot_dimension_numbers<[1], [0], [0], [1], [0, 0, 1, 1], [], []>} : vector<2x32xf32>, vector<32x96xf32>, vector<2x96xf32> -> vector<2x96xf32>
    %651 = vector.extract_strided_slice %649 {offsets = [0, 0], sizes = [2, 32], strides = [1, 1]} : vector<2x96xf32> to vector<2x32xf32>
    %652 = vector.extract_strided_slice %650 {offsets = [0, 0], sizes = [2, 32], strides = [1, 1]} : vector<2x96xf32> to vector<2x32xf32>
    %653 = arith.addf %651, %652 : vector<2x32xf32>
    %654 = arith.negf %653 : vector<2x32xf32>
    %655 = math.exp %654 : vector<2x32xf32>
    %cst_193 = arith.constant 1.000000e+00 : f32
    %656 = vector.broadcast %cst_193 : f32 to vector<2x32xf32>
    %657 = arith.addf %656, %655 : vector<2x32xf32>
    %658 = arith.divf %656, %657 : vector<2x32xf32>
    %659 = vector.extract_strided_slice %649 {offsets = [0, 32], sizes = [2, 32], strides = [1, 1]} : vector<2x96xf32> to vector<2x32xf32>
    %660 = vector.extract_strided_slice %650 {offsets = [0, 32], sizes = [2, 32], strides = [1, 1]} : vector<2x96xf32> to vector<2x32xf32>
    %661 = arith.addf %659, %660 : vector<2x32xf32>
    %662 = arith.negf %661 : vector<2x32xf32>
    %663 = math.exp %662 : vector<2x32xf32>
    %cst_194 = arith.constant 1.000000e+00 : f32
    %664 = vector.broadcast %cst_194 : f32 to vector<2x32xf32>
    %665 = arith.addf %664, %663 : vector<2x32xf32>
    %666 = arith.divf %664, %665 : vector<2x32xf32>
    %667 = vector.extract_strided_slice %649 {offsets = [0, 64], sizes = [2, 32], strides = [1, 1]} : vector<2x96xf32> to vector<2x32xf32>
    %668 = vector.extract_strided_slice %650 {offsets = [0, 64], sizes = [2, 32], strides = [1, 1]} : vector<2x96xf32> to vector<2x32xf32>
    %669 = vector.broadcast %523 : vector<1x32xf32> to vector<2x32xf32>
    %670 = arith.addf %668, %669 : vector<2x32xf32>
    %671 = arith.mulf %658, %670 : vector<2x32xf32>
    %672 = arith.addf %667, %671 : vector<2x32xf32>
    %673 = math.tanh %672 : vector<2x32xf32>
    %cst_195 = arith.constant 1.000000e+00 : f32
    %674 = vector.broadcast %cst_195 : f32 to vector<2x32xf32>
    %675 = arith.subf %674, %666 : vector<2x32xf32>
    %676 = arith.mulf %675, %673 : vector<2x32xf32>
    %677 = arith.mulf %666, %647 : vector<2x32xf32>
    %678 = arith.addf %676, %677 : vector<2x32xf32>
    %c8_196 = arith.constant 8 : index
    %c0_197 = arith.constant 0 : index
    %679 = vector.load %arg23[%c8_196, %c0_197] : memref<16x64xf32, #tpu.memory_space<vmem>>, vector<2x32xf32>
    tpu.vector_store %arg23[%c8_196, %c0_197], %678 {strides = array<i32>} : memref<16x64xf32, #tpu.memory_space<vmem>>, vector<2x32xf32>,
    %c10_198 = arith.constant 10 : index
    %c0_199 = arith.constant 0 : index
    %680 = vector.load %arg24[%c10_198, %c0_199] : memref<16x96xf32, #tpu.memory_space<vmem>>, vector<2x96xf32>
    %cst_200 = arith.constant dense<0.000000e+00> : vector<2x96xf32>
    %681 = tpu.matmul %678, %522, %cst_200 {dimension_numbers = #tpu.dot_dimension_numbers<[1], [0], [0], [1], [0, 0, 1, 1], [], []>} : vector<2x32xf32>, vector<32x96xf32>, vector<2x96xf32> -> vector<2x96xf32>
    %682 = vector.extract_strided_slice %680 {offsets = [0, 0], sizes = [2, 32], strides = [1, 1]} : vector<2x96xf32> to vector<2x32xf32>
    %683 = vector.extract_strided_slice %681 {offsets = [0, 0], sizes = [2, 32], strides = [1, 1]} : vector<2x96xf32> to vector<2x32xf32>
    %684 = arith.addf %682, %683 : vector<2x32xf32>
    %685 = arith.negf %684 : vector<2x32xf32>
    %686 = math.exp %685 : vector<2x32xf32>
    %cst_201 = arith.constant 1.000000e+00 : f32
    %687 = vector.broadcast %cst_201 : f32 to vector<2x32xf32>
    %688 = arith.addf %687, %686 : vector<2x32xf32>
    %689 = arith.divf %687, %688 : vector<2x32xf32>
    %690 = vector.extract_strided_slice %680 {offsets = [0, 32], sizes = [2, 32], strides = [1, 1]} : vector<2x96xf32> to vector<2x32xf32>
    %691 = vector.extract_strided_slice %681 {offsets = [0, 32], sizes = [2, 32], strides = [1, 1]} : vector<2x96xf32> to vector<2x32xf32>
    %692 = arith.addf %690, %691 : vector<2x32xf32>
    %693 = arith.negf %692 : vector<2x32xf32>
    %694 = math.exp %693 : vector<2x32xf32>
    %cst_202 = arith.constant 1.000000e+00 : f32
    %695 = vector.broadcast %cst_202 : f32 to vector<2x32xf32>
    %696 = arith.addf %695, %694 : vector<2x32xf32>
    %697 = arith.divf %695, %696 : vector<2x32xf32>
    %698 = vector.extract_strided_slice %680 {offsets = [0, 64], sizes = [2, 32], strides = [1, 1]} : vector<2x96xf32> to vector<2x32xf32>
    %699 = vector.extract_strided_slice %681 {offsets = [0, 64], sizes = [2, 32], strides = [1, 1]} : vector<2x96xf32> to vector<2x32xf32>
    %700 = vector.broadcast %523 : vector<1x32xf32> to vector<2x32xf32>
    %701 = arith.addf %699, %700 : vector<2x32xf32>
    %702 = arith.mulf %689, %701 : vector<2x32xf32>
    %703 = arith.addf %698, %702 : vector<2x32xf32>
    %704 = math.tanh %703 : vector<2x32xf32>
    %cst_203 = arith.constant 1.000000e+00 : f32
    %705 = vector.broadcast %cst_203 : f32 to vector<2x32xf32>
    %706 = arith.subf %705, %697 : vector<2x32xf32>
    %707 = arith.mulf %706, %704 : vector<2x32xf32>
    %708 = arith.mulf %697, %678 : vector<2x32xf32>
    %709 = arith.addf %707, %708 : vector<2x32xf32>
    %c10_204 = arith.constant 10 : index
    %c0_205 = arith.constant 0 : index
    %710 = vector.load %arg23[%c10_204, %c0_205] : memref<16x64xf32, #tpu.memory_space<vmem>>, vector<2x32xf32>
    tpu.vector_store %arg23[%c10_204, %c0_205], %709 {strides = array<i32>} : memref<16x64xf32, #tpu.memory_space<vmem>>, vector<2x32xf32>,
    %c12_206 = arith.constant 12 : index
    %c0_207 = arith.constant 0 : index
    %711 = vector.load %arg24[%c12_206, %c0_207] : memref<16x96xf32, #tpu.memory_space<vmem>>, vector<2x96xf32>
    %cst_208 = arith.constant dense<0.000000e+00> : vector<2x96xf32>
    %712 = tpu.matmul %709, %522, %cst_208 {dimension_numbers = #tpu.dot_dimension_numbers<[1], [0], [0], [1], [0, 0, 1, 1], [], []>} : vector<2x32xf32>, vector<32x96xf32>, vector<2x96xf32> -> vector<2x96xf32>
    %713 = vector.extract_strided_slice %711 {offsets = [0, 0], sizes = [2, 32], strides = [1, 1]} : vector<2x96xf32> to vector<2x32xf32>
    %714 = vector.extract_strided_slice %712 {offsets = [0, 0], sizes = [2, 32], strides = [1, 1]} : vector<2x96xf32> to vector<2x32xf32>
    %715 = arith.addf %713, %714 : vector<2x32xf32>
    %716 = arith.negf %715 : vector<2x32xf32>
    %717 = math.exp %716 : vector<2x32xf32>
    %cst_209 = arith.constant 1.000000e+00 : f32
    %718 = vector.broadcast %cst_209 : f32 to vector<2x32xf32>
    %719 = arith.addf %718, %717 : vector<2x32xf32>
    %720 = arith.divf %718, %719 : vector<2x32xf32>
    %721 = vector.extract_strided_slice %711 {offsets = [0, 32], sizes = [2, 32], strides = [1, 1]} : vector<2x96xf32> to vector<2x32xf32>
    %722 = vector.extract_strided_slice %712 {offsets = [0, 32], sizes = [2, 32], strides = [1, 1]} : vector<2x96xf32> to vector<2x32xf32>
    %723 = arith.addf %721, %722 : vector<2x32xf32>
    %724 = arith.negf %723 : vector<2x32xf32>
    %725 = math.exp %724 : vector<2x32xf32>
    %cst_210 = arith.constant 1.000000e+00 : f32
    %726 = vector.broadcast %cst_210 : f32 to vector<2x32xf32>
    %727 = arith.addf %726, %725 : vector<2x32xf32>
    %728 = arith.divf %726, %727 : vector<2x32xf32>
    %729 = vector.extract_strided_slice %711 {offsets = [0, 64], sizes = [2, 32], strides = [1, 1]} : vector<2x96xf32> to vector<2x32xf32>
    %730 = vector.extract_strided_slice %712 {offsets = [0, 64], sizes = [2, 32], strides = [1, 1]} : vector<2x96xf32> to vector<2x32xf32>
    %731 = vector.broadcast %523 : vector<1x32xf32> to vector<2x32xf32>
    %732 = arith.addf %730, %731 : vector<2x32xf32>
    %733 = arith.mulf %720, %732 : vector<2x32xf32>
    %734 = arith.addf %729, %733 : vector<2x32xf32>
    %735 = math.tanh %734 : vector<2x32xf32>
    %cst_211 = arith.constant 1.000000e+00 : f32
    %736 = vector.broadcast %cst_211 : f32 to vector<2x32xf32>
    %737 = arith.subf %736, %728 : vector<2x32xf32>
    %738 = arith.mulf %737, %735 : vector<2x32xf32>
    %739 = arith.mulf %728, %709 : vector<2x32xf32>
    %740 = arith.addf %738, %739 : vector<2x32xf32>
    %c12_212 = arith.constant 12 : index
    %c0_213 = arith.constant 0 : index
    %741 = vector.load %arg23[%c12_212, %c0_213] : memref<16x64xf32, #tpu.memory_space<vmem>>, vector<2x32xf32>
    tpu.vector_store %arg23[%c12_212, %c0_213], %740 {strides = array<i32>} : memref<16x64xf32, #tpu.memory_space<vmem>>, vector<2x32xf32>,
    %c14_214 = arith.constant 14 : index
    %c0_215 = arith.constant 0 : index
    %742 = vector.load %arg24[%c14_214, %c0_215] : memref<16x96xf32, #tpu.memory_space<vmem>>, vector<2x96xf32>
    %cst_216 = arith.constant dense<0.000000e+00> : vector<2x96xf32>
    %743 = tpu.matmul %740, %522, %cst_216 {dimension_numbers = #tpu.dot_dimension_numbers<[1], [0], [0], [1], [0, 0, 1, 1], [], []>} : vector<2x32xf32>, vector<32x96xf32>, vector<2x96xf32> -> vector<2x96xf32>
    %744 = vector.extract_strided_slice %742 {offsets = [0, 0], sizes = [2, 32], strides = [1, 1]} : vector<2x96xf32> to vector<2x32xf32>
    %745 = vector.extract_strided_slice %743 {offsets = [0, 0], sizes = [2, 32], strides = [1, 1]} : vector<2x96xf32> to vector<2x32xf32>
    %746 = arith.addf %744, %745 : vector<2x32xf32>
    %747 = arith.negf %746 : vector<2x32xf32>
    %748 = math.exp %747 : vector<2x32xf32>
    %cst_217 = arith.constant 1.000000e+00 : f32
    %749 = vector.broadcast %cst_217 : f32 to vector<2x32xf32>
    %750 = arith.addf %749, %748 : vector<2x32xf32>
    %751 = arith.divf %749, %750 : vector<2x32xf32>
    %752 = vector.extract_strided_slice %742 {offsets = [0, 32], sizes = [2, 32], strides = [1, 1]} : vector<2x96xf32> to vector<2x32xf32>
    %753 = vector.extract_strided_slice %743 {offsets = [0, 32], sizes = [2, 32], strides = [1, 1]} : vector<2x96xf32> to vector<2x32xf32>
    %754 = arith.addf %752, %753 : vector<2x32xf32>
    %755 = arith.negf %754 : vector<2x32xf32>
    %756 = math.exp %755 : vector<2x32xf32>
    %cst_218 = arith.constant 1.000000e+00 : f32
    %757 = vector.broadcast %cst_218 : f32 to vector<2x32xf32>
    %758 = arith.addf %757, %756 : vector<2x32xf32>
    %759 = arith.divf %757, %758 : vector<2x32xf32>
    %760 = vector.extract_strided_slice %742 {offsets = [0, 64], sizes = [2, 32], strides = [1, 1]} : vector<2x96xf32> to vector<2x32xf32>
    %761 = vector.extract_strided_slice %743 {offsets = [0, 64], sizes = [2, 32], strides = [1, 1]} : vector<2x96xf32> to vector<2x32xf32>
    %762 = vector.broadcast %523 : vector<1x32xf32> to vector<2x32xf32>
    %763 = arith.addf %761, %762 : vector<2x32xf32>
    %764 = arith.mulf %751, %763 : vector<2x32xf32>
    %765 = arith.addf %760, %764 : vector<2x32xf32>
    %766 = math.tanh %765 : vector<2x32xf32>
    %cst_219 = arith.constant 1.000000e+00 : f32
    %767 = vector.broadcast %cst_219 : f32 to vector<2x32xf32>
    %768 = arith.subf %767, %759 : vector<2x32xf32>
    %769 = arith.mulf %768, %766 : vector<2x32xf32>
    %770 = arith.mulf %759, %740 : vector<2x32xf32>
    %771 = arith.addf %769, %770 : vector<2x32xf32>
    %c14_220 = arith.constant 14 : index
    %c0_221 = arith.constant 0 : index
    %772 = vector.load %arg23[%c14_220, %c0_221] : memref<16x64xf32, #tpu.memory_space<vmem>>, vector<2x32xf32>
    tpu.vector_store %arg23[%c14_220, %c0_221], %771 {strides = array<i32>} : memref<16x64xf32, #tpu.memory_space<vmem>>, vector<2x32xf32>,
    %c0_222 = arith.constant 0 : index
    %c0_223 = arith.constant 0 : index
    %773 = vector.load %arg13[%c0_222, %c0_223] : memref<64x96xf32, #tpu.memory_space<vmem>>, vector<64x96xf32>
    %cst_224 = arith.constant dense<0.000000e+00> : vector<16x96xf32>
    %774 = tpu.matmul %515, %773, %cst_224 {dimension_numbers = #tpu.dot_dimension_numbers<[1], [0], [0], [1], [0, 0, 1, 1], [], []>} : vector<16x64xf32>, vector<64x96xf32>, vector<16x96xf32> -> vector<16x96xf32>
    %c0_225 = arith.constant 0 : index
    %c0_226 = arith.constant 0 : index
    %775 = vector.load %arg15[%c0_225, %c0_226] : memref<1x96xf32, #tpu.memory_space<vmem>>, vector<1x96xf32>
    %776 = vector.broadcast %775 : vector<1x96xf32> to vector<16x96xf32>
    %777 = arith.addf %774, %776 : vector<16x96xf32>
    %c0_227 = arith.constant 0 : index
    %c0_228 = arith.constant 0 : index
    %778 = vector.load %arg24[%c0_227, %c0_228] : memref<16x96xf32, #tpu.memory_space<vmem>>, vector<16x96xf32>
    tpu.vector_store %arg24[%c0_227, %c0_228], %777 {strides = array<i32>} : memref<16x96xf32, #tpu.memory_space<vmem>>, vector<16x96xf32>,
    %c0_229 = arith.constant 0 : index
    %c0_230 = arith.constant 0 : index
    %779 = vector.load %arg14[%c0_229, %c0_230] : memref<32x96xf32, #tpu.memory_space<vmem>>, vector<32x96xf32>
    %c0_231 = arith.constant 0 : index
    %c0_232 = arith.constant 0 : index
    %780 = vector.load %arg16[%c0_231, %c0_232] : memref<1x32xf32, #tpu.memory_space<vmem>>, vector<1x32xf32>
    %cst_233 = arith.constant 0.000000e+00 : f32
    %781 = vector.broadcast %cst_233 : f32 to vector<2x32xf32>
    %c14_234 = arith.constant 14 : index
    %c0_235 = arith.constant 0 : index
    %782 = vector.load %arg24[%c14_234, %c0_235] : memref<16x96xf32, #tpu.memory_space<vmem>>, vector<2x96xf32>
    %cst_236 = arith.constant dense<0.000000e+00> : vector<2x96xf32>
    %783 = tpu.matmul %781, %779, %cst_236 {dimension_numbers = #tpu.dot_dimension_numbers<[1], [0], [0], [1], [0, 0, 1, 1], [], []>} : vector<2x32xf32>, vector<32x96xf32>, vector<2x96xf32> -> vector<2x96xf32>
    %784 = vector.extract_strided_slice %782 {offsets = [0, 0], sizes = [2, 32], strides = [1, 1]} : vector<2x96xf32> to vector<2x32xf32>
    %785 = vector.extract_strided_slice %783 {offsets = [0, 0], sizes = [2, 32], strides = [1, 1]} : vector<2x96xf32> to vector<2x32xf32>
    %786 = arith.addf %784, %785 : vector<2x32xf32>
    %787 = arith.negf %786 : vector<2x32xf32>
    %788 = math.exp %787 : vector<2x32xf32>
    %cst_237 = arith.constant 1.000000e+00 : f32
    %789 = vector.broadcast %cst_237 : f32 to vector<2x32xf32>
    %790 = arith.addf %789, %788 : vector<2x32xf32>
    %791 = arith.divf %789, %790 : vector<2x32xf32>
    %792 = vector.extract_strided_slice %782 {offsets = [0, 32], sizes = [2, 32], strides = [1, 1]} : vector<2x96xf32> to vector<2x32xf32>
    %793 = vector.extract_strided_slice %783 {offsets = [0, 32], sizes = [2, 32], strides = [1, 1]} : vector<2x96xf32> to vector<2x32xf32>
    %794 = arith.addf %792, %793 : vector<2x32xf32>
    %795 = arith.negf %794 : vector<2x32xf32>
    %796 = math.exp %795 : vector<2x32xf32>
    %cst_238 = arith.constant 1.000000e+00 : f32
    %797 = vector.broadcast %cst_238 : f32 to vector<2x32xf32>
    %798 = arith.addf %797, %796 : vector<2x32xf32>
    %799 = arith.divf %797, %798 : vector<2x32xf32>
    %800 = vector.extract_strided_slice %782 {offsets = [0, 64], sizes = [2, 32], strides = [1, 1]} : vector<2x96xf32> to vector<2x32xf32>
    %801 = vector.extract_strided_slice %783 {offsets = [0, 64], sizes = [2, 32], strides = [1, 1]} : vector<2x96xf32> to vector<2x32xf32>
    %802 = vector.broadcast %780 : vector<1x32xf32> to vector<2x32xf32>
    %803 = arith.addf %801, %802 : vector<2x32xf32>
    %804 = arith.mulf %791, %803 : vector<2x32xf32>
    %805 = arith.addf %800, %804 : vector<2x32xf32>
    %806 = math.tanh %805 : vector<2x32xf32>
    %cst_239 = arith.constant 1.000000e+00 : f32
    %807 = vector.broadcast %cst_239 : f32 to vector<2x32xf32>
    %808 = arith.subf %807, %799 : vector<2x32xf32>
    %809 = arith.mulf %808, %806 : vector<2x32xf32>
    %810 = arith.mulf %799, %781 : vector<2x32xf32>
    %811 = arith.addf %809, %810 : vector<2x32xf32>
    %c14_240 = arith.constant 14 : index
    %c32_241 = arith.constant 32 : index
    %812 = vector.load %arg23[%c14_240, %c32_241] : memref<16x64xf32, #tpu.memory_space<vmem>>, vector<2x32xf32>
    tpu.vector_store %arg23[%c14_240, %c32_241], %811 {strides = array<i32>} : memref<16x64xf32, #tpu.memory_space<vmem>>, vector<2x32xf32>,
    %c12_242 = arith.constant 12 : index
    %c0_243 = arith.constant 0 : index
    %813 = vector.load %arg24[%c12_242, %c0_243] : memref<16x96xf32, #tpu.memory_space<vmem>>, vector<2x96xf32>
    %cst_244 = arith.constant dense<0.000000e+00> : vector<2x96xf32>
    %814 = tpu.matmul %811, %779, %cst_244 {dimension_numbers = #tpu.dot_dimension_numbers<[1], [0], [0], [1], [0, 0, 1, 1], [], []>} : vector<2x32xf32>, vector<32x96xf32>, vector<2x96xf32> -> vector<2x96xf32>
    %815 = vector.extract_strided_slice %813 {offsets = [0, 0], sizes = [2, 32], strides = [1, 1]} : vector<2x96xf32> to vector<2x32xf32>
    %816 = vector.extract_strided_slice %814 {offsets = [0, 0], sizes = [2, 32], strides = [1, 1]} : vector<2x96xf32> to vector<2x32xf32>
    %817 = arith.addf %815, %816 : vector<2x32xf32>
    %818 = arith.negf %817 : vector<2x32xf32>
    %819 = math.exp %818 : vector<2x32xf32>
    %cst_245 = arith.constant 1.000000e+00 : f32
    %820 = vector.broadcast %cst_245 : f32 to vector<2x32xf32>
    %821 = arith.addf %820, %819 : vector<2x32xf32>
    %822 = arith.divf %820, %821 : vector<2x32xf32>
    %823 = vector.extract_strided_slice %813 {offsets = [0, 32], sizes = [2, 32], strides = [1, 1]} : vector<2x96xf32> to vector<2x32xf32>
    %824 = vector.extract_strided_slice %814 {offsets = [0, 32], sizes = [2, 32], strides = [1, 1]} : vector<2x96xf32> to vector<2x32xf32>
    %825 = arith.addf %823, %824 : vector<2x32xf32>
    %826 = arith.negf %825 : vector<2x32xf32>
    %827 = math.exp %826 : vector<2x32xf32>
    %cst_246 = arith.constant 1.000000e+00 : f32
    %828 = vector.broadcast %cst_246 : f32 to vector<2x32xf32>
    %829 = arith.addf %828, %827 : vector<2x32xf32>
    %830 = arith.divf %828, %829 : vector<2x32xf32>
    %831 = vector.extract_strided_slice %813 {offsets = [0, 64], sizes = [2, 32], strides = [1, 1]} : vector<2x96xf32> to vector<2x32xf32>
    %832 = vector.extract_strided_slice %814 {offsets = [0, 64], sizes = [2, 32], strides = [1, 1]} : vector<2x96xf32> to vector<2x32xf32>
    %833 = vector.broadcast %780 : vector<1x32xf32> to vector<2x32xf32>
    %834 = arith.addf %832, %833 : vector<2x32xf32>
    %835 = arith.mulf %822, %834 : vector<2x32xf32>
    %836 = arith.addf %831, %835 : vector<2x32xf32>
    %837 = math.tanh %836 : vector<2x32xf32>
    %cst_247 = arith.constant 1.000000e+00 : f32
    %838 = vector.broadcast %cst_247 : f32 to vector<2x32xf32>
    %839 = arith.subf %838, %830 : vector<2x32xf32>
    %840 = arith.mulf %839, %837 : vector<2x32xf32>
    %841 = arith.mulf %830, %811 : vector<2x32xf32>
    %842 = arith.addf %840, %841 : vector<2x32xf32>
    %c12_248 = arith.constant 12 : index
    %c32_249 = arith.constant 32 : index
    %843 = vector.load %arg23[%c12_248, %c32_249] : memref<16x64xf32, #tpu.memory_space<vmem>>, vector<2x32xf32>
    tpu.vector_store %arg23[%c12_248, %c32_249], %842 {strides = array<i32>} : memref<16x64xf32, #tpu.memory_space<vmem>>, vector<2x32xf32>,
    %c10_250 = arith.constant 10 : index
    %c0_251 = arith.constant 0 : index
    %844 = vector.load %arg24[%c10_250, %c0_251] : memref<16x96xf32, #tpu.memory_space<vmem>>, vector<2x96xf32>
    %cst_252 = arith.constant dense<0.000000e+00> : vector<2x96xf32>
    %845 = tpu.matmul %842, %779, %cst_252 {dimension_numbers = #tpu.dot_dimension_numbers<[1], [0], [0], [1], [0, 0, 1, 1], [], []>} : vector<2x32xf32>, vector<32x96xf32>, vector<2x96xf32> -> vector<2x96xf32>
    %846 = vector.extract_strided_slice %844 {offsets = [0, 0], sizes = [2, 32], strides = [1, 1]} : vector<2x96xf32> to vector<2x32xf32>
    %847 = vector.extract_strided_slice %845 {offsets = [0, 0], sizes = [2, 32], strides = [1, 1]} : vector<2x96xf32> to vector<2x32xf32>
    %848 = arith.addf %846, %847 : vector<2x32xf32>
    %849 = arith.negf %848 : vector<2x32xf32>
    %850 = math.exp %849 : vector<2x32xf32>
    %cst_253 = arith.constant 1.000000e+00 : f32
    %851 = vector.broadcast %cst_253 : f32 to vector<2x32xf32>
    %852 = arith.addf %851, %850 : vector<2x32xf32>
    %853 = arith.divf %851, %852 : vector<2x32xf32>
    %854 = vector.extract_strided_slice %844 {offsets = [0, 32], sizes = [2, 32], strides = [1, 1]} : vector<2x96xf32> to vector<2x32xf32>
    %855 = vector.extract_strided_slice %845 {offsets = [0, 32], sizes = [2, 32], strides = [1, 1]} : vector<2x96xf32> to vector<2x32xf32>
    %856 = arith.addf %854, %855 : vector<2x32xf32>
    %857 = arith.negf %856 : vector<2x32xf32>
    %858 = math.exp %857 : vector<2x32xf32>
    %cst_254 = arith.constant 1.000000e+00 : f32
    %859 = vector.broadcast %cst_254 : f32 to vector<2x32xf32>
    %860 = arith.addf %859, %858 : vector<2x32xf32>
    %861 = arith.divf %859, %860 : vector<2x32xf32>
    %862 = vector.extract_strided_slice %844 {offsets = [0, 64], sizes = [2, 32], strides = [1, 1]} : vector<2x96xf32> to vector<2x32xf32>
    %863 = vector.extract_strided_slice %845 {offsets = [0, 64], sizes = [2, 32], strides = [1, 1]} : vector<2x96xf32> to vector<2x32xf32>
    %864 = vector.broadcast %780 : vector<1x32xf32> to vector<2x32xf32>
    %865 = arith.addf %863, %864 : vector<2x32xf32>
    %866 = arith.mulf %853, %865 : vector<2x32xf32>
    %867 = arith.addf %862, %866 : vector<2x32xf32>
    %868 = math.tanh %867 : vector<2x32xf32>
    %cst_255 = arith.constant 1.000000e+00 : f32
    %869 = vector.broadcast %cst_255 : f32 to vector<2x32xf32>
    %870 = arith.subf %869, %861 : vector<2x32xf32>
    %871 = arith.mulf %870, %868 : vector<2x32xf32>
    %872 = arith.mulf %861, %842 : vector<2x32xf32>
    %873 = arith.addf %871, %872 : vector<2x32xf32>
    %c10_256 = arith.constant 10 : index
    %c32_257 = arith.constant 32 : index
    %874 = vector.load %arg23[%c10_256, %c32_257] : memref<16x64xf32, #tpu.memory_space<vmem>>, vector<2x32xf32>
    tpu.vector_store %arg23[%c10_256, %c32_257], %873 {strides = array<i32>} : memref<16x64xf32, #tpu.memory_space<vmem>>, vector<2x32xf32>,
    %c8_258 = arith.constant 8 : index
    %c0_259 = arith.constant 0 : index
    %875 = vector.load %arg24[%c8_258, %c0_259] : memref<16x96xf32, #tpu.memory_space<vmem>>, vector<2x96xf32>
    %cst_260 = arith.constant dense<0.000000e+00> : vector<2x96xf32>
    %876 = tpu.matmul %873, %779, %cst_260 {dimension_numbers = #tpu.dot_dimension_numbers<[1], [0], [0], [1], [0, 0, 1, 1], [], []>} : vector<2x32xf32>, vector<32x96xf32>, vector<2x96xf32> -> vector<2x96xf32>
    %877 = vector.extract_strided_slice %875 {offsets = [0, 0], sizes = [2, 32], strides = [1, 1]} : vector<2x96xf32> to vector<2x32xf32>
    %878 = vector.extract_strided_slice %876 {offsets = [0, 0], sizes = [2, 32], strides = [1, 1]} : vector<2x96xf32> to vector<2x32xf32>
    %879 = arith.addf %877, %878 : vector<2x32xf32>
    %880 = arith.negf %879 : vector<2x32xf32>
    %881 = math.exp %880 : vector<2x32xf32>
    %cst_261 = arith.constant 1.000000e+00 : f32
    %882 = vector.broadcast %cst_261 : f32 to vector<2x32xf32>
    %883 = arith.addf %882, %881 : vector<2x32xf32>
    %884 = arith.divf %882, %883 : vector<2x32xf32>
    %885 = vector.extract_strided_slice %875 {offsets = [0, 32], sizes = [2, 32], strides = [1, 1]} : vector<2x96xf32> to vector<2x32xf32>
    %886 = vector.extract_strided_slice %876 {offsets = [0, 32], sizes = [2, 32], strides = [1, 1]} : vector<2x96xf32> to vector<2x32xf32>
    %887 = arith.addf %885, %886 : vector<2x32xf32>
    %888 = arith.negf %887 : vector<2x32xf32>
    %889 = math.exp %888 : vector<2x32xf32>
    %cst_262 = arith.constant 1.000000e+00 : f32
    %890 = vector.broadcast %cst_262 : f32 to vector<2x32xf32>
    %891 = arith.addf %890, %889 : vector<2x32xf32>
    %892 = arith.divf %890, %891 : vector<2x32xf32>
    %893 = vector.extract_strided_slice %875 {offsets = [0, 64], sizes = [2, 32], strides = [1, 1]} : vector<2x96xf32> to vector<2x32xf32>
    %894 = vector.extract_strided_slice %876 {offsets = [0, 64], sizes = [2, 32], strides = [1, 1]} : vector<2x96xf32> to vector<2x32xf32>
    %895 = vector.broadcast %780 : vector<1x32xf32> to vector<2x32xf32>
    %896 = arith.addf %894, %895 : vector<2x32xf32>
    %897 = arith.mulf %884, %896 : vector<2x32xf32>
    %898 = arith.addf %893, %897 : vector<2x32xf32>
    %899 = math.tanh %898 : vector<2x32xf32>
    %cst_263 = arith.constant 1.000000e+00 : f32
    %900 = vector.broadcast %cst_263 : f32 to vector<2x32xf32>
    %901 = arith.subf %900, %892 : vector<2x32xf32>
    %902 = arith.mulf %901, %899 : vector<2x32xf32>
    %903 = arith.mulf %892, %873 : vector<2x32xf32>
    %904 = arith.addf %902, %903 : vector<2x32xf32>
    %c8_264 = arith.constant 8 : index
    %c32_265 = arith.constant 32 : index
    %905 = vector.load %arg23[%c8_264, %c32_265] : memref<16x64xf32, #tpu.memory_space<vmem>>, vector<2x32xf32>
    tpu.vector_store %arg23[%c8_264, %c32_265], %904 {strides = array<i32>} : memref<16x64xf32, #tpu.memory_space<vmem>>, vector<2x32xf32>,
    %c6_266 = arith.constant 6 : index
    %c0_267 = arith.constant 0 : index
    %906 = vector.load %arg24[%c6_266, %c0_267] : memref<16x96xf32, #tpu.memory_space<vmem>>, vector<2x96xf32>
    %cst_268 = arith.constant dense<0.000000e+00> : vector<2x96xf32>
    %907 = tpu.matmul %904, %779, %cst_268 {dimension_numbers = #tpu.dot_dimension_numbers<[1], [0], [0], [1], [0, 0, 1, 1], [], []>} : vector<2x32xf32>, vector<32x96xf32>, vector<2x96xf32> -> vector<2x96xf32>
    %908 = vector.extract_strided_slice %906 {offsets = [0, 0], sizes = [2, 32], strides = [1, 1]} : vector<2x96xf32> to vector<2x32xf32>
    %909 = vector.extract_strided_slice %907 {offsets = [0, 0], sizes = [2, 32], strides = [1, 1]} : vector<2x96xf32> to vector<2x32xf32>
    %910 = arith.addf %908, %909 : vector<2x32xf32>
    %911 = arith.negf %910 : vector<2x32xf32>
    %912 = math.exp %911 : vector<2x32xf32>
    %cst_269 = arith.constant 1.000000e+00 : f32
    %913 = vector.broadcast %cst_269 : f32 to vector<2x32xf32>
    %914 = arith.addf %913, %912 : vector<2x32xf32>
    %915 = arith.divf %913, %914 : vector<2x32xf32>
    %916 = vector.extract_strided_slice %906 {offsets = [0, 32], sizes = [2, 32], strides = [1, 1]} : vector<2x96xf32> to vector<2x32xf32>
    %917 = vector.extract_strided_slice %907 {offsets = [0, 32], sizes = [2, 32], strides = [1, 1]} : vector<2x96xf32> to vector<2x32xf32>
    %918 = arith.addf %916, %917 : vector<2x32xf32>
    %919 = arith.negf %918 : vector<2x32xf32>
    %920 = math.exp %919 : vector<2x32xf32>
    %cst_270 = arith.constant 1.000000e+00 : f32
    %921 = vector.broadcast %cst_270 : f32 to vector<2x32xf32>
    %922 = arith.addf %921, %920 : vector<2x32xf32>
    %923 = arith.divf %921, %922 : vector<2x32xf32>
    %924 = vector.extract_strided_slice %906 {offsets = [0, 64], sizes = [2, 32], strides = [1, 1]} : vector<2x96xf32> to vector<2x32xf32>
    %925 = vector.extract_strided_slice %907 {offsets = [0, 64], sizes = [2, 32], strides = [1, 1]} : vector<2x96xf32> to vector<2x32xf32>
    %926 = vector.broadcast %780 : vector<1x32xf32> to vector<2x32xf32>
    %927 = arith.addf %925, %926 : vector<2x32xf32>
    %928 = arith.mulf %915, %927 : vector<2x32xf32>
    %929 = arith.addf %924, %928 : vector<2x32xf32>
    %930 = math.tanh %929 : vector<2x32xf32>
    %cst_271 = arith.constant 1.000000e+00 : f32
    %931 = vector.broadcast %cst_271 : f32 to vector<2x32xf32>
    %932 = arith.subf %931, %923 : vector<2x32xf32>
    %933 = arith.mulf %932, %930 : vector<2x32xf32>
    %934 = arith.mulf %923, %904 : vector<2x32xf32>
    %935 = arith.addf %933, %934 : vector<2x32xf32>
    %c6_272 = arith.constant 6 : index
    %c32_273 = arith.constant 32 : index
    %936 = vector.load %arg23[%c6_272, %c32_273] : memref<16x64xf32, #tpu.memory_space<vmem>>, vector<2x32xf32>
    tpu.vector_store %arg23[%c6_272, %c32_273], %935 {strides = array<i32>} : memref<16x64xf32, #tpu.memory_space<vmem>>, vector<2x32xf32>,
    %c4_274 = arith.constant 4 : index
    %c0_275 = arith.constant 0 : index
    %937 = vector.load %arg24[%c4_274, %c0_275] : memref<16x96xf32, #tpu.memory_space<vmem>>, vector<2x96xf32>
    %cst_276 = arith.constant dense<0.000000e+00> : vector<2x96xf32>
    %938 = tpu.matmul %935, %779, %cst_276 {dimension_numbers = #tpu.dot_dimension_numbers<[1], [0], [0], [1], [0, 0, 1, 1], [], []>} : vector<2x32xf32>, vector<32x96xf32>, vector<2x96xf32> -> vector<2x96xf32>
    %939 = vector.extract_strided_slice %937 {offsets = [0, 0], sizes = [2, 32], strides = [1, 1]} : vector<2x96xf32> to vector<2x32xf32>
    %940 = vector.extract_strided_slice %938 {offsets = [0, 0], sizes = [2, 32], strides = [1, 1]} : vector<2x96xf32> to vector<2x32xf32>
    %941 = arith.addf %939, %940 : vector<2x32xf32>
    %942 = arith.negf %941 : vector<2x32xf32>
    %943 = math.exp %942 : vector<2x32xf32>
    %cst_277 = arith.constant 1.000000e+00 : f32
    %944 = vector.broadcast %cst_277 : f32 to vector<2x32xf32>
    %945 = arith.addf %944, %943 : vector<2x32xf32>
    %946 = arith.divf %944, %945 : vector<2x32xf32>
    %947 = vector.extract_strided_slice %937 {offsets = [0, 32], sizes = [2, 32], strides = [1, 1]} : vector<2x96xf32> to vector<2x32xf32>
    %948 = vector.extract_strided_slice %938 {offsets = [0, 32], sizes = [2, 32], strides = [1, 1]} : vector<2x96xf32> to vector<2x32xf32>
    %949 = arith.addf %947, %948 : vector<2x32xf32>
    %950 = arith.negf %949 : vector<2x32xf32>
    %951 = math.exp %950 : vector<2x32xf32>
    %cst_278 = arith.constant 1.000000e+00 : f32
    %952 = vector.broadcast %cst_278 : f32 to vector<2x32xf32>
    %953 = arith.addf %952, %951 : vector<2x32xf32>
    %954 = arith.divf %952, %953 : vector<2x32xf32>
    %955 = vector.extract_strided_slice %937 {offsets = [0, 64], sizes = [2, 32], strides = [1, 1]} : vector<2x96xf32> to vector<2x32xf32>
    %956 = vector.extract_strided_slice %938 {offsets = [0, 64], sizes = [2, 32], strides = [1, 1]} : vector<2x96xf32> to vector<2x32xf32>
    %957 = vector.broadcast %780 : vector<1x32xf32> to vector<2x32xf32>
    %958 = arith.addf %956, %957 : vector<2x32xf32>
    %959 = arith.mulf %946, %958 : vector<2x32xf32>
    %960 = arith.addf %955, %959 : vector<2x32xf32>
    %961 = math.tanh %960 : vector<2x32xf32>
    %cst_279 = arith.constant 1.000000e+00 : f32
    %962 = vector.broadcast %cst_279 : f32 to vector<2x32xf32>
    %963 = arith.subf %962, %954 : vector<2x32xf32>
    %964 = arith.mulf %963, %961 : vector<2x32xf32>
    %965 = arith.mulf %954, %935 : vector<2x32xf32>
    %966 = arith.addf %964, %965 : vector<2x32xf32>
    %c4_280 = arith.constant 4 : index
    %c32_281 = arith.constant 32 : index
    %967 = vector.load %arg23[%c4_280, %c32_281] : memref<16x64xf32, #tpu.memory_space<vmem>>, vector<2x32xf32>
    tpu.vector_store %arg23[%c4_280, %c32_281], %966 {strides = array<i32>} : memref<16x64xf32, #tpu.memory_space<vmem>>, vector<2x32xf32>,
    %c2_282 = arith.constant 2 : index
    %c0_283 = arith.constant 0 : index
    %968 = vector.load %arg24[%c2_282, %c0_283] : memref<16x96xf32, #tpu.memory_space<vmem>>, vector<2x96xf32>
    %cst_284 = arith.constant dense<0.000000e+00> : vector<2x96xf32>
    %969 = tpu.matmul %966, %779, %cst_284 {dimension_numbers = #tpu.dot_dimension_numbers<[1], [0], [0], [1], [0, 0, 1, 1], [], []>} : vector<2x32xf32>, vector<32x96xf32>, vector<2x96xf32> -> vector<2x96xf32>
    %970 = vector.extract_strided_slice %968 {offsets = [0, 0], sizes = [2, 32], strides = [1, 1]} : vector<2x96xf32> to vector<2x32xf32>
    %971 = vector.extract_strided_slice %969 {offsets = [0, 0], sizes = [2, 32], strides = [1, 1]} : vector<2x96xf32> to vector<2x32xf32>
    %972 = arith.addf %970, %971 : vector<2x32xf32>
    %973 = arith.negf %972 : vector<2x32xf32>
    %974 = math.exp %973 : vector<2x32xf32>
    %cst_285 = arith.constant 1.000000e+00 : f32
    %975 = vector.broadcast %cst_285 : f32 to vector<2x32xf32>
    %976 = arith.addf %975, %974 : vector<2x32xf32>
    %977 = arith.divf %975, %976 : vector<2x32xf32>
    %978 = vector.extract_strided_slice %968 {offsets = [0, 32], sizes = [2, 32], strides = [1, 1]} : vector<2x96xf32> to vector<2x32xf32>
    %979 = vector.extract_strided_slice %969 {offsets = [0, 32], sizes = [2, 32], strides = [1, 1]} : vector<2x96xf32> to vector<2x32xf32>
    %980 = arith.addf %978, %979 : vector<2x32xf32>
    %981 = arith.negf %980 : vector<2x32xf32>
    %982 = math.exp %981 : vector<2x32xf32>
    %cst_286 = arith.constant 1.000000e+00 : f32
    %983 = vector.broadcast %cst_286 : f32 to vector<2x32xf32>
    %984 = arith.addf %983, %982 : vector<2x32xf32>
    %985 = arith.divf %983, %984 : vector<2x32xf32>
    %986 = vector.extract_strided_slice %968 {offsets = [0, 64], sizes = [2, 32], strides = [1, 1]} : vector<2x96xf32> to vector<2x32xf32>
    %987 = vector.extract_strided_slice %969 {offsets = [0, 64], sizes = [2, 32], strides = [1, 1]} : vector<2x96xf32> to vector<2x32xf32>
    %988 = vector.broadcast %780 : vector<1x32xf32> to vector<2x32xf32>
    %989 = arith.addf %987, %988 : vector<2x32xf32>
    %990 = arith.mulf %977, %989 : vector<2x32xf32>
    %991 = arith.addf %986, %990 : vector<2x32xf32>
    %992 = math.tanh %991 : vector<2x32xf32>
    %cst_287 = arith.constant 1.000000e+00 : f32
    %993 = vector.broadcast %cst_287 : f32 to vector<2x32xf32>
    %994 = arith.subf %993, %985 : vector<2x32xf32>
    %995 = arith.mulf %994, %992 : vector<2x32xf32>
    %996 = arith.mulf %985, %966 : vector<2x32xf32>
    %997 = arith.addf %995, %996 : vector<2x32xf32>
    %c2_288 = arith.constant 2 : index
    %c32_289 = arith.constant 32 : index
    %998 = vector.load %arg23[%c2_288, %c32_289] : memref<16x64xf32, #tpu.memory_space<vmem>>, vector<2x32xf32>
    tpu.vector_store %arg23[%c2_288, %c32_289], %997 {strides = array<i32>} : memref<16x64xf32, #tpu.memory_space<vmem>>, vector<2x32xf32>,
    %c0_290 = arith.constant 0 : index
    %c0_291 = arith.constant 0 : index
    %999 = vector.load %arg24[%c0_290, %c0_291] : memref<16x96xf32, #tpu.memory_space<vmem>>, vector<2x96xf32>
    %cst_292 = arith.constant dense<0.000000e+00> : vector<2x96xf32>
    %1000 = tpu.matmul %997, %779, %cst_292 {dimension_numbers = #tpu.dot_dimension_numbers<[1], [0], [0], [1], [0, 0, 1, 1], [], []>} : vector<2x32xf32>, vector<32x96xf32>, vector<2x96xf32> -> vector<2x96xf32>
    %1001 = vector.extract_strided_slice %999 {offsets = [0, 0], sizes = [2, 32], strides = [1, 1]} : vector<2x96xf32> to vector<2x32xf32>
    %1002 = vector.extract_strided_slice %1000 {offsets = [0, 0], sizes = [2, 32], strides = [1, 1]} : vector<2x96xf32> to vector<2x32xf32>
    %1003 = arith.addf %1001, %1002 : vector<2x32xf32>
    %1004 = arith.negf %1003 : vector<2x32xf32>
    %1005 = math.exp %1004 : vector<2x32xf32>
    %cst_293 = arith.constant 1.000000e+00 : f32
    %1006 = vector.broadcast %cst_293 : f32 to vector<2x32xf32>
    %1007 = arith.addf %1006, %1005 : vector<2x32xf32>
    %1008 = arith.divf %1006, %1007 : vector<2x32xf32>
    %1009 = vector.extract_strided_slice %999 {offsets = [0, 32], sizes = [2, 32], strides = [1, 1]} : vector<2x96xf32> to vector<2x32xf32>
    %1010 = vector.extract_strided_slice %1000 {offsets = [0, 32], sizes = [2, 32], strides = [1, 1]} : vector<2x96xf32> to vector<2x32xf32>
    %1011 = arith.addf %1009, %1010 : vector<2x32xf32>
    %1012 = arith.negf %1011 : vector<2x32xf32>
    %1013 = math.exp %1012 : vector<2x32xf32>
    %cst_294 = arith.constant 1.000000e+00 : f32
    %1014 = vector.broadcast %cst_294 : f32 to vector<2x32xf32>
    %1015 = arith.addf %1014, %1013 : vector<2x32xf32>
    %1016 = arith.divf %1014, %1015 : vector<2x32xf32>
    %1017 = vector.extract_strided_slice %999 {offsets = [0, 64], sizes = [2, 32], strides = [1, 1]} : vector<2x96xf32> to vector<2x32xf32>
    %1018 = vector.extract_strided_slice %1000 {offsets = [0, 64], sizes = [2, 32], strides = [1, 1]} : vector<2x96xf32> to vector<2x32xf32>
    %1019 = vector.broadcast %780 : vector<1x32xf32> to vector<2x32xf32>
    %1020 = arith.addf %1018, %1019 : vector<2x32xf32>
    %1021 = arith.mulf %1008, %1020 : vector<2x32xf32>
    %1022 = arith.addf %1017, %1021 : vector<2x32xf32>
    %1023 = math.tanh %1022 : vector<2x32xf32>
    %cst_295 = arith.constant 1.000000e+00 : f32
    %1024 = vector.broadcast %cst_295 : f32 to vector<2x32xf32>
    %1025 = arith.subf %1024, %1016 : vector<2x32xf32>
    %1026 = arith.mulf %1025, %1023 : vector<2x32xf32>
    %1027 = arith.mulf %1016, %997 : vector<2x32xf32>
    %1028 = arith.addf %1026, %1027 : vector<2x32xf32>
    %c0_296 = arith.constant 0 : index
    %c32_297 = arith.constant 32 : index
    %1029 = vector.load %arg23[%c0_296, %c32_297] : memref<16x64xf32, #tpu.memory_space<vmem>>, vector<2x32xf32>
    tpu.vector_store %arg23[%c0_296, %c32_297], %1028 {strides = array<i32>} : memref<16x64xf32, #tpu.memory_space<vmem>>, vector<2x32xf32>,
    %c0_298 = arith.constant 0 : index
    %c0_299 = arith.constant 0 : index
    %1030 = vector.load %arg23[%c0_298, %c0_299] : memref<16x64xf32, #tpu.memory_space<vmem>>, vector<16x64xf32>
    %cst_300 = arith.constant dense<0.000000e+00> : vector<64xf32>
    %1031 = vector.multi_reduction <add>, %1030, %cst_300 [0] : vector<16x64xf32> to vector<64xf32>
    %1032 = vector.shape_cast %1031 : vector<64xf32> to vector<1x64xf32>
    %cst_301 = arith.constant 1.600000e+01 : f32
    %1033 = vector.broadcast %cst_301 : f32 to vector<1x64xf32>
    %1034 = arith.divf %1032, %1033 : vector<1x64xf32>
    %1035 = vector.broadcast %1034 : vector<1x64xf32> to vector<16x64xf32>
    %1036 = arith.subf %1030, %1035 : vector<16x64xf32>
    %1037 = arith.mulf %1036, %1036 : vector<16x64xf32>
    %cst_302 = arith.constant dense<0.000000e+00> : vector<64xf32>
    %1038 = vector.multi_reduction <add>, %1037, %cst_302 [0] : vector<16x64xf32> to vector<64xf32>
    %1039 = vector.shape_cast %1038 : vector<64xf32> to vector<1x64xf32>
    %cst_303 = arith.constant 1.600000e+01 : f32
    %1040 = vector.broadcast %cst_303 : f32 to vector<1x64xf32>
    %1041 = arith.divf %1039, %1040 : vector<1x64xf32>
    %cst_304 = arith.constant 9.99999974E-6 : f32
    %1042 = vector.broadcast %cst_304 : f32 to vector<1x64xf32>
    %1043 = arith.addf %1041, %1042 : vector<1x64xf32>
    %1044 = math.rsqrt %1043 : vector<1x64xf32>
    %1045 = vector.broadcast %1044 : vector<1x64xf32> to vector<16x64xf32>
    %1046 = arith.mulf %1036, %1045 : vector<16x64xf32>
    %c0_305 = arith.constant 0 : index
    %c0_306 = arith.constant 0 : index
    %1047 = vector.load %arg17[%c0_305, %c0_306] : memref<1x64xf32, #tpu.memory_space<vmem>>, vector<1x64xf32>
    %1048 = vector.broadcast %1047 : vector<1x64xf32> to vector<16x64xf32>
    %1049 = arith.mulf %1046, %1048 : vector<16x64xf32>
    %c0_307 = arith.constant 0 : index
    %c0_308 = arith.constant 0 : index
    %1050 = vector.load %arg18[%c0_307, %c0_308] : memref<1x64xf32, #tpu.memory_space<vmem>>, vector<1x64xf32>
    %1051 = vector.broadcast %1050 : vector<1x64xf32> to vector<16x64xf32>
    %1052 = arith.addf %1049, %1051 : vector<16x64xf32>
    %c0_309 = arith.constant 0 : index
    %c0_310 = arith.constant 0 : index
    %1053 = vector.load %arg19[%c0_309, %c0_310] : memref<64x128xf32, #tpu.memory_space<vmem>>, vector<64x128xf32>
    %cst_311 = arith.constant dense<0.000000e+00> : vector<16x128xf32>
    %1054 = tpu.matmul %1052, %1053, %cst_311 {dimension_numbers = #tpu.dot_dimension_numbers<[1], [0], [0], [1], [0, 0, 1, 1], [], []>} : vector<16x64xf32>, vector<64x128xf32>, vector<16x128xf32> -> vector<16x128xf32>
    %c0_312 = arith.constant 0 : index
    %c0_313 = arith.constant 0 : index
    %1055 = vector.load %arg20[%c0_312, %c0_313] : memref<1x128xf32, #tpu.memory_space<vmem>>, vector<1x128xf32>
    %1056 = vector.broadcast %1055 : vector<1x128xf32> to vector<16x128xf32>
    %1057 = arith.addf %1054, %1056 : vector<16x128xf32>
    %c0_314 = arith.constant 0 : index
    %c0_315 = arith.constant 0 : index
    %1058 = vector.load %arg21[%c0_314, %c0_315] : memref<16x128xf32, #tpu.memory_space<vmem>>, vector<16x128xf32>
    tpu.vector_store %arg21[%c0_314, %c0_315], %1057 {strides = array<i32>} : memref<16x128xf32, #tpu.memory_space<vmem>>, vector<16x128xf32>,
    return
  }
}

</mosaic_0001>

<bundles_post_ra>
// kernel: gru_classifier_forward.1
= control target key start
LH: loop header
LB: loop body
LE: loop exit
PB: predicated region body
PF: predicated region fallthrough
CT: control target
= control target key end

     0   :  { %s6279_s0 = inlined_call_operand.vmem [shape: f32[16,16], index: 0, kind: input, shape index: {}]   ;;  %s6280_s1 = inlined_call_operand.vmem [shape: f32[16,96], index: 1, kind: input, shape index: {}]   ;;  %s6281_s2 = inlined_call_operand.vmem [shape: f32[32,96], index: 2, kind: input, shape index: {}]   ;;  %s6282_s3 = inlined_call_operand.vmem [shape: f32[1,96], index: 3, kind: input, shape index: {}]   ;;  %s6283_s4 = inlined_call_operand.vmem [shape: f32[1,32], index: 4, kind: input, shape index: {}]   ;;  %s6284_s5 = inlined_call_operand.vmem [shape: f32[16,96], index: 5, kind: input, shape index: {}]   ;;  %s6285_s6 = inlined_call_operand.vmem [shape: f32[32,96], index: 6, kind: input, shape index: {}]   ;;  %s6286_s7 = inlined_call_operand.hbm [shape: f32[1,96], index: 7, kind: input, shape index: {}]   ;;  %s6287_s8 = inlined_call_operand.hbm [shape: f32[1,32], index: 8, kind: input, shape index: {}]   ;;  %s6288_s9 = inlined_call_operand.vmem [shape: f32[64,96], index: 9, kind: input, shape index: {}]   ;;  %s6289_s10 = inlined_call_operand.vmem [shape: f32[32,96], index: 10, kind: input, shape index: {}]   ;;  %s6290_s11 = inlined_call_operand.hbm [shape: f32[1,96], index: 11, kind: input, shape index: {}]   ;;  %s6291_s12 = inlined_call_operand.hbm [shape: f32[1,32], index: 12, kind: input, shape index: {}]   ;;  %s6292_s13 = inlined_call_operand.vmem [shape: f32[64,96], index: 13, kind: input, shape index: {}]   ;;  %s6293_s14 = inlined_call_operand.hbm [shape: f32[32,96], index: 14, kind: input, shape index: {}]   ;;  %s6294_s15 = inlined_call_operand.hbm [shape: f32[1,96], index: 15, kind: input, shape index: {}]   ;;  %s6295_s16 = inlined_call_operand.hbm [shape: f32[1,32], index: 16, kind: input, shape index: {}]   ;;  %s6296_s17 = inlined_call_operand.vmem [shape: f32[1,64], index: 17, kind: input, shape index: {}]   ;;  %s6297_s18 = inlined_call_operand.vmem [shape: f32[1,64], index: 18, kind: input, shape index: {}]   ;;  %s6298_s19 = inlined_call_operand.vmem [shape: f32[64,128], index: 19, kind: input, shape index: {}]   ;;  %s6299_s20 = inlined_call_operand.vmem [shape: f32[1,128], index: 20, kind: input, shape index: {}]   ;;  %s6300_s21 = inlined_call_operand.vmem [shape: f32[16,128], index: 21, kind: output, shape index: {}]  }
   0x1   :  { %6305 = sst [smem:[#allocation20_spill]] %s6279_s0 }
   0x2   :  { %6306 = sst [smem:[#allocation21_spill]] %s6280_s1 }
   0x3   :  { %6307 = sst [smem:[#allocation22_spill]] %s6281_s2 }
   0x4   :  { %6308 = sst [smem:[#allocation23_spill]] %s6282_s3 }
   0x5   :  { %6309 = sst [smem:[#allocation24_spill]] %s6283_s4 }
   0x6   :  { %6310 = sst [smem:[#allocation25_spill]] %s6284_s5 }
   0x7   :  { %26 = vsyncpa [#allocation6], 0 }
   0x8   :  { %27 = vsyncpa [#allocation8], 0 }
   0x9   :  { %28 = vsyncpa [#allocation11], 0 }
   0xa   :  { %29 = vsyncpa [#allocation14], 0  ;;  %s5389_s2 = smov [#allocation7]   ;;  %s5390_s26 = smov [#allocation10]  }
   0xb   :  { %s60_s25 = sshll.u32 %s5389_s2, 4  ;;  %s84_s27 = sshll.u32 %s5390_s26, 4  ;;  %s61_s25 = int_to_ptr.vmem [resolvable:$true] %s60_s25  ;;  %s85_s27 = int_to_ptr.vmem [resolvable:$true] %s84_s27 }
   0xc   :  { %s5227_s29 = scalar_lea.hbm %s6287_s8, 16 }
   0xd   :  { %p5228_p0 = scmp.ne.s32.totalorder %s6287_s8, %s5227_s29  ;;  %p5231_p1 = scmp.lt.u32.totalorder %s5227_s29, %s6287_s8 }
   0xf   :  { %p5233_p2 = pnand %p5231_p1, %p5228_p0 }
  0x11   :  { %5236 = shalt.err (!%p5233_p2)
}
  0x12   :  { %s5237_s22 = scalar_lea.vmem %s61_s25, 16  ;;  %s5241_s23 = scalar_lea.vmem %s61_s25, 32 }
  0x13   :  { %p5238_p3 = scmp.ne.s32.totalorder %s61_s25, %s5237_s22  ;;  %p5242_p4 = scmp.lt.s32.totalorder %s61_s25, %s61_s25 }
  0x14   :  { %p5243_p5 = scmp.lt.s32.totalorder %s5241_s23, %s5237_s22 }
  0x16   :  { %p5244_p6 = por %p5243_p5, %p5242_p4 }
  0x18   :  { %p5245_p7 = pnand %p5244_p6, %p5238_p3 }
  0x1a   :  { %5248 = shalt.err (!%p5245_p7)
}
  0x1b   :  { %63 = dma.hbm_to_vmem [thread:$0]  %s6287_s8, 16, %s61_s25, [#allocation8]  }
  0x1c   :  { %s5249_s3 = scalar_lea.hbm %s6291_s12, 16 }
  0x1d   :  { %p5250_p8 = scmp.ne.s32.totalorder %s6291_s12, %s5249_s3  ;;  %p5253_p9 = scmp.lt.u32.totalorder %s5249_s3, %s6291_s12 }
  0x1f   :  { %p5255_p10 = pnand %p5253_p9, %p5250_p8 }
  0x21   :  { %5258 = shalt.err (!%p5255_p10)
}
  0x22   :  { %s5259_s30 = scalar_lea.vmem %s85_s27, 16  ;;  %s5263_s5 = scalar_lea.vmem %s85_s27, 32 }
  0x23   :  { %p5260_p11 = scmp.ne.s32.totalorder %s85_s27, %s5259_s30  ;;  %p5264_p12 = scmp.lt.s32.totalorder %s85_s27, %s85_s27 }
  0x24   :  { %p5265_p13 = scmp.lt.s32.totalorder %s5263_s5, %s5259_s30 }
  0x26   :  { %p5266_p0 = por %p5265_p13, %p5264_p12 }
  0x28   :  { %p5267_p1 = pnand %p5266_p0, %p5260_p11 }
  0x2a   :  { %5270 = shalt.err (!%p5267_p1)
}
  0x2b   :  { %87 = dma.hbm_to_vmem [thread:$0]  %s6291_s12, 16, %s85_s27, [#allocation11]  }
  0x2c   :  { %s5391_s22 = smov [#allocation13]   ;;  %s5392_s1 = smov [#allocation5]  }
  0x2d   :  { %s108_s23 = sshll.u32 %s5391_s22, 4  ;;  %s50_s24 = sshll.u32 %s5392_s1, 4  ;;  %s109_s23 = int_to_ptr.vmem [resolvable:$true] %s108_s23  ;;  %s51_s24 = int_to_ptr.vmem [resolvable:$true] %s50_s24 }
  0x2e   :  { %s5271_s3 = scalar_lea.hbm %s6294_s15, 16 }
  0x2f   :  { %p5272_p2 = scmp.ne.s32.totalorder %s6294_s15, %s5271_s3  ;;  %p5275_p3 = scmp.lt.u32.totalorder %s5271_s3, %s6294_s15 }
  0x31   :  { %p5277_p4 = pnand %p5275_p3, %p5272_p2 }
  0x33   :  { %5280 = shalt.err (!%p5277_p4)
}
  0x34   :  { %s5281_s12 = scalar_lea.vmem %s109_s23, 16  ;;  %s5285_s27 = scalar_lea.vmem %s109_s23, 32 }
  0x35   :  { %p5282_p5 = scmp.ne.s32.totalorder %s109_s23, %s5281_s12  ;;  %p5286_p6 = scmp.lt.s32.totalorder %s109_s23, %s109_s23 }
  0x36   :  { %p5287_p7 = scmp.lt.s32.totalorder %s5285_s27, %s5281_s12 }
  0x38   :  { %p5288_p8 = por %p5287_p7, %p5286_p6 }
  0x3a   :  { %p5289_p9 = pnand %p5288_p8, %p5282_p5 }
  0x3c   :  { %5292 = shalt.err (!%p5289_p9)
}
  0x3d   :  { %111 = dma.hbm_to_vmem [thread:$0]  %s6294_s15, 16, %s109_s23, [#allocation14]  }
  0x3e   :  { %s5293_s22 = scalar_lea.hbm %s6286_s7, 16 }
  0x3f   :  { %p5294_p10 = scmp.ne.s32.totalorder %s6286_s7, %s5293_s22  ;;  %p5297_p11 = scmp.lt.u32.totalorder %s5293_s22, %s6286_s7 }
  0x41   :  { %p5299_p12 = pnand %p5297_p11, %p5294_p10 }
  0x43   :  { %5302 = shalt.err (!%p5299_p12)
}
  0x44   :  { %s5303_s28 = scalar_lea.vmem %s51_s24, 16  ;;  %s5307_s29 = scalar_lea.vmem %s51_s24, 32 }
  0x45   :  { %p5304_p13 = scmp.ne.s32.totalorder %s51_s24, %s5303_s28  ;;  %p5308_p0 = scmp.lt.s32.totalorder %s51_s24, %s51_s24 }
  0x46   :  { %p5309_p1 = scmp.lt.s32.totalorder %s5307_s29, %s5303_s28 }
  0x48   :  { %p5310_p2 = por %p5309_p1, %p5308_p0 }
  0x4a   :  { %p5311_p3 = pnand %p5310_p2, %p5304_p13 }
  0x4c   :  { %5314 = shalt.err (!%p5311_p3)
}
  0x4d   :  { %53 = dma.hbm_to_vmem [thread:$0]  %s6286_s7, 16, %s51_s24, [#allocation6]  }
  0x4e   :  { %s5393_s0 = smov [#allocation9]   ;;  %s5394_s12 = smov [#allocation12]  }
  0x4f   :  { %s74_s4 = sshll.u32 %s5393_s0, 4  ;;  %s95_s27 = sshll.u32 %s5394_s12, 4  ;;  %s75_s4 = int_to_ptr.vmem [resolvable:$true] %s74_s4  ;;  %s5561_s27 = int_to_ptr.vmem [resolvable:$true] %s95_s27 }
  0x50   :  { %s5315_s8 = scalar_lea.hbm %s6290_s11, 16 }
  0x51   :  { %p5316_p4 = scmp.ne.s32.totalorder %s6290_s11, %s5315_s8  ;;  %p5319_p5 = scmp.lt.u32.totalorder %s5315_s8, %s6290_s11 }
  0x53   :  { %p5321_p6 = pnand %p5319_p5, %p5316_p4 }
  0x55   :  { %5324 = shalt.err (!%p5321_p6)
}
  0x56   :  { %s5325_s7 = scalar_lea.vmem %s75_s4, 16  ;;  %s5329_s24 = scalar_lea.vmem %s75_s4, 32 }
  0x57   :  { %p5326_p7 = scmp.ne.s32.totalorder %s75_s4, %s5325_s7  ;;  %p5330_p8 = scmp.lt.s32.totalorder %s75_s4, %s75_s4 }
  0x58   :  { %p5331_p9 = scmp.lt.s32.totalorder %s5329_s24, %s5325_s7 }
  0x5a   :  { %p5332_p10 = por %p5331_p9, %p5330_p8 }
  0x5c   :  { %p5333_p11 = pnand %p5332_p10, %p5326_p7 }
  0x5e   :  { %5336 = shalt.err (!%p5333_p11)
}
  0x5f   :  { %77 = dma.hbm_to_vmem [thread:$0]  %s6290_s11, 16, %s75_s4, [#allocation8]  }
  0x60   :  { %s5337_s15 = scalar_lea.hbm %s6293_s14, 512 }
  0x61   :  { %p5338_p12 = scmp.ne.s32.totalorder %s6293_s14, %s5337_s15  ;;  %p5341_p13 = scmp.lt.u32.totalorder %s5337_s15, %s6293_s14 }
  0x63   :  { %p5343_p0 = pnand %p5341_p13, %p5338_p12 }
  0x65   :  { %5346 = shalt.err (!%p5343_p0)
}
  0x66   :  { %s5347_s5 = scalar_lea.vmem %s5561_s27, 512  ;;  %p5352_p2 = scmp.lt.s32.totalorder %s5561_s27, %s5561_s27 }
  0x67   :  { %p5348_p1 = scmp.ne.s32.totalorder %s5561_s27, %s5347_s5  ;;  %p5353_p3 = scmp.lt.s32.totalorder %s5347_s5, %s5347_s5 }
  0x69   :  { %p5354_p4 = por %p5353_p3, %p5352_p2 }
  0x6b   :  { %p5355_p5 = pnand %p5354_p4, %p5348_p1 }
  0x6d   :  { %5358 = shalt.err (!%p5355_p5)
}
  0x6e   :  { %s5395_s11 = smov 128   ;;  %s5396_s4 = smov 8  }
  0x6f   :  { %101 = dma.hbm_to_vmem [thread:$0]  %s6293_s14, 512, %s5561_s27, [#allocation11], %s5395_s11, %s5395_s11, %s5396_s4  }
  0x70   :  { %s5397_s22 = smov [#allocation15]   ;;  %s5359_s24 = scalar_lea.hbm %s6295_s16, 16 }
  0x71   :  { %s118_s1 = sshll.u32 %s5397_s22, 4  ;;  %p5360_p6 = scmp.ne.s32.totalorder %s6295_s16, %s5359_s24  ;;  %s119_s1 = int_to_ptr.vmem [resolvable:$true] %s118_s1 }
  0x72   :  { %p5363_p7 = scmp.lt.u32.totalorder %s5359_s24, %s6295_s16 }
  0x74   :  { %p5365_p8 = pnand %p5363_p7, %p5360_p6 }
  0x76   :  { %5368 = shalt.err (!%p5365_p8)
}
  0x77   :  { %s5369_s15 = scalar_lea.vmem %s119_s1, 16  ;;  %s5373_s14 = scalar_lea.vmem %s119_s1, 32 }
  0x78   :  { %p5370_p9 = scmp.ne.s32.totalorder %s119_s1, %s5369_s15  ;;  %p5374_p10 = scmp.lt.s32.totalorder %s119_s1, %s119_s1 }
  0x79   :  { %p5375_p11 = scmp.lt.s32.totalorder %s5373_s14, %s5369_s15 }
  0x7b   :  { %p5376_p12 = por %p5375_p11, %p5374_p10 }
  0x7d   :  { %p5377_p13 = pnand %p5376_p12, %p5370_p9 }
  0x7f   :  { %5380 = shalt.err (!%p5377_p13)
}
  0x80   :  { %121 = dma.hbm_to_vmem [thread:$0]  %s6295_s16, 16, %s119_s1, [#allocation14]  }
  0x81   :  { %5381 = dma.done.wait [#allocation6], 16  }
  0x82   :  { %5382 = vsyncadd [#allocation6], 4294967280 }
  0x83   :  { %5383 = dma.done.wait [#allocation8], 32  }
  0x84   :  { %5384 = vsyncadd [#allocation8], 4294967264 }
  0x85   :  { %5385 = dma.done.wait [#allocation11], 528  }
  0x86   :  { %5386 = vsyncadd [#allocation11], 4294966768 }
  0x87   :  { %5387 = dma.done.wait [#allocation14], 32  }
  0x88   :  { %5388 = vsyncadd [#allocation14], 4294967264  ;;  %v5398_v0 = vmov 0.0|0.0   ;;  %vm5399_vm0 = vmmov 0   ;;  %v5400_v1 = vmov 0.0   ;;  %vm162_vm1 = vcmask 130048  }
  0x89   :  { %4775 = vmatprep.subr.bf16.mxu1 %v5398_v0  ;;  %4363 = vmatprep.mubr.msk.f32.mxu1 %vm5399_vm0, %v5400_v1  ;;  %s6311_s16 = sld [smem:[#allocation21_spill]]  ;;  %s6312_s8 = sld [smem:[#allocation22_spill]]  ;;  %vm244_vm2 = vcmask 785408   ;;  %vm366_vm3 = vcmask 254976   ;;  %vm253_vm4 = vcmask 261120   ;;  %vm1300_vm5 = vcmask 517376  }
  0x8a   :  { %s6313_s7 = sld [smem:[#allocation20_spill]]  ;;  %s6314_s14 = sld [smem:[#allocation24_spill]]  ;;  %vm2047_vm6 = vcmask 523264  }
  0x8b   :  { %s5401_s27 = smov 64   ;;  %s6315_s30 = sld [smem:[#allocation23_spill]] }
  0x8c   :  { %s5402_s5 = smov 96  }
  0x8f   :  { %v153_v2 = vld [vmem:[%s6311_s16] sm:$0xff]  ;;  %v154_v3 = vld [vmem:[%s6311_s16 + $0x8] sm:$0xff]  ;;  %v249_v9 = vld [vmem:[%s6312_s8 + $0x10] sm:$0xff] }
  0x90   :  { %v247_v4 = vld [vmem:[%s6312_s8] sm:$0xff]  ;;  %v4771_v5 = vpack.c.bf16 %v154_v3, %v153_v2  ;;  %v248_v6 = vld [vmem:[%s6312_s8 + $0x8] sm:$0xff]  ;;  %v250_v10 = vld [vmem:[%s6312_s8 + $0x18] sm:$0xff]  ;;  %s6316_s8 = sld [smem:[#allocation25_spill]] }
  0x91   :  { %v5622_v7 = vld [vmem:[%s6313_s7] sm:$0xff]  ;;  %v5624_v8 = vpack.c.bf16 %v248_v6, %v247_v4  ;;  %v5642_v12 = vld [vmem:[%s6313_s7 + $0x8] sm:$0xff]  ;;  %v5644_v13 = vpack.c.bf16 %v250_v10, %v249_v9 }
  0x92   :  { %4352 = vmatprep.mubr.msk.f32.mxu0 %vm162_vm1, %v5622_v7  ;;  %v4073_v11 = vld [vmem:[%s6314_s14] ss:$0 sm:$0xff]  ;;  %4772 = vmatprep.subr.bf16.mxu0 %v4771_v5 }
  0x93   :  { %339 = vrot.lane.b32.xlu0 %v4073_v11, %s5401_s27  ;;  %4777 = vmatpush3.bf16.msra.mxu1 %v5624_v8  ;;  %v4069_v14 = vld [vmem:[%s6315_s30] ss:$0 sm:$0xff] }
  0x94   :  { %4774 = vmatpush3.bf16.msra.mxu0 %v4771_v5  ;;  %4778 = vmatprep.subr.bf16.mxu1 %v5398_v0 }
  0x95   :  { %4793 = vmatprep.subr.bf16.mxu0 %v5398_v0 }
  0x97   :  { %4353 = vmatmul.mubr.msk.f32.vlgmr.msra.gmra.mrb[0].mxu0 %vm162_vm1, %v5642_v12  ;;  %4780 = vmatpush3.bf16.msra.mxu1 %v5644_v13 }
  0x98   :  { %4795 = vmatpush3.bf16.msra.mxu0 %v5624_v8  ;;  %4781 = vmatprep.subr.bf16.mxu1 %v5398_v0 }
  0x99   :  { %4796 = vmatprep.subr.bf16.mxu0 %v5398_v0  ;;  %4396 = vmatprep.mubr.msk.f32.mxu0 %vm5399_vm0, %v5400_v1 }
  0x9a   :  { %4364 = vmatmul.mubr.f32.vlgmr.msra.gmra.mrb[0].mxu1 %v5400_v1 }
  0x9b   :  { %4783 = vmatpush3.bf16.msra.mxu1 %v5624_v8  ;;  %4374 = vmatprep.mubr.msk.f32.mxu1 %vm5399_vm0, %v5400_v1 }
  0x9c   :  { %4784 = vmatprep.subr.bf16.mxu1 %v5398_v0  ;;  %4798 = vmatpush3.bf16.msra.mxu0 %v5644_v13 }
  0x9d   :  { %4805 = vmatprep.subr.bf16.mxu0 %v5398_v0 }
  0x9f   :  { %4786 = vmatpush3.bf16.msra.mxu1 %v5644_v13 }
  0xa0   :  { %4787 = vmatprep.subr.bf16.mxu1 %v5398_v0 }
 0x105   :  { %v5668_v19 = vpop.permute.xlu0 %339 }
 0x16a   :  { %v4354_v15 = vpop.f32.mrb[0].mxu0 }
 0x16b   :  { %v241_v16 = vadd.f32 %v4354_v15, %v4069_v14  ;;  %v235_v17 = vpop.f32.mrb[1].mxu0 }
 0x16c   :  { %v236_v18 = vadd.f32 %v4069_v14, %v235_v17 }
 0x16d   :  { %246 = vst.msk [vmem:[#allocation4 + $0x8] sm:$0xff] %vm244_vm2, %v241_v16  ;;  %v323_v20 = vpop.f32.mrb[0].mxu1 }
 0x16e   :  { %245 = vst.msk [vmem:[#allocation4] sm:$0xff] %vm244_vm2, %v236_v18  ;;  %v342_v21 = vadd.f32 %v5668_v19, %v323_v20  ;;  %v4365_v22 = vpop.f32.mrb[1].mxu1 }
 0x170   :  { %344 = vrot.lane.b32.xlu0 %v342_v21, %s5401_s27 }
 0x175   :  { %v252_v23 = vld [vmem:[#allocation4] sm:$0x3]  ;;  %v368_v43 = vld [vmem:[#allocation4 + $0x2] sm:$0x3]  ;;  %v473_v63 = vld [vmem:[#allocation4 + $0x4] sm:$0x3] }
 0x176   :  { %v327_v24 = vadd.f32 %v323_v20, %v252_v23 }
 0x178   :  { %v4072_v25 = vmul.f32 -1.442695, %v327_v24 }
 0x17a   :  { %5033 = vpow2.f32 %v4072_v25 }
 0x184   :  { %v5034_v26 = vpop.eup %5033 }
 0x185   :  { %v331_v27 = vadd.f32 1.0, %v5034_v26  ;;  %v578_v26 = vld [vmem:[#allocation4 + $0x6] sm:$0x3] }
 0x187   :  { %5035 = vrcp.f32 %v331_v27 }
 0x191   :  { %v5036_v28 = vpop.eup %5035 }
 0x192   :  { %v354_v34 = vsub.f32 1.0, %v5036_v28  ;;  %v360_v36 = vmul.f32 0.0, %v5036_v28 }
 0x1e2   :  { %v345_v29 = vpop.permute.xlu0 %344 }
 0x1e3   :  { %v347_v30 = vmul.f32 %v5036_v28, %v345_v29 }
 0x1e5   :  { %349 = vrot.lane.b32.xlu1 %v347_v30, %s5401_s27 }
 0x257   :  { %v350_v31 = vpop.permute.xlu1 %349 }
 0x258   :  { %v352_v32 = vadd.f32 %v350_v31, %v252_v23 }
 0x25a   :  { %5037 = vtanh.f32 %v352_v32 }
 0x264   :  { %v5038_v33 = vpop.eup %5037 }
 0x265   :  { %356 = vrot.lane.b32.xlu1 %v5038_v33, %s5402_s5 }
 0x2d7   :  { %v357_v35 = vpop.permute.xlu1 %356 }
 0x2d8   :  { %v359_v37 = vmul.f32 %v357_v35, %v354_v34 }
 0x2da   :  { %v361_v38 = vadd.f32 %v360_v36, %v359_v37 }
 0x2dc   :  { %363 = vrot.lane.b32.xlu0 %v361_v38, %s5402_s5 }
 0x34e   :  { %v364_v39 = vpop.permute.xlu0 %363 }
 0x34f   :  { %367 = vst.msk [vmem:[#allocation2] sm:$0x3] %vm366_vm3, %v364_v39  ;;  %4375 = vmatmul.mubr.msk.f32.vlgmr.msra.gmra.mrb[2].mxu1 %vm253_vm4, %v364_v39 }
 0x350   :  { %4789 = vmatpush3.bf16.msra.mxu1 %v5624_v8  ;;  %4385 = vmatprep.mubr.msk.f32.mxu1 %vm5399_vm0, %v5400_v1 }
 0x351   :  { %4790 = vmatprep.subr.bf16.mxu1 %v5398_v0 }
 0x354   :  { %4792 = vmatpush3.bf16.msra.mxu1 %v5644_v13 }
 0x355   :  { %4799 = vmatprep.subr.bf16.mxu1 %v5398_v0 }
 0x422   :  { %v437_v40 = vpop.f32.mrb[2].mxu1 }
 0x423   :  { %v448_v41 = vadd.f32 %v437_v40, %v5668_v19  ;;  %v4376_v42 = vpop.f32.mrb[3].mxu1  ;;  %v441_v44 = vadd.f32 %v437_v40, %v368_v43 }
 0x425   :  { %450 = vrot.lane.b32.xlu1 %v448_v41, %s5401_s27  ;;  %v4075_v45 = vmul.f32 -1.442695, %v441_v44 }
 0x427   :  { %5039 = vpow2.f32 %v4075_v45 }
 0x431   :  { %v5040_v46 = vpop.eup %5039 }
 0x432   :  { %v445_v47 = vadd.f32 1.0, %v5040_v46  ;;  %v683_v46 = vld [vmem:[#allocation4 + $0x8] sm:$0x3] }
 0x434   :  { %5041 = vrcp.f32 %v445_v47 }
 0x43e   :  { %v5042_v48 = vpop.eup %5041 }
 0x43f   :  { %v460_v54 = vsub.f32 1.0, %v5042_v48  ;;  %v466_v56 = vmul.f32 %v5042_v48, %v361_v38 }
 0x497   :  { %v451_v49 = vpop.permute.xlu1 %450 }
 0x498   :  { %v453_v50 = vmul.f32 %v5042_v48, %v451_v49 }
 0x49a   :  { %455 = vrot.lane.b32.xlu0 %v453_v50, %s5401_s27 }
 0x50c   :  { %v456_v51 = vpop.permute.xlu0 %455 }
 0x50d   :  { %v458_v52 = vadd.f32 %v456_v51, %v368_v43 }
 0x50f   :  { %5043 = vtanh.f32 %v458_v52 }
 0x519   :  { %v5044_v53 = vpop.eup %5043 }
 0x51a   :  { %462 = vrot.lane.b32.xlu1 %v5044_v53, %s5402_s5 }
 0x58c   :  { %v463_v55 = vpop.permute.xlu1 %462 }
 0x58d   :  { %v465_v57 = vmul.f32 %v463_v55, %v460_v54 }
 0x58f   :  { %v467_v58 = vadd.f32 %v466_v56, %v465_v57 }
 0x591   :  { %469 = vrot.lane.b32.xlu0 %v467_v58, %s5402_s5 }
 0x603   :  { %v470_v59 = vpop.permute.xlu0 %469 }
 0x604   :  { %472 = vst.msk [vmem:[#allocation2 + $0x2] sm:$0x3] %vm366_vm3, %v470_v59  ;;  %4386 = vmatmul.mubr.msk.f32.vlgmr.msra.gmra.mrb[4].mxu1 %vm253_vm4, %v470_v59 }
 0x605   :  { %4801 = vmatpush3.bf16.msra.mxu1 %v5624_v8  ;;  %4407 = vmatprep.mubr.msk.f32.mxu1 %vm5399_vm0, %v5400_v1 }
 0x606   :  { %4802 = vmatprep.subr.bf16.mxu1 %v5398_v0 }
 0x609   :  { %4804 = vmatpush3.bf16.msra.mxu1 %v5644_v13 }
 0x60a   :  { %4811 = vmatprep.subr.bf16.mxu1 %v5398_v0 }
 0x6d7   :  { %v542_v60 = vpop.f32.mrb[4].mxu1 }
 0x6d8   :  { %v553_v61 = vadd.f32 %v542_v60, %v5668_v19  ;;  %v4387_v62 = vpop.f32.mrb[5].mxu1  ;;  %v546_v2 = vadd.f32 %v542_v60, %v473_v63 }
 0x6da   :  { %555 = vrot.lane.b32.xlu1 %v553_v61, %s5401_s27  ;;  %v4077_v3 = vmul.f32 -1.442695, %v546_v2 }
 0x6dc   :  { %5045 = vpow2.f32 %v4077_v3 }
 0x6e6   :  { %v5046_v4 = vpop.eup %5045 }
 0x6e7   :  { %v550_v5 = vadd.f32 1.0, %v5046_v4  ;;  %v788_v4 = vld [vmem:[#allocation4 + $0xa] sm:$0x3] }
 0x6e9   :  { %5047 = vrcp.f32 %v550_v5 }
 0x6f3   :  { %v5048_v6 = vpop.eup %5047 }
 0x6f4   :  { %v565_v16 = vsub.f32 1.0, %v5048_v6  ;;  %v571_v18 = vmul.f32 %v5048_v6, %v467_v58 }
 0x74c   :  { %v556_v9 = vpop.permute.xlu1 %555 }
 0x74d   :  { %v558_v10 = vmul.f32 %v5048_v6, %v556_v9 }
 0x74f   :  { %560 = vrot.lane.b32.xlu0 %v558_v10, %s5401_s27 }
 0x7c1   :  { %v561_v11 = vpop.permute.xlu0 %560 }
 0x7c2   :  { %v563_v14 = vadd.f32 %v561_v11, %v473_v63 }
 0x7c4   :  { %5049 = vtanh.f32 %v563_v14 }
 0x7ce   :  { %v5050_v15 = vpop.eup %5049 }
 0x7cf   :  { %567 = vrot.lane.b32.xlu1 %v5050_v15, %s5402_s5 }
 0x841   :  { %v568_v17 = vpop.permute.xlu1 %567 }
 0x842   :  { %v570_v20 = vmul.f32 %v568_v17, %v565_v16 }
 0x844   :  { %v572_v21 = vadd.f32 %v571_v18, %v570_v20 }
 0x846   :  { %574 = vrot.lane.b32.xlu0 %v572_v21, %s5402_s5 }
 0x8b8   :  { %v575_v22 = vpop.permute.xlu0 %574 }
 0x8b9   :  { %577 = vst.msk [vmem:[#allocation2 + $0x4] sm:$0x3] %vm366_vm3, %v575_v22  ;;  %4397 = vmatmul.mubr.msk.f32.vlgmr.msra.gmra.mrb[2].mxu0 %vm253_vm4, %v575_v22 }
 0x8ba   :  { %4807 = vmatpush3.bf16.msra.mxu0 %v5624_v8  ;;  %4418 = vmatprep.mubr.msk.f32.mxu0 %vm5399_vm0, %v5400_v1 }
 0x8bb   :  { %4808 = vmatprep.subr.bf16.mxu0 %v5398_v0 }
 0x8be   :  { %4810 = vmatpush3.bf16.msra.mxu0 %v5644_v13 }
 0x8bf   :  { %4817 = vmatprep.subr.bf16.mxu0 %v5398_v0 }
 0x98c   :  { %v647_v23 = vpop.f32.mrb[2].mxu0 }
 0x98d   :  { %v658_v24 = vadd.f32 %v647_v23, %v5668_v19  ;;  %v4398_v25 = vpop.f32.mrb[3].mxu0  ;;  %v651_v27 = vadd.f32 %v647_v23, %v578_v26 }
 0x98f   :  { %660 = vrot.lane.b32.xlu1 %v658_v24, %s5401_s27  ;;  %v4079_v28 = vmul.f32 -1.442695, %v651_v27  ;;  %v893_v27 = vld [vmem:[#allocation4 + $0xc] sm:$0x3] }
 0x991   :  { %5051 = vpow2.f32 %v4079_v28 }
 0x99b   :  { %v5052_v29 = vpop.eup %5051 }
 0x99c   :  { %v655_v30 = vadd.f32 1.0, %v5052_v29 }
 0x99e   :  { %5053 = vrcp.f32 %v655_v30 }
 0x9a8   :  { %v5054_v31 = vpop.eup %5053 }
 0x9a9   :  { %v670_v37 = vsub.f32 1.0, %v5054_v31  ;;  %v676_v39 = vmul.f32 %v5054_v31, %v572_v21 }
 0xa01   :  { %v661_v32 = vpop.permute.xlu1 %660 }
 0xa02   :  { %v663_v33 = vmul.f32 %v5054_v31, %v661_v32 }
 0xa04   :  { %665 = vrot.lane.b32.xlu0 %v663_v33, %s5401_s27 }
 0xa76   :  { %v666_v34 = vpop.permute.xlu0 %665 }
 0xa77   :  { %v668_v35 = vadd.f32 %v666_v34, %v578_v26 }
 0xa79   :  { %5055 = vtanh.f32 %v668_v35 }
 0xa83   :  { %v5056_v36 = vpop.eup %5055 }
 0xa84   :  { %672 = vrot.lane.b32.xlu1 %v5056_v36, %s5402_s5  ;;  %v1103_v36 = vld [vmem:[%s6316_s8] sm:$0xff] }
 0xaf6   :  { %v673_v38 = vpop.permute.xlu1 %672 }
 0xaf7   :  { %v675_v40 = vmul.f32 %v673_v38, %v670_v37  ;;  %v1104_v37 = vld [vmem:[%s6316_s8 + $0x8] sm:$0xff] }
 0xaf8   :  { %v4823_v38 = vpack.c.bf16 %v1104_v37, %v1103_v36 }
 0xaf9   :  { %v677_v41 = vadd.f32 %v676_v39, %v675_v40  ;;  %v1189_v40 = vld [vmem:[%s6285_s6] sm:$0xff] }
 0xafb   :  { %679 = vrot.lane.b32.xlu0 %v677_v41, %s5402_s5 }
 0xb6d   :  { %v680_v42 = vpop.permute.xlu0 %679 }
 0xb6e   :  { %682 = vst.msk [vmem:[#allocation2 + $0x6] sm:$0x3] %vm366_vm3, %v680_v42  ;;  %4408 = vmatmul.mubr.msk.f32.vlgmr.msra.gmra.mrb[6].mxu1 %vm253_vm4, %v680_v42 }
 0xb6f   :  { %4813 = vmatpush3.bf16.msra.mxu1 %v5624_v8  ;;  %4429 = vmatprep.mubr.msk.f32.mxu1 %vm5399_vm0, %v5400_v1 }
 0xb70   :  { %4814 = vmatprep.subr.bf16.mxu1 %v5398_v0 }
 0xb73   :  { %4816 = vmatpush3.bf16.msra.mxu1 %v5644_v13 }
 0xb74   :  { %4824 = vmatprep.subr.bf16.mxu1 %v4823_v38 }
 0xc41   :  { %v752_v43 = vpop.f32.mrb[6].mxu1 }
 0xc42   :  { %v763_v44 = vadd.f32 %v752_v43, %v5668_v19  ;;  %v4409_v45 = vpop.f32.mrb[7].mxu1  ;;  %v756_v47 = vadd.f32 %v752_v43, %v683_v46  ;;  %v1192_v43 = vld [vmem:[%s6285_s6 + $0x18] sm:$0xff] }
 0xc44   :  { %765 = vrot.lane.b32.xlu1 %v763_v44, %s5401_s27  ;;  %v4081_v48 = vmul.f32 -1.442695, %v756_v47  ;;  %v4092_v47 = vld [vmem:[#allocation7] ss:$0 sm:$0xff] }
 0xc46   :  { %5057 = vpow2.f32 %v4081_v48 }
 0xc50   :  { %v5058_v49 = vpop.eup %5057 }
 0xc51   :  { %v760_v50 = vadd.f32 1.0, %v5058_v49 }
 0xc53   :  { %5059 = vrcp.f32 %v760_v50 }
 0xc5d   :  { %v5060_v51 = vpop.eup %5059 }
 0xc5e   :  { %v775_v57 = vsub.f32 1.0, %v5060_v51  ;;  %v781_v59 = vmul.f32 %v5060_v51, %v677_v41  ;;  %v1190_v41 = vld [vmem:[%s6285_s6 + $0x8] sm:$0xff] }
 0xc5f   :  { %v5766_v42 = vpack.c.bf16 %v1190_v41, %v1189_v40 }
 0xcb6   :  { %v766_v52 = vpop.permute.xlu1 %765 }
 0xcb7   :  { %v768_v53 = vmul.f32 %v5060_v51, %v766_v52  ;;  %v4088_v51 = vld [vmem:[#allocation5] ss:$0 sm:$0xff] }
 0xcb9   :  { %770 = vrot.lane.b32.xlu0 %v768_v53, %s5401_s27 }
 0xd2b   :  { %v771_v54 = vpop.permute.xlu0 %770 }
 0xd2c   :  { %v773_v55 = vadd.f32 %v771_v54, %v683_v46  ;;  %v5785_v54 = vld [vmem:[#allocation4 + $0xe] sm:$0x3] }
 0xd2e   :  { %5061 = vtanh.f32 %v773_v55 }
 0xd38   :  { %v5062_v56 = vpop.eup %5061 }
 0xd39   :  { %777 = vrot.lane.b32.xlu1 %v5062_v56, %s5402_s5 }
 0xdab   :  { %v778_v58 = vpop.permute.xlu1 %777 }
 0xdac   :  { %v780_v60 = vmul.f32 %v778_v58, %v775_v57 }
 0xdae   :  { %v782_v61 = vadd.f32 %v781_v59, %v780_v60 }
 0xdb0   :  { %784 = vrot.lane.b32.xlu0 %v782_v61, %s5402_s5 }
 0xe22   :  { %v785_v62 = vpop.permute.xlu0 %784 }
 0xe23   :  { %787 = vst.msk [vmem:[#allocation2 + $0x8] sm:$0x3] %vm366_vm3, %v785_v62  ;;  %4419 = vmatmul.mubr.msk.f32.vlgmr.msra.gmra.mrb[4].mxu0 %vm253_vm4, %v785_v62 }
 0xe24   :  { %4819 = vmatpush3.bf16.msra.mxu0 %v5624_v8  ;;  %4440 = vmatprep.mubr.msk.f32.mxu0 %vm5399_vm0, %v5400_v1 }
 0xe25   :  { %4820 = vmatprep.subr.bf16.mxu0 %v5398_v0 }
 0xe28   :  { %4822 = vmatpush3.bf16.msra.mxu0 %v5644_v13 }
 0xe29   :  { %4827 = vmatprep.subr.bf16.mxu0 %v5398_v0 }
 0xef6   :  { %v857_v63 = vpop.f32.mrb[4].mxu0 }
 0xef7   :  { %v868_v2 = vadd.f32 %v857_v63, %v5668_v19  ;;  %v4420_v3 = vpop.f32.mrb[5].mxu0  ;;  %v861_v5 = vadd.f32 %v857_v63, %v788_v4 }
 0xef9   :  { %870 = vrot.lane.b32.xlu1 %v868_v2, %s5401_s27  ;;  %v4083_v6 = vmul.f32 -1.442695, %v861_v5 }
 0xefb   :  { %5063 = vpow2.f32 %v4083_v6 }
 0xf05   :  { %v5064_v8 = vpop.eup %5063 }
 0xf06   :  { %v865_v9 = vadd.f32 1.0, %v5064_v8 }
 0xf08   :  { %5065 = vrcp.f32 %v865_v9 }
 0xf12   :  { %v5066_v10 = vpop.eup %5065 }
 0xf13   :  { %v880_v17 = vsub.f32 1.0, %v5066_v10  ;;  %v886_v20 = vmul.f32 %v5066_v10, %v782_v61 }
 0xf6b   :  { %v871_v11 = vpop.permute.xlu1 %870 }
 0xf6c   :  { %v873_v14 = vmul.f32 %v5066_v10, %v871_v11 }
 0xf6e   :  { %875 = vrot.lane.b32.xlu0 %v873_v14, %s5401_s27 }
 0xfe0   :  { %v876_v13 = vpop.permute.xlu0 %875 }
 0xfe1   :  { %v878_v15 = vadd.f32 %v876_v13, %v788_v4 }
 0xfe3   :  { %5067 = vtanh.f32 %v878_v15 }
 0xfed   :  { %v5068_v16 = vpop.eup %5067 }
 0xfee   :  { %882 = vrot.lane.b32.xlu1 %v5068_v16, %s5402_s5 }
0x1060   :  { %v883_v18 = vpop.permute.xlu1 %882 }
0x1061   :  { %v885_v21 = vmul.f32 %v883_v18, %v880_v17 }
0x1063   :  { %v887_v22 = vadd.f32 %v886_v20, %v885_v21 }
0x1065   :  { %889 = vrot.lane.b32.xlu0 %v887_v22, %s5402_s5 }
0x10d7   :  { %v890_v23 = vpop.permute.xlu0 %889 }
0x10d8   :  { %892 = vst.msk [vmem:[#allocation2 + $0xa] sm:$0x3] %vm366_vm3, %v890_v23  ;;  %4430 = vmatmul.mubr.msk.f32.vlgmr.msra.gmra.mrb[8].mxu1 %vm253_vm4, %v890_v23 }
0x10d9   :  { %4447 = vmatprep.mubr.msk.f32.mxu1 %vm162_vm1, %v5622_v7  ;;  %4826 = vmatpush3.bf16.msra.mxu1 %v4823_v38 }
0x10da   :  { %4833 = vmatprep.subr.bf16.mxu1 %v5398_v0 }
0x10dc   :  { %4448 = vmatmul.mubr.msk.f32.vlgmr.msra.gmra.mrb[10].mxu1 %vm162_vm1, %v5642_v12  ;;  %v1191_v12 = vld [vmem:[%s6285_s6 + $0x10] sm:$0xff] }
0x10dd   :  { %4469 = vmatprep.mubr.msk.f32.mxu1 %vm5399_vm0, %v5400_v1  ;;  %4835 = vmatpush3.bf16.msra.mxu1 %v5766_v42  ;;  %v5776_v44 = vpack.c.bf16 %v1192_v43, %v1191_v12 }
0x10de   :  { %4836 = vmatprep.subr.bf16.mxu1 %v5398_v0 }
0x10e1   :  { %4838 = vmatpush3.bf16.msra.mxu1 %v5776_v44 }
0x10e2   :  { %4845 = vmatprep.subr.bf16.mxu1 %v5398_v0 }
0x11ab   :  { %v962_v24 = vpop.f32.mrb[8].mxu1 }
0x11ac   :  { %v973_v25 = vadd.f32 %v962_v24, %v5668_v19  ;;  %v4431_v26 = vpop.f32.mrb[9].mxu1  ;;  %v966_v28 = vadd.f32 %v962_v24, %v893_v27 }
0x11ae   :  { %975 = vrot.lane.b32.xlu1 %v973_v25, %s5401_s27  ;;  %v4085_v29 = vmul.f32 -1.442695, %v966_v28 }
0x11af   :  { %v4449_v52 = vpop.f32.mrb[10].mxu1 }
0x11b0   :  { %5069 = vpow2.f32 %v4085_v29  ;;  %v1184_v53 = vadd.f32 %v4449_v52, %v4088_v51  ;;  %v1178_v56 = vpop.f32.mrb[11].mxu1 }
0x11b1   :  { %v1179_v57 = vadd.f32 %v4088_v51, %v1178_v56 }
0x11b2   :  { %1188 = vst.msk [vmem:[#allocation4 + $0x8] sm:$0xff] %vm244_vm2, %v1184_v53 }
0x11b3   :  { %1187 = vst.msk [vmem:[#allocation4] sm:$0xff] %vm244_vm2, %v1179_v57 }
0x11b9   :  { %v1194_v2 = vld [vmem:[#allocation4 + $0xe] sm:$0x3]  ;;  %v1302_v25 = vld [vmem:[#allocation4 + $0xc] sm:$0x3] }
0x11ba   :  { %v5070_v30 = vpop.eup %5069 }
0x11bb   :  { %v970_v31 = vadd.f32 1.0, %v5070_v30 }
0x11bd   :  { %5071 = vrcp.f32 %v970_v31 }
0x11c7   :  { %v5072_v32 = vpop.eup %5071 }
0x11c8   :  { %v985_v45 = vsub.f32 1.0, %v5072_v32  ;;  %v991_v48 = vmul.f32 %v5072_v32, %v887_v22 }
0x1220   :  { %v976_v33 = vpop.permute.xlu1 %975 }
0x1221   :  { %v978_v34 = vmul.f32 %v5072_v32, %v976_v33 }
0x1223   :  { %980 = vrot.lane.b32.xlu0 %v978_v34, %s5401_s27 }
0x1295   :  { %v981_v35 = vpop.permute.xlu0 %980 }
0x1296   :  { %v983_v7 = vadd.f32 %v981_v35, %v893_v27 }
0x1298   :  { %5073 = vtanh.f32 %v983_v7 }
0x12a2   :  { %v5074_v39 = vpop.eup %5073 }
0x12a3   :  { %987 = vrot.lane.b32.xlu1 %v5074_v39, %s5402_s5 }
0x12a7   :  { %1277 = vrot.lane.b32.xlu1 %v4092_v47, %s5401_s27 }
0x1315   :  { %v988_v46 = vpop.permute.xlu1 %987 }
0x1316   :  { %v990_v49 = vmul.f32 %v988_v46, %v985_v45  ;;  %v1406_v45 = vld [vmem:[#allocation4 + $0xa] sm:$0x3] }
0x1318   :  { %v5781_v50 = vadd.f32 %v991_v48, %v990_v49 }
0x1319   :  { %v5806_v60 = vpop.permute.xlu1 %1277 }
0x131a   :  { %994 = vrot.lane.b32.xlu0 %v5781_v50, %s5402_s5 }
0x138c   :  { %v995_v55 = vpop.permute.xlu0 %994 }
0x138d   :  { %997 = vst.msk [vmem:[#allocation2 + $0xc] sm:$0x3] %vm366_vm3, %v995_v55  ;;  %4441 = vmatmul.mubr.msk.f32.vlgmr.msra.gmra.mrb[6].mxu0 %vm253_vm4, %v995_v55 }
0x138e   :  { %4829 = vmatpush3.bf16.msra.mxu0 %v5766_v42  ;;  %4458 = vmatprep.mubr.msk.f32.mxu0 %vm5399_vm0, %v5400_v1 }
0x138f   :  { %4830 = vmatprep.subr.bf16.mxu0 %v5398_v0 }
0x1392   :  { %4832 = vmatpush3.bf16.msra.mxu0 %v5776_v44 }
0x1393   :  { %4839 = vmatprep.subr.bf16.mxu0 %v5398_v0 }
0x1395   :  { %4459 = vmatmul.mubr.f32.vlgmr.msra.gmra.mrb[8].mxu0 %v5400_v1 }
0x1396   :  { %4841 = vmatpush3.bf16.msra.mxu0 %v5766_v42  ;;  %4480 = vmatprep.mubr.msk.f32.mxu0 %vm5399_vm0, %v5400_v1 }
0x1397   :  { %4842 = vmatprep.subr.bf16.mxu0 %v5398_v0 }
0x139a   :  { %4844 = vmatpush3.bf16.msra.mxu0 %v5776_v44 }
0x139b   :  { %4851 = vmatprep.subr.bf16.mxu0 %v5398_v0 }
0x1460   :  { %v5804_v58 = vpop.f32.mrb[6].mxu0 }
0x1461   :  { %v4442_v59 = vpop.f32.mrb[7].mxu0 }
0x1468   :  { %v1261_v61 = vpop.f32.mrb[8].mxu0 }
0x1469   :  { %v4460_v62 = vpop.f32.mrb[9].mxu0  ;;  %v1280_v63 = vadd.f32 %v5806_v60, %v1261_v61  ;;  %v1265_v3 = vadd.f32 %v1261_v61, %v1194_v2 }
0x146b   :  { %1282 = vrot.lane.b32.xlu0 %v1280_v63, %s5401_s27  ;;  %v4091_v4 = vmul.f32 -1.442695, %v1265_v3 }
0x146d   :  { %5075 = vpow2.f32 %v4091_v4 }
0x1477   :  { %v5076_v5 = vpop.eup %5075 }
0x1478   :  { %v1269_v6 = vadd.f32 1.0, %v5076_v5 }
0x147a   :  { %5077 = vrcp.f32 %v1269_v6 }
0x1484   :  { %v5078_v8 = vpop.eup %5077 }
0x1485   :  { %v1292_v15 = vsub.f32 1.0, %v5078_v8  ;;  %v1298_v17 = vmul.f32 0.0, %v5078_v8 }
0x14dd   :  { %v1283_v9 = vpop.permute.xlu0 %1282 }
0x14de   :  { %v1285_v10 = vmul.f32 %v5078_v8, %v1283_v9  ;;  %v1510_v8 = vld [vmem:[#allocation4 + $0x8] sm:$0x3] }
0x14e0   :  { %1287 = vrot.lane.b32.xlu1 %v1285_v10, %s5401_s27 }
0x1552   :  { %v1288_v11 = vpop.permute.xlu1 %1287 }
0x1553   :  { %v1290_v14 = vadd.f32 %v1288_v11, %v1194_v2 }
0x1555   :  { %5079 = vtanh.f32 %v1290_v14 }
0x155f   :  { %v5080_v13 = vpop.eup %5079 }
0x1560   :  { %1294 = vrot.lane.b32.xlu0 %v5080_v13, %s5402_s5 }
0x15d2   :  { %v1295_v16 = vpop.permute.xlu0 %1294 }
0x15d3   :  { %v1297_v18 = vmul.f32 %v1295_v16, %v1292_v15 }
0x15d5   :  { %v5812_v20 = vadd.f32 %v1298_v17, %v1297_v18 }
0x15d7   :  { %1304 = vrot.lane.b32.xlu1 %v5812_v20, %s5402_s5 }
0x1649   :  { %v1305_v21 = vpop.permute.xlu1 %1304 }
0x164a   :  { %4470 = vmatmul.mubr.msk.f32.vlgmr.msra.gmra.mrb[12].mxu1 %vm253_vm4, %v1305_v21 }
0x164b   :  { %4847 = vmatpush3.bf16.msra.mxu1 %v5766_v42  ;;  %4491 = vmatprep.mubr.msk.f32.mxu1 %vm5399_vm0, %v5400_v1 }
0x164c   :  { %4848 = vmatprep.subr.bf16.mxu1 %v5398_v0 }
0x164f   :  { %4850 = vmatpush3.bf16.msra.mxu1 %v5776_v44 }
0x1650   :  { %4857 = vmatprep.subr.bf16.mxu1 %v5398_v0 }
0x171d   :  { %v1374_v22 = vpop.f32.mrb[12].mxu1 }
0x171e   :  { %v1385_v23 = vadd.f32 %v1374_v22, %v5806_v60  ;;  %v4471_v24 = vpop.f32.mrb[13].mxu1  ;;  %v1378_v26 = vadd.f32 %v1374_v22, %v1302_v25 }
0x1720   :  { %1387 = vrot.lane.b32.xlu0 %v1385_v23, %s5401_s27  ;;  %v4094_v27 = vmul.f32 -1.442695, %v1378_v26 }
0x1722   :  { %5081 = vpow2.f32 %v4094_v27 }
0x172c   :  { %v5082_v28 = vpop.eup %5081 }
0x172d   :  { %v1382_v29 = vadd.f32 1.0, %v5082_v28 }
0x172f   :  { %5083 = vrcp.f32 %v1382_v29 }
0x1739   :  { %v5084_v30 = vpop.eup %5083 }
0x173a   :  { %v1397_v7 = vsub.f32 1.0, %v5084_v30  ;;  %v1403_v37 = vmul.f32 %v5084_v30, %v5812_v20 }
0x1792   :  { %v1388_v31 = vpop.permute.xlu0 %1387 }
0x1793   :  { %v1390_v32 = vmul.f32 %v5084_v30, %v1388_v31  ;;  %v1614_v31 = vld [vmem:[#allocation4 + $0x6] sm:$0x3] }
0x1795   :  { %1392 = vrot.lane.b32.xlu1 %v1390_v32, %s5401_s27 }
0x1807   :  { %v1393_v33 = vpop.permute.xlu1 %1392 }
0x1808   :  { %v1395_v34 = vadd.f32 %v1393_v33, %v1302_v25 }
0x180a   :  { %5085 = vtanh.f32 %v1395_v34 }
0x1814   :  { %v5086_v35 = vpop.eup %5085 }
0x1815   :  { %1399 = vrot.lane.b32.xlu0 %v5086_v35, %s5402_s5 }
0x1887   :  { %v1400_v36 = vpop.permute.xlu0 %1399 }
0x1888   :  { %v1402_v38 = vmul.f32 %v1400_v36, %v1397_v7 }
0x188a   :  { %v1404_v39 = vadd.f32 %v1403_v37, %v1402_v38 }
0x188c   :  { %1405 = vst.msk [vmem:[#allocation2 + $0xc] sm:$0x3] %vm1300_vm5, %v1404_v39  ;;  %1408 = vrot.lane.b32.xlu1 %v1404_v39, %s5402_s5 }
0x18fe   :  { %v1409_v40 = vpop.permute.xlu1 %1408 }
0x18ff   :  { %4481 = vmatmul.mubr.msk.f32.vlgmr.msra.gmra.mrb[10].mxu0 %vm253_vm4, %v1409_v40 }
0x1900   :  { %4853 = vmatpush3.bf16.msra.mxu0 %v5766_v42  ;;  %4502 = vmatprep.mubr.msk.f32.mxu0 %vm5399_vm0, %v5400_v1 }
0x1901   :  { %4854 = vmatprep.subr.bf16.mxu0 %v5398_v0 }
0x1904   :  { %4856 = vmatpush3.bf16.msra.mxu0 %v5776_v44 }
0x1905   :  { %4863 = vmatprep.subr.bf16.mxu0 %v5398_v0 }
0x19d2   :  { %v1478_v41 = vpop.f32.mrb[10].mxu0 }
0x19d3   :  { %v1489_v12 = vadd.f32 %v1478_v41, %v5806_v60  ;;  %v4482_v43 = vpop.f32.mrb[11].mxu0  ;;  %v1482_v46 = vadd.f32 %v1478_v41, %v1406_v45 }
0x19d5   :  { %1491 = vrot.lane.b32.xlu0 %v1489_v12, %s5401_s27  ;;  %v4096_v47 = vmul.f32 -1.442695, %v1482_v46 }
0x19d7   :  { %5087 = vpow2.f32 %v4096_v47 }
0x19e1   :  { %v5088_v48 = vpop.eup %5087 }
0x19e2   :  { %v1486_v49 = vadd.f32 1.0, %v5088_v48 }
0x19e4   :  { %5089 = vrcp.f32 %v1486_v49 }
0x19ee   :  { %v5090_v51 = vpop.eup %5089 }
0x19ef   :  { %v1501_v59 = vsub.f32 1.0, %v5090_v51  ;;  %v1507_v62 = vmul.f32 %v5090_v51, %v1404_v39 }
0x1a47   :  { %v1492_v52 = vpop.permute.xlu0 %1491 }
0x1a48   :  { %v1494_v53 = vmul.f32 %v5090_v51, %v1492_v52  ;;  %v1718_v52 = vld [vmem:[#allocation4 + $0x4] sm:$0x3] }
0x1a4a   :  { %1496 = vrot.lane.b32.xlu1 %v1494_v53, %s5401_s27 }
0x1abc   :  { %v1497_v55 = vpop.permute.xlu1 %1496 }
0x1abd   :  { %v1499_v56 = vadd.f32 %v1497_v55, %v1406_v45 }
0x1abf   :  { %5091 = vtanh.f32 %v1499_v56 }
0x1ac9   :  { %v5092_v57 = vpop.eup %5091 }
0x1aca   :  { %1503 = vrot.lane.b32.xlu0 %v5092_v57, %s5402_s5 }
0x1b3c   :  { %v1504_v61 = vpop.permute.xlu0 %1503 }
0x1b3d   :  { %v1506_v63 = vmul.f32 %v1504_v61, %v1501_v59 }
0x1b3f   :  { %v1508_v2 = vadd.f32 %v1507_v62, %v1506_v63 }
0x1b41   :  { %1509 = vst.msk [vmem:[#allocation2 + $0xa] sm:$0x3] %vm1300_vm5, %v1508_v2  ;;  %1512 = vrot.lane.b32.xlu1 %v1508_v2, %s5402_s5 }
0x1bb3   :  { %v1513_v3 = vpop.permute.xlu1 %1512 }
0x1bb4   :  { %4492 = vmatmul.mubr.msk.f32.vlgmr.msra.gmra.mrb[14].mxu1 %vm253_vm4, %v1513_v3 }
0x1bb5   :  { %4859 = vmatpush3.bf16.msra.mxu1 %v5766_v42  ;;  %4513 = vmatprep.mubr.msk.f32.mxu1 %vm5399_vm0, %v5400_v1 }
0x1bb6   :  { %4860 = vmatprep.subr.bf16.mxu1 %v5398_v0 }
0x1bb9   :  { %4862 = vmatpush3.bf16.msra.mxu1 %v5776_v44 }
0x1bba   :  { %4869 = vmatprep.subr.bf16.mxu1 %v5398_v0 }
0x1c87   :  { %v1582_v4 = vpop.f32.mrb[14].mxu1 }
0x1c88   :  { %v1593_v5 = vadd.f32 %v1582_v4, %v5806_v60  ;;  %v4493_v6 = vpop.f32.mrb[15].mxu1  ;;  %v1586_v9 = vadd.f32 %v1582_v4, %v1510_v8 }
0x1c8a   :  { %1595 = vrot.lane.b32.xlu0 %v1593_v5, %s5401_s27  ;;  %v4098_v10 = vmul.f32 -1.442695, %v1586_v9 }
0x1c8c   :  { %5093 = vpow2.f32 %v4098_v10 }
0x1c96   :  { %v5094_v11 = vpop.eup %5093 }
0x1c97   :  { %v1590_v14 = vadd.f32 1.0, %v5094_v11 }
0x1c99   :  { %5095 = vrcp.f32 %v1590_v14  ;;  %v1822_v14 = vld [vmem:[#allocation4 + $0x2] sm:$0x3] }
0x1ca3   :  { %v5096_v13 = vpop.eup %5095 }
0x1ca4   :  { %v1605_v22 = vsub.f32 1.0, %v5096_v13  ;;  %v1611_v24 = vmul.f32 %v5096_v13, %v1508_v2 }
0x1cfc   :  { %v1596_v15 = vpop.permute.xlu0 %1595 }
0x1cfd   :  { %v1598_v16 = vmul.f32 %v5096_v13, %v1596_v15 }
0x1cff   :  { %1600 = vrot.lane.b32.xlu1 %v1598_v16, %s5401_s27 }
0x1d71   :  { %v1601_v17 = vpop.permute.xlu1 %1600 }
0x1d72   :  { %v1603_v18 = vadd.f32 %v1601_v17, %v1510_v8 }
0x1d74   :  { %5097 = vtanh.f32 %v1603_v18 }
0x1d7e   :  { %v5098_v21 = vpop.eup %5097 }
0x1d7f   :  { %1607 = vrot.lane.b32.xlu0 %v5098_v21, %s5402_s5 }
0x1df1   :  { %v1608_v23 = vpop.permute.xlu0 %1607 }
0x1df2   :  { %v1610_v25 = vmul.f32 %v1608_v23, %v1605_v22 }
0x1df4   :  { %v1612_v26 = vadd.f32 %v1611_v24, %v1610_v25 }
0x1df6   :  { %1613 = vst.msk [vmem:[#allocation2 + $0x8] sm:$0x3] %vm1300_vm5, %v1612_v26  ;;  %1616 = vrot.lane.b32.xlu1 %v1612_v26, %s5402_s5 }
0x1e68   :  { %v1617_v27 = vpop.permute.xlu1 %1616 }
0x1e69   :  { %4503 = vmatmul.mubr.msk.f32.vlgmr.msra.gmra.mrb[12].mxu0 %vm253_vm4, %v1617_v27  ;;  %v1071_v27 = vadd.f32 %v5804_v58, %v5785_v54 }
0x1e6a   :  { %4865 = vmatpush3.bf16.msra.mxu0 %v5766_v42  ;;  %4524 = vmatprep.mubr.msk.f32.mxu0 %vm5399_vm0, %v5400_v1 }
0x1e6b   :  { %4866 = vmatprep.subr.bf16.mxu0 %v5398_v0 }
0x1e6e   :  { %4868 = vmatpush3.bf16.msra.mxu0 %v5776_v44 }
0x1f3c   :  { %v1686_v28 = vpop.f32.mrb[12].mxu0 }
0x1f3d   :  { %v1697_v29 = vadd.f32 %v1686_v28, %v5806_v60  ;;  %v4504_v30 = vpop.f32.mrb[13].mxu0  ;;  %v1690_v32 = vadd.f32 %v1686_v28, %v1614_v31  ;;  %v4087_v28 = vmul.f32 -1.442695, %v1071_v27 }
0x1f3f   :  { %1699 = vrot.lane.b32.xlu0 %v1697_v29, %s5401_s27  ;;  %v4100_v33 = vmul.f32 -1.442695, %v1690_v32 }
0x1f41   :  { %5099 = vpow2.f32 %v4100_v33 }
0x1f4b   :  { %v5100_v34 = vpop.eup %5099 }
0x1f4c   :  { %v1694_v35 = vadd.f32 1.0, %v5100_v34 }
0x1f4e   :  { %5101 = vrcp.f32 %v1694_v35 }
0x1f58   :  { %v5102_v7 = vpop.eup %5101 }
0x1f59   :  { %v1709_v41 = vsub.f32 1.0, %v5102_v7  ;;  %v1715_v43 = vmul.f32 %v5102_v7, %v1612_v26  ;;  %v1078_v26 = vadd.f32 %v5804_v58, %v5668_v19 }
0x1fb1   :  { %v1700_v36 = vpop.permute.xlu0 %1699 }
0x1fb2   :  { %v1702_v37 = vmul.f32 %v5102_v7, %v1700_v36 }
0x1fb4   :  { %1704 = vrot.lane.b32.xlu1 %v1702_v37, %s5401_s27 }
0x2026   :  { %v1705_v38 = vpop.permute.xlu1 %1704 }
0x2027   :  { %v1707_v39 = vadd.f32 %v1705_v38, %v1614_v31 }
0x2029   :  { %5103 = vtanh.f32 %v1707_v39 }
0x2033   :  { %v5104_v40 = vpop.eup %5103 }
0x2034   :  { %1711 = vrot.lane.b32.xlu0 %v5104_v40, %s5402_s5 }
0x20a6   :  { %v1712_v12 = vpop.permute.xlu0 %1711 }
0x20a7   :  { %v1714_v45 = vmul.f32 %v1712_v12, %v1709_v41 }
0x20a9   :  { %v1716_v46 = vadd.f32 %v1715_v43, %v1714_v45 }
0x20ab   :  { %1717 = vst.msk [vmem:[#allocation2 + $0x6] sm:$0x3] %vm1300_vm5, %v1716_v46  ;;  %1720 = vrot.lane.b32.xlu1 %v1716_v46, %s5402_s5 }
0x211d   :  { %v1721_v47 = vpop.permute.xlu1 %1720 }
0x211e   :  { %4514 = vmatmul.mubr.msk.f32.vlgmr.msra.gmra.mrb[16].mxu1 %vm253_vm4, %v1721_v47 }
0x211f   :  { %4871 = vmatpush3.bf16.msra.mxu1 %v5766_v42  ;;  %4535 = vmatprep.mubr.msk.f32.mxu1 %vm5399_vm0, %v5400_v1 }
0x2120   :  { %4872 = vmatprep.subr.bf16.mxu1 %v5398_v0 }
0x2123   :  { %4874 = vmatpush3.bf16.msra.mxu1 %v5776_v44 }
0x2124   :  { %4891 = vmatprep.subr.bf16.mxu1 %v5398_v0 }
0x21f1   :  { %v1790_v48 = vpop.f32.mrb[16].mxu1 }
0x21f2   :  { %v1801_v49 = vadd.f32 %v1790_v48, %v5806_v60  ;;  %v4515_v51 = vpop.f32.mrb[17].mxu1  ;;  %v1794_v53 = vadd.f32 %v1790_v48, %v1718_v52 }
0x21f4   :  { %1803 = vrot.lane.b32.xlu0 %v1801_v49, %s5401_s27  ;;  %v4102_v55 = vmul.f32 -1.442695, %v1794_v53 }
0x21f6   :  { %5105 = vpow2.f32 %v4102_v55 }
0x2200   :  { %v5106_v42 = vpop.eup %5105 }
0x2201   :  { %v1798_v56 = vadd.f32 1.0, %v5106_v42 }
0x2203   :  { %5107 = vrcp.f32 %v1798_v56 }
0x220d   :  { %v5108_v57 = vpop.eup %5107 }
0x220e   :  { %v1813_v2 = vsub.f32 1.0, %v5108_v57  ;;  %v1819_v4 = vmul.f32 %v5108_v57, %v1716_v46 }
0x2266   :  { %v1804_v59 = vpop.permute.xlu0 %1803 }
0x2267   :  { %v1806_v61 = vmul.f32 %v5108_v57, %v1804_v59  ;;  %v2133_v57 = vld [vmem:[%s6289_s10 + $0x10] sm:$0xff] }
0x2269   :  { %1808 = vrot.lane.b32.xlu1 %v1806_v61, %s5401_s27  ;;  %v2134_v61 = vld [vmem:[%s6289_s10 + $0x18] sm:$0xff] }
0x22db   :  { %v1809_v44 = vpop.permute.xlu1 %1808 }
0x22dc   :  { %v1811_v62 = vadd.f32 %v1809_v44, %v1718_v52  ;;  %v2032_v44 = vld [vmem:[%s6288_s9] sm:$0xff] }
0x22de   :  { %5109 = vtanh.f32 %v1811_v62  ;;  %v2033_v62 = vld [vmem:[%s6288_s9 + $0x8] sm:$0xff] }
0x22e8   :  { %v5110_v63 = vpop.eup %5109 }
0x22e9   :  { %1815 = vrot.lane.b32.xlu0 %v5110_v63, %s5402_s5  ;;  %v4875_v63 = vpack.c.bf16 %v2033_v62, %v2032_v44 }
0x22eb   :  { %4876 = vmatprep.subr.bf16.mxu0 %v4875_v63 }
0x235b   :  { %v1816_v3 = vpop.permute.xlu0 %1815 }
0x235c   :  { %v1818_v5 = vmul.f32 %v1816_v3, %v1813_v2  ;;  %v5932_v2 = vpack.c.bf16 %v2134_v61, %v2133_v57  ;;  %v2034_v3 = vld [vmem:[%s6288_s9 + $0x10] sm:$0xff] }
0x235e   :  { %v1820_v6 = vadd.f32 %v1819_v4, %v1818_v5  ;;  %v2035_v4 = vld [vmem:[%s6288_s9 + $0x18] sm:$0xff] }
0x2360   :  { %1821 = vst.msk [vmem:[#allocation2 + $0x4] sm:$0x3] %vm1300_vm5, %v1820_v6  ;;  %1824 = vrot.lane.b32.xlu1 %v1820_v6, %s5402_s5 }
0x23d2   :  { %v1825_v8 = vpop.permute.xlu1 %1824 }
0x23d3   :  { %4525 = vmatmul.mubr.msk.f32.vlgmr.msra.gmra.mrb[14].mxu0 %vm253_vm4, %v1825_v8 }
0x23d4   :  { %4878 = vmatpush3.bf16.msra.mxu0 %v4875_v63 }
0x24a6   :  { %v1894_v9 = vpop.f32.mrb[14].mxu0 }
0x24a7   :  { %v1905_v10 = vadd.f32 %v1894_v9, %v5806_v60  ;;  %v4526_v11 = vpop.f32.mrb[15].mxu0  ;;  %v1898_v13 = vadd.f32 %v1894_v9, %v1822_v14  ;;  %v2036_v9 = vld [vmem:[%s6288_s9 + $0x20] sm:$0xff] }
0x24a9   :  { %1907 = vrot.lane.b32.xlu0 %v1905_v10, %s5401_s27  ;;  %v4104_v15 = vmul.f32 -1.442695, %v1898_v13  ;;  %v2037_v10 = vld [vmem:[%s6288_s9 + $0x28] sm:$0xff]  ;;  %v2039_v13 = vld [vmem:[%s6288_s9 + $0x38] sm:$0xff] }
0x24aa   :  { %v4883_v11 = vpack.c.bf16 %v2037_v10, %v2036_v9 }
0x24ab   :  { %5111 = vpow2.f32 %v4104_v15 }
0x24b5   :  { %v5112_v16 = vpop.eup %5111 }
0x24b6   :  { %v1902_v17 = vadd.f32 1.0, %v5112_v16 }
0x24b8   :  { %5113 = vrcp.f32 %v1902_v17  ;;  %v4111_v17 = vld [vmem:[#allocation10] ss:$0 sm:$0xff] }
0x24c2   :  { %v5114_v18 = vpop.eup %5113 }
0x24c3   :  { %v1917_v31 = vsub.f32 1.0, %v5114_v18  ;;  %v1923_v33 = vmul.f32 %v5114_v18, %v1820_v6  ;;  %v4879_v6 = vpack.c.bf16 %v2035_v4, %v2034_v3 }
0x24c5   :  { %4880 = vmatprep.subr.bf16.mxu0 %v4879_v6 }
0x24c6   :  { %4882 = vmatpush3.bf16.msra.mxu0 %v4879_v6 }
0x24c7   :  { %4884 = vmatprep.subr.bf16.mxu0 %v4883_v11 }
0x24ca   :  { %4886 = vmatpush3.bf16.msra.mxu0 %v4883_v11 }
0x251b   :  { %v1908_v21 = vpop.permute.xlu0 %1907 }
0x251c   :  { %v1910_v22 = vmul.f32 %v5114_v18, %v1908_v21 }
0x251e   :  { %1912 = vrot.lane.b32.xlu1 %v1910_v22, %s5401_s27 }
0x2590   :  { %v1913_v23 = vpop.permute.xlu1 %1912 }
0x2591   :  { %v1915_v24 = vadd.f32 %v1913_v23, %v1822_v14  ;;  %v2038_v14 = vld [vmem:[%s6288_s9 + $0x30] sm:$0xff] }
0x2592   :  { %v4887_v15 = vpack.c.bf16 %v2039_v13, %v2038_v14 }
0x2593   :  { %5115 = vtanh.f32 %v1915_v24 }
0x2594   :  { %5117 = vpow2.f32 %v4087_v28  ;;  %4888 = vmatprep.subr.bf16.mxu0 %v4887_v15 }
0x2595   :  { %4890 = vmatpush3.bf16.msra.mxu0 %v4887_v15 }
0x2596   :  { %4903 = vmatprep.subr.bf16.mxu0 %v5398_v0 }
0x259d   :  { %v5116_v25 = vpop.eup %5115 }
0x259e   :  { %1919 = vrot.lane.b32.xlu0 %v5116_v25, %s5402_s5  ;;  %v5118_v29 = vpop.eup %5117 }
0x259f   :  { %v1075_v30 = vadd.f32 1.0, %v5118_v29 }
0x25a1   :  { %5119 = vrcp.f32 %v1075_v30 }
0x25a2   :  { %1080 = vrot.lane.b32.xlu0 %v1078_v26, %s5401_s27 }
0x25ab   :  { %v5120_v7 = vpop.eup %5119 }
0x25ac   :  { %v1090_v40 = vsub.f32 1.0, %v5120_v7  ;;  %v1096_v12 = vmul.f32 %v5120_v7, %v5781_v50 }
0x2610   :  { %v1920_v32 = vpop.permute.xlu0 %1919 }
0x2611   :  { %v1922_v34 = vmul.f32 %v1920_v32, %v1917_v31  ;;  %v4107_v31 = vld [vmem:[#allocation9] ss:$0 sm:$0xff] }
0x2613   :  { %v5891_v35 = vadd.f32 %v1923_v33, %v1922_v34 }
0x2614   :  { %v1081_v36 = vpop.permute.xlu0 %1080 }
0x2615   :  { %1925 = vst.msk [vmem:[#allocation2 + $0x2] sm:$0x3] %vm1300_vm5, %v5891_v35  ;;  %v1083_v19 = vmul.f32 %v5120_v7, %v1081_v36  ;;  %1928 = vrot.lane.b32.xlu1 %v5891_v35, %s5402_s5 }
0x2617   :  { %1085 = vrot.lane.b32.xlu0 %v1083_v19, %s5401_s27 }
0x2687   :  { %v1929_v58 = vpop.permute.xlu1 %1928 }
0x2688   :  { %4536 = vmatmul.mubr.msk.f32.vlgmr.msra.gmra.mrb[18].mxu1 %vm253_vm4, %v1929_v58 }
0x2689   :  { %v1086_v37 = vpop.permute.xlu0 %1085  ;;  %4565 = vmatprep.mubr.msk.f32.mxu1 %vm5399_vm0, %v5400_v1 }
0x268a   :  { %v1088_v38 = vadd.f32 %v1086_v37, %v5785_v54  ;;  %v1926_v54 = vld [vmem:[#allocation4] sm:$0x3] }
0x268c   :  { %5121 = vtanh.f32 %v1088_v38 }
0x2696   :  { %v5122_v39 = vpop.eup %5121 }
0x2697   :  { %1092 = vrot.lane.b32.xlu0 %v5122_v39, %s5402_s5 }
0x2709   :  { %v1093_v41 = vpop.permute.xlu0 %1092 }
0x270a   :  { %v1095_v43 = vmul.f32 %v1093_v41, %v1090_v40 }
0x270c   :  { %v1097_v45 = vadd.f32 %v1096_v12, %v1095_v43 }
0x270e   :  { %1099 = vrot.lane.b32.xlu0 %v1097_v45, %s5402_s5 }
0x275b   :  { %v1998_v46 = vpop.f32.mrb[18].mxu1 }
0x275c   :  { %v2009_v47 = vadd.f32 %v1998_v46, %v5806_v60  ;;  %v4537_v48 = vpop.f32.mrb[19].mxu1  ;;  %v2002_v51 = vadd.f32 %v1998_v46, %v1926_v54  ;;  %v2131_v60 = vld [vmem:[%s6289_s10] sm:$0xff] }
0x275e   :  { %2011 = vrot.lane.b32.xlu1 %v2009_v47, %s5401_s27  ;;  %v4106_v52 = vmul.f32 -1.442695, %v2002_v51 }
0x2760   :  { %5123 = vpow2.f32 %v4106_v52 }
0x276a   :  { %v5124_v50 = vpop.eup %5123 }
0x276b   :  { %v2006_v53 = vadd.f32 1.0, %v5124_v50 }
0x276d   :  { %5125 = vrcp.f32 %v2006_v53 }
0x2777   :  { %v5126_v55 = vpop.eup %5125 }
0x2778   :  { %v2021_v22 = vsub.f32 1.0, %v5126_v55  ;;  %v2027_v24 = vmul.f32 %v5126_v55, %v5891_v35 }
0x2780   :  { %v1100_v49 = vpop.permute.xlu0 %1099 }
0x2781   :  { %1102 = vst.msk [vmem:[#allocation2 + $0xe] sm:$0x3] %vm366_vm3, %v1100_v49 }
0x2782   :  { %1301 = vst.msk [vmem:[#allocation2 + $0xe] sm:$0x3] %vm1300_vm5, %v5812_v20  ;;  %v2132_v20 = vld [vmem:[%s6289_s10 + $0x8] sm:$0xff] }
0x2783   :  { %v5920_v59 = vpack.c.bf16 %v2132_v20, %v2131_v60 }
0x2785   :  { %4893 = vmatpush3.bf16.msra.mxu1 %v5920_v59 }
0x2786   :  { %4894 = vmatprep.subr.bf16.mxu1 %v5398_v0 }
0x2789   :  { %4896 = vmatpush3.bf16.msra.mxu1 %v5932_v2  ;;  %v5975_v30 = vld [vmem:[#allocation2 + $0x8] sm:$0xff] }
0x278a   :  { %4897 = vmatprep.subr.bf16.mxu1 %v5398_v0 }
0x278c   :  { %4566 = vmatmul.mubr.f32.vlgmr.msra.gmra.mrb[20].mxu1 %v5400_v1 }
0x278d   :  { %4899 = vmatpush3.bf16.msra.mxu1 %v5920_v59  ;;  %4576 = vmatprep.mubr.msk.f32.mxu1 %vm5399_vm0, %v5400_v1 }
0x278e   :  { %4900 = vmatprep.subr.bf16.mxu1 %v5398_v0 }
0x2791   :  { %4902 = vmatpush3.bf16.msra.mxu1 %v5932_v2 }
0x2792   :  { %4909 = vmatprep.subr.bf16.mxu1 %v5398_v0 }
0x27d0   :  { %v2012_v42 = vpop.permute.xlu1 %2011 }
0x27d1   :  { %v2014_v56 = vmul.f32 %v5126_v55, %v2012_v42 }
0x27d3   :  { %2016 = vrot.lane.b32.xlu1 %v2014_v56, %s5401_s27 }
0x2845   :  { %v2017_v5 = vpop.permute.xlu1 %2016 }
0x2846   :  { %v2019_v8 = vadd.f32 %v2017_v5, %v1926_v54 }
0x2848   :  { %5127 = vtanh.f32 %v2019_v8 }
0x2852   :  { %v5128_v16 = vpop.eup %5127 }
0x2853   :  { %2023 = vrot.lane.b32.xlu1 %v5128_v16, %s5402_s5 }
0x2857   :  { %2219 = vrot.lane.b32.xlu1 %v4111_v17, %s5401_s27 }
0x285f   :  { %v2203_v18 = vpop.f32.mrb[20].mxu1 }
0x2860   :  { %v4567_v21 = vpop.f32.mrb[21].mxu1 }
0x28c5   :  { %v2024_v23 = vpop.permute.xlu1 %2023 }
0x28c6   :  { %v2026_v25 = vmul.f32 %v2024_v23, %v2021_v22 }
0x28c8   :  { %v2028_v26 = vadd.f32 %v2027_v24, %v2026_v25 }
0x28c9   :  { %v5966_v27 = vpop.permute.xlu1 %2219 }
0x28ca   :  { %2029 = vst.msk [vmem:[#allocation2] sm:$0x3] %vm1300_vm5, %v2028_v26  ;;  %v2222_v28 = vadd.f32 %v5966_v27, %v2203_v18 }
0x28cc   :  { %2224 = vrot.lane.b32.xlu0 %v2222_v28, %s5401_s27 }
0x28d1   :  { %v5971_v29 = vld [vmem:[#allocation2] sm:$0xff] }
0x28d2   :  { %4554 = vmatprep.mubr.msk.f32.mxu0 %vm2047_vm6, %v5971_v29 }
0x28d3   :  { %4555 = vmatmul.mubr.msk.f32.vlgmr.msra.gmra.mrb[16].mxu0 %vm2047_vm6, %v5975_v30 }
0x28d4   :  { %4905 = vmatpush3.bf16.msra.mxu0 %v5920_v59  ;;  %4587 = vmatprep.mubr.msk.f32.mxu0 %vm5399_vm0, %v5400_v1 }
0x28d5   :  { %4906 = vmatprep.subr.bf16.mxu0 %v5398_v0 }
0x28d8   :  { %4908 = vmatpush3.bf16.msra.mxu0 %v5932_v2 }
0x28d9   :  { %4915 = vmatprep.subr.bf16.mxu0 %v5398_v0 }
0x293e   :  { %v2225_v38 = vpop.permute.xlu0 %2224 }
0x29a6   :  { %v4556_v32 = vpop.f32.mrb[16].mxu0 }
0x29a7   :  { %v2126_v33 = vadd.f32 %v4556_v32, %v4107_v31  ;;  %v2120_v34 = vpop.f32.mrb[17].mxu0 }
0x29a8   :  { %v2121_v35 = vadd.f32 %v4107_v31, %v2120_v34 }
0x29a9   :  { %2130 = vst.msk [vmem:[#allocation4 + $0x8] sm:$0xff] %vm244_vm2, %v2126_v33 }
0x29aa   :  { %2129 = vst.msk [vmem:[#allocation4] sm:$0xff] %vm244_vm2, %v2121_v35 }
0x29b1   :  { %v2136_v7 = vld [vmem:[#allocation4] sm:$0x3]  ;;  %v2247_v53 = vld [vmem:[#allocation4 + $0x2] sm:$0x3]  ;;  %v2352_v13 = vld [vmem:[#allocation4 + $0x4] sm:$0x3] }
0x29b2   :  { %v2207_v36 = vadd.f32 %v2203_v18, %v2136_v7 }
0x29b4   :  { %v4110_v19 = vmul.f32 -1.442695, %v2207_v36 }
0x29b6   :  { %5129 = vpow2.f32 %v4110_v19 }
0x29c0   :  { %v5130_v58 = vpop.eup %5129 }
0x29c1   :  { %v2211_v37 = vadd.f32 1.0, %v5130_v58  ;;  %v2457_v58 = vld [vmem:[#allocation4 + $0x6] sm:$0x3] }
0x29c3   :  { %5131 = vrcp.f32 %v2211_v37 }
0x29cd   :  { %v5132_v39 = vpop.eup %5131 }
0x29ce   :  { %v2227_v40 = vmul.f32 %v5132_v39, %v2225_v38  ;;  %v2234_v45 = vsub.f32 1.0, %v5132_v39  ;;  %v2240_v47 = vmul.f32 0.0, %v5132_v39 }
0x29d0   :  { %2229 = vrot.lane.b32.xlu1 %v2227_v40, %s5401_s27 }
0x2a42   :  { %v2230_v41 = vpop.permute.xlu1 %2229 }
0x2a43   :  { %v2232_v12 = vadd.f32 %v2230_v41, %v2136_v7 }
0x2a45   :  { %5133 = vtanh.f32 %v2232_v12 }
0x2a4f   :  { %v5134_v43 = vpop.eup %5133 }
0x2a50   :  { %2236 = vrot.lane.b32.xlu0 %v5134_v43, %s5402_s5 }
0x2ac2   :  { %v2237_v46 = vpop.permute.xlu0 %2236 }
0x2ac3   :  { %v2239_v48 = vmul.f32 %v2237_v46, %v2234_v45 }
0x2ac5   :  { %v2241_v49 = vadd.f32 %v2240_v47, %v2239_v48 }
0x2ac7   :  { %2243 = vrot.lane.b32.xlu1 %v2241_v49, %s5402_s5 }
0x2b39   :  { %v2244_v54 = vpop.permute.xlu1 %2243 }
0x2b3a   :  { %2246 = vst.msk [vmem:[#allocation3] sm:$0x3] %vm366_vm3, %v2244_v54  ;;  %4577 = vmatmul.mubr.msk.f32.vlgmr.msra.gmra.mrb[22].mxu1 %vm253_vm4, %v2244_v54 }
0x2b3b   :  { %4911 = vmatpush3.bf16.msra.mxu1 %v5920_v59  ;;  %4598 = vmatprep.mubr.msk.f32.mxu1 %vm5399_vm0, %v5400_v1 }
0x2b3c   :  { %4912 = vmatprep.subr.bf16.mxu1 %v5398_v0 }
0x2b3f   :  { %4914 = vmatpush3.bf16.msra.mxu1 %v5932_v2 }
0x2b40   :  { %4921 = vmatprep.subr.bf16.mxu1 %v5398_v0 }
0x2c0d   :  { %v2316_v51 = vpop.f32.mrb[22].mxu1 }
0x2c0e   :  { %v2327_v52 = vadd.f32 %v2316_v51, %v5966_v27  ;;  %v4578_v50 = vpop.f32.mrb[23].mxu1  ;;  %v2320_v55 = vadd.f32 %v2316_v51, %v2247_v53 }
0x2c10   :  { %2329 = vrot.lane.b32.xlu0 %v2327_v52, %s5401_s27  ;;  %v4113_v42 = vmul.f32 -1.442695, %v2320_v55 }
0x2c12   :  { %5135 = vpow2.f32 %v4113_v42 }
0x2c1c   :  { %v5136_v56 = vpop.eup %5135 }
0x2c1d   :  { %v2324_v60 = vadd.f32 1.0, %v5136_v56  ;;  %v2562_v56 = vld [vmem:[#allocation4 + $0x8] sm:$0x3] }
0x2c1f   :  { %5137 = vrcp.f32 %v2324_v60 }
0x2c29   :  { %v5138_v20 = vpop.eup %5137 }
0x2c2a   :  { %v2339_v3 = vsub.f32 1.0, %v5138_v20  ;;  %v2345_v5 = vmul.f32 %v5138_v20, %v2241_v49 }
0x2c82   :  { %v2330_v57 = vpop.permute.xlu0 %2329 }
0x2c83   :  { %v2332_v61 = vmul.f32 %v5138_v20, %v2330_v57 }
0x2c85   :  { %2334 = vrot.lane.b32.xlu1 %v2332_v61, %s5401_s27 }
0x2cf7   :  { %v2335_v44 = vpop.permute.xlu1 %2334 }
0x2cf8   :  { %v2337_v62 = vadd.f32 %v2335_v44, %v2247_v53 }
0x2cfa   :  { %5139 = vtanh.f32 %v2337_v62 }
0x2d04   :  { %v5140_v63 = vpop.eup %5139 }
0x2d05   :  { %2341 = vrot.lane.b32.xlu0 %v5140_v63, %s5402_s5 }
0x2d77   :  { %v2342_v4 = vpop.permute.xlu0 %2341 }
0x2d78   :  { %v2344_v6 = vmul.f32 %v2342_v4, %v2339_v3 }
0x2d7a   :  { %v2346_v8 = vadd.f32 %v2345_v5, %v2344_v6 }
0x2d7c   :  { %2348 = vrot.lane.b32.xlu1 %v2346_v8, %s5402_s5 }
0x2dee   :  { %v2349_v9 = vpop.permute.xlu1 %2348 }
0x2def   :  { %2351 = vst.msk [vmem:[#allocation3 + $0x2] sm:$0x3] %vm366_vm3, %v2349_v9  ;;  %4588 = vmatmul.mubr.msk.f32.vlgmr.msra.gmra.mrb[18].mxu0 %vm253_vm4, %v2349_v9 }
0x2df0   :  { %4917 = vmatpush3.bf16.msra.mxu0 %v5920_v59  ;;  %4609 = vmatprep.mubr.msk.f32.mxu0 %vm5399_vm0, %v5400_v1 }
0x2df1   :  { %4918 = vmatprep.subr.bf16.mxu0 %v5398_v0 }
0x2df4   :  { %4920 = vmatpush3.bf16.msra.mxu0 %v5932_v2 }
0x2df5   :  { %4927 = vmatprep.subr.bf16.mxu0 %v5398_v0 }
0x2ec2   :  { %v2421_v10 = vpop.f32.mrb[18].mxu0 }
0x2ec3   :  { %v2432_v11 = vadd.f32 %v2421_v10, %v5966_v27  ;;  %v4589_v14 = vpop.f32.mrb[19].mxu0  ;;  %v2425_v15 = vadd.f32 %v2421_v10, %v2352_v13 }
0x2ec5   :  { %2434 = vrot.lane.b32.xlu0 %v2432_v11, %s5401_s27  ;;  %v4115_v16 = vmul.f32 -1.442695, %v2425_v15 }
0x2ec7   :  { %5141 = vpow2.f32 %v4115_v16 }
0x2ed1   :  { %v5142_v17 = vpop.eup %5141 }
0x2ed2   :  { %v2429_v18 = vadd.f32 1.0, %v5142_v17  ;;  %v2667_v17 = vld [vmem:[#allocation4 + $0xa] sm:$0x3] }
0x2ed4   :  { %5143 = vrcp.f32 %v2429_v18 }
0x2ede   :  { %v5144_v21 = vpop.eup %5143 }
0x2edf   :  { %v2444_v28 = vsub.f32 1.0, %v5144_v21  ;;  %v2450_v32 = vmul.f32 %v5144_v21, %v2346_v8 }
0x2f37   :  { %v2435_v22 = vpop.permute.xlu0 %2434 }
0x2f38   :  { %v2437_v23 = vmul.f32 %v5144_v21, %v2435_v22 }
0x2f3a   :  { %2439 = vrot.lane.b32.xlu1 %v2437_v23, %s5401_s27 }
0x2fac   :  { %v2440_v24 = vpop.permute.xlu1 %2439 }
0x2fad   :  { %v2442_v25 = vadd.f32 %v2440_v24, %v2352_v13 }
0x2faf   :  { %5145 = vtanh.f32 %v2442_v25 }
0x2fb9   :  { %v5146_v26 = vpop.eup %5145 }
0x2fba   :  { %2446 = vrot.lane.b32.xlu0 %v5146_v26, %s5402_s5 }
0x302c   :  { %v2447_v31 = vpop.permute.xlu0 %2446 }
0x302d   :  { %v2449_v33 = vmul.f32 %v2447_v31, %v2444_v28  ;;  %v2982_v28 = vld [vmem:[%s6292_s13] sm:$0xff]  ;;  %v2983_v31 = vld [vmem:[%s6292_s13 + $0x8] sm:$0xff] }
0x302f   :  { %v2451_v34 = vadd.f32 %v2450_v32, %v2449_v33  ;;  %v4939_v32 = vpack.c.bf16 %v2983_v31, %v2982_v28 }
0x3031   :  { %2453 = vrot.lane.b32.xlu1 %v2451_v34, %s5402_s5 }
0x30a3   :  { %v2454_v35 = vpop.permute.xlu1 %2453 }
0x30a4   :  { %2456 = vst.msk [vmem:[#allocation3 + $0x4] sm:$0x3] %vm366_vm3, %v2454_v35  ;;  %4599 = vmatmul.mubr.msk.f32.vlgmr.msra.gmra.mrb[24].mxu1 %vm253_vm4, %v2454_v35 }
0x30a5   :  { %4923 = vmatpush3.bf16.msra.mxu1 %v5920_v59  ;;  %4620 = vmatprep.mubr.msk.f32.mxu1 %vm5399_vm0, %v5400_v1 }
0x30a6   :  { %4924 = vmatprep.subr.bf16.mxu1 %v5398_v0 }
0x30a9   :  { %4926 = vmatpush3.bf16.msra.mxu1 %v5932_v2 }
0x30aa   :  { %4933 = vmatprep.subr.bf16.mxu1 %v5398_v0 }
0x3177   :  { %v2526_v7 = vpop.f32.mrb[24].mxu1 }
0x3178   :  { %v2537_v36 = vadd.f32 %v2526_v7, %v5966_v27  ;;  %v4600_v19 = vpop.f32.mrb[25].mxu1  ;;  %v2530_v37 = vadd.f32 %v2526_v7, %v2457_v58 }
0x317a   :  { %2539 = vrot.lane.b32.xlu0 %v2537_v36, %s5401_s27  ;;  %v4117_v38 = vmul.f32 -1.442695, %v2530_v37  ;;  %v2985_v37 = vld [vmem:[%s6292_s13 + $0x18] sm:$0xff] }
0x317c   :  { %5147 = vpow2.f32 %v4117_v38 }
0x3186   :  { %v5148_v39 = vpop.eup %5147 }
0x3187   :  { %v2534_v40 = vadd.f32 1.0, %v5148_v39 }
0x3189   :  { %5149 = vrcp.f32 %v2534_v40  ;;  %v2986_v40 = vld [vmem:[%s6292_s13 + $0x20] sm:$0xff] }
0x3193   :  { %v5150_v41 = vpop.eup %5149 }
0x3194   :  { %v2549_v48 = vsub.f32 1.0, %v5150_v41  ;;  %v2555_v54 = vmul.f32 %v5150_v41, %v2451_v34 }
0x31ec   :  { %v2540_v12 = vpop.permute.xlu0 %2539 }
0x31ed   :  { %v2542_v43 = vmul.f32 %v5150_v41, %v2540_v12  ;;  %v2987_v41 = vld [vmem:[%s6292_s13 + $0x28] sm:$0xff] }
0x31ee   :  { %v4947_v12 = vpack.c.bf16 %v2987_v41, %v2986_v40 }
0x31ef   :  { %2544 = vrot.lane.b32.xlu1 %v2542_v43, %s5401_s27  ;;  %v2988_v43 = vld [vmem:[%s6292_s13 + $0x30] sm:$0xff] }
0x3261   :  { %v2545_v45 = vpop.permute.xlu1 %2544 }
0x3262   :  { %v2547_v46 = vadd.f32 %v2545_v45, %v2457_v58  ;;  %v2984_v58 = vld [vmem:[%s6292_s13 + $0x10] sm:$0xff]  ;;  %v2989_v45 = vld [vmem:[%s6292_s13 + $0x38] sm:$0xff] }
0x3263   :  { %v4943_v38 = vpack.c.bf16 %v2985_v37, %v2984_v58 }
0x3264   :  { %5151 = vtanh.f32 %v2547_v46  ;;  %v4951_v46 = vpack.c.bf16 %v2989_v45, %v2988_v43 }
0x326e   :  { %v5152_v47 = vpop.eup %5151 }
0x326f   :  { %2551 = vrot.lane.b32.xlu0 %v5152_v47, %s5402_s5 }
0x32e1   :  { %v2552_v49 = vpop.permute.xlu0 %2551 }
0x32e2   :  { %v2554_v51 = vmul.f32 %v2552_v49, %v2549_v48  ;;  %v4126_v49 = vld [vmem:[#allocation13] ss:$0 sm:$0xff] }
0x32e4   :  { %v2556_v52 = vadd.f32 %v2555_v54, %v2554_v51 }
0x32e6   :  { %2558 = vrot.lane.b32.xlu1 %v2556_v52, %s5402_s5 }
0x3358   :  { %v2559_v50 = vpop.permute.xlu1 %2558 }
0x3359   :  { %2561 = vst.msk [vmem:[#allocation3 + $0x6] sm:$0x3] %vm366_vm3, %v2559_v50  ;;  %4610 = vmatmul.mubr.msk.f32.vlgmr.msra.gmra.mrb[20].mxu0 %vm253_vm4, %v2559_v50  ;;  %v2772_v50 = vld [vmem:[#allocation4 + $0xc] sm:$0x3] }
0x335a   :  { %4929 = vmatpush3.bf16.msra.mxu0 %v5920_v59  ;;  %4631 = vmatprep.mubr.msk.f32.mxu0 %vm5399_vm0, %v5400_v1 }
0x335b   :  { %4930 = vmatprep.subr.bf16.mxu0 %v5398_v0 }
0x335e   :  { %4932 = vmatpush3.bf16.msra.mxu0 %v5932_v2 }
0x335f   :  { %4940 = vmatprep.subr.bf16.mxu0 %v4939_v32 }
0x342c   :  { %v2631_v53 = vpop.f32.mrb[20].mxu0 }
0x342d   :  { %v2642_v55 = vadd.f32 %v2631_v53, %v5966_v27  ;;  %v4611_v42 = vpop.f32.mrb[21].mxu0  ;;  %v2635_v60 = vadd.f32 %v2631_v53, %v2562_v56 }
0x342f   :  { %2644 = vrot.lane.b32.xlu0 %v2642_v55, %s5401_s27  ;;  %v4119_v20 = vmul.f32 -1.442695, %v2635_v60  ;;  %v6092_v55 = vld [vmem:[#allocation4 + $0xe] sm:$0x3] }
0x3431   :  { %5153 = vpow2.f32 %v4119_v20 }
0x343b   :  { %v5154_v57 = vpop.eup %5153 }
0x343c   :  { %v2639_v61 = vadd.f32 1.0, %v5154_v57 }
0x343e   :  { %5155 = vrcp.f32 %v2639_v61 }
0x3448   :  { %v5156_v44 = vpop.eup %5155 }
0x3449   :  { %v2654_v6 = vsub.f32 1.0, %v5156_v44  ;;  %v2660_v9 = vmul.f32 %v5156_v44, %v2556_v52 }
0x34a1   :  { %v2645_v62 = vpop.permute.xlu0 %2644 }
0x34a2   :  { %v2647_v63 = vmul.f32 %v5156_v44, %v2645_v62 }
0x34a4   :  { %2649 = vrot.lane.b32.xlu1 %v2647_v63, %s5401_s27 }
0x3516   :  { %v2650_v3 = vpop.permute.xlu1 %2649 }
0x3517   :  { %v2652_v4 = vadd.f32 %v2650_v3, %v2562_v56  ;;  %v3074_v3 = vld [vmem:[#allocation12] sm:$0xff] }
0x3519   :  { %5157 = vtanh.f32 %v2652_v4  ;;  %v3075_v4 = vld [vmem:[#allocation12 + $0x8] sm:$0xff] }
0x3523   :  { %v5158_v5 = vpop.eup %5157 }
0x3524   :  { %2656 = vrot.lane.b32.xlu0 %v5158_v5, %s5402_s5  ;;  %v6098_v5 = vpack.c.bf16 %v3075_v4, %v3074_v3 }
0x3596   :  { %v2657_v8 = vpop.permute.xlu0 %2656 }
0x3597   :  { %v2659_v10 = vmul.f32 %v2657_v8, %v2654_v6  ;;  %v3076_v6 = vld [vmem:[#allocation12 + $0x10] sm:$0xff]  ;;  %v3077_v8 = vld [vmem:[#allocation12 + $0x18] sm:$0xff] }
0x3599   :  { %v2661_v11 = vadd.f32 %v2660_v9, %v2659_v10  ;;  %v6102_v9 = vpack.c.bf16 %v3077_v8, %v3076_v6 }
0x359b   :  { %2663 = vrot.lane.b32.xlu1 %v2661_v11, %s5402_s5 }
0x360d   :  { %v2664_v14 = vpop.permute.xlu1 %2663 }
0x360e   :  { %2666 = vst.msk [vmem:[#allocation3 + $0x8] sm:$0x3] %vm366_vm3, %v2664_v14  ;;  %4621 = vmatmul.mubr.msk.f32.vlgmr.msra.gmra.mrb[26].mxu1 %vm253_vm4, %v2664_v14  ;;  %v4130_v14 = vld [vmem:[#allocation15] ss:$0 sm:$0xff] }
0x360f   :  { %4935 = vmatpush3.bf16.msra.mxu1 %v5920_v59  ;;  %4642 = vmatprep.mubr.msk.f32.mxu1 %vm5399_vm0, %v5400_v1 }
0x3610   :  { %4936 = vmatprep.subr.bf16.mxu1 %v5398_v0 }
0x3613   :  { %4938 = vmatpush3.bf16.msra.mxu1 %v5932_v2 }
0x3614   :  { %4955 = vmatprep.subr.bf16.mxu1 %v5398_v0 }
0x36e1   :  { %v2736_v13 = vpop.f32.mrb[26].mxu1 }
0x36e2   :  { %v2747_v15 = vadd.f32 %v2736_v13, %v5966_v27  ;;  %v4622_v16 = vpop.f32.mrb[27].mxu1  ;;  %v2740_v18 = vadd.f32 %v2736_v13, %v2667_v17 }
0x36e4   :  { %2749 = vrot.lane.b32.xlu0 %v2747_v15, %s5401_s27  ;;  %v4121_v21 = vmul.f32 -1.442695, %v2740_v18 }
0x36e6   :  { %5159 = vpow2.f32 %v4121_v21 }
0x36f0   :  { %v5160_v59 = vpop.eup %5159 }
0x36f1   :  { %v2744_v22 = vadd.f32 1.0, %v5160_v59 }
0x36f3   :  { %5161 = vrcp.f32 %v2744_v22 }
0x36fd   :  { %v5162_v23 = vpop.eup %5161 }
0x36fe   :  { %v2759_v34 = vsub.f32 1.0, %v5162_v23  ;;  %v2765_v7 = vmul.f32 %v5162_v23, %v2661_v11 }
0x3756   :  { %v2750_v24 = vpop.permute.xlu0 %2749 }
0x3757   :  { %v2752_v25 = vmul.f32 %v5162_v23, %v2750_v24 }
0x3759   :  { %2754 = vrot.lane.b32.xlu1 %v2752_v25, %s5401_s27 }
0x37cb   :  { %v2755_v2 = vpop.permute.xlu1 %2754 }
0x37cc   :  { %v2757_v26 = vadd.f32 %v2755_v2, %v2667_v17 }
0x37ce   :  { %5163 = vtanh.f32 %v2757_v26 }
0x37d8   :  { %v5164_v33 = vpop.eup %5163 }
0x37d9   :  { %2761 = vrot.lane.b32.xlu0 %v5164_v33, %s5402_s5 }
0x384b   :  { %v2762_v35 = vpop.permute.xlu0 %2761 }
0x384c   :  { %v2764_v36 = vmul.f32 %v2762_v35, %v2759_v34 }
0x384e   :  { %v6059_v19 = vadd.f32 %v2765_v7, %v2764_v36 }
0x3850   :  { %2768 = vrot.lane.b32.xlu1 %v6059_v19, %s5402_s5 }
0x38c2   :  { %v2769_v39 = vpop.permute.xlu1 %2768 }
0x38c3   :  { %2771 = vst.msk [vmem:[#allocation3 + $0xa] sm:$0x3] %vm366_vm3, %v2769_v39  ;;  %4632 = vmatmul.mubr.msk.f32.vlgmr.msra.gmra.mrb[22].mxu0 %vm253_vm4, %v2769_v39 }
0x38c4   :  { %4942 = vmatpush3.bf16.msra.mxu0 %v4939_v32  ;;  %4661 = vmatprep.mubr.msk.f32.mxu0 %vm2047_vm6, %v5971_v29 }
0x38c5   :  { %4944 = vmatprep.subr.bf16.mxu0 %v4943_v38 }
0x38c8   :  { %4946 = vmatpush3.bf16.msra.mxu0 %v4943_v38 }
0x38c9   :  { %4948 = vmatprep.subr.bf16.mxu0 %v4947_v12 }
0x38cc   :  { %4950 = vmatpush3.bf16.msra.mxu0 %v4947_v12 }
0x38cd   :  { %4952 = vmatprep.subr.bf16.mxu0 %v4951_v46 }
0x38d0   :  { %4954 = vmatpush3.bf16.msra.mxu0 %v4951_v46 }
0x38d1   :  { %4967 = vmatprep.subr.bf16.mxu0 %v5398_v0 }
0x38d3   :  { %4662 = vmatmul.mubr.msk.f32.vlgmr.msra.gmra.mrb[24].mxu0 %vm2047_vm6, %v5975_v30 }
0x38d4   :  { %4694 = vmatprep.mubr.msk.f32.mxu0 %vm5399_vm0, %v5400_v1  ;;  %4969 = vmatpush3.bf16.msra.mxu0 %v6098_v5 }
0x38d5   :  { %4970 = vmatprep.subr.bf16.mxu0 %v5398_v0 }
0x38d8   :  { %4972 = vmatpush3.bf16.msra.mxu0 %v6102_v9 }
0x38d9   :  { %4979 = vmatprep.subr.bf16.mxu0 %v5398_v0 }
0x3996   :  { %v2841_v29 = vpop.f32.mrb[22].mxu0 }
0x3997   :  { %v2852_v47 = vadd.f32 %v2841_v29, %v5966_v27  ;;  %v4633_v48 = vpop.f32.mrb[23].mxu0  ;;  %v2845_v30 = vadd.f32 %v2841_v29, %v2772_v50 }
0x3999   :  { %2854 = vrot.lane.b32.xlu0 %v2852_v47, %s5401_s27  ;;  %v4123_v42 = vmul.f32 -1.442695, %v2845_v30 }
0x399b   :  { %5165 = vpow2.f32 %v4123_v42 }
0x39a5   :  { %v5166_v56 = vpop.eup %5165 }
0x39a6   :  { %v4663_v54 = vpop.f32.mrb[24].mxu0  ;;  %v2849_v60 = vadd.f32 1.0, %v5166_v56 }
0x39a7   :  { %v3069_v51 = vadd.f32 %v4663_v54, %v4126_v49  ;;  %v3063_v52 = vpop.f32.mrb[25].mxu0 }
0x39a8   :  { %v3064_v53 = vadd.f32 %v4126_v49, %v3063_v52  ;;  %5167 = vrcp.f32 %v2849_v60 }
0x39a9   :  { %3073 = vst.msk [vmem:[#allocation4 + $0x8] sm:$0xff] %vm244_vm2, %v3069_v51 }
0x39aa   :  { %3072 = vst.msk [vmem:[#allocation4] sm:$0xff] %vm244_vm2, %v3064_v53 }
0x39b0   :  { %v3079_v25 = vld [vmem:[#allocation4 + $0xe] sm:$0x3]  ;;  %v3186_v45 = vld [vmem:[#allocation4 + $0xc] sm:$0x3] }
0x39b2   :  { %v5168_v20 = vpop.eup %5167 }
0x39b3   :  { %v2864_v10 = vsub.f32 1.0, %v5168_v20  ;;  %v2870_v13 = vmul.f32 %v5168_v20, %v6059_v19 }
0x3a0b   :  { %v2855_v57 = vpop.permute.xlu0 %2854 }
0x3a0c   :  { %v2857_v61 = vmul.f32 %v5168_v20, %v2855_v57 }
0x3a0e   :  { %2859 = vrot.lane.b32.xlu1 %v2857_v61, %s5401_s27 }
0x3a80   :  { %v2860_v44 = vpop.permute.xlu1 %2859 }
0x3a81   :  { %v2862_v62 = vadd.f32 %v2860_v44, %v2772_v50 }
0x3a83   :  { %5169 = vtanh.f32 %v2862_v62 }
0x3a8d   :  { %v5170_v63 = vpop.eup %5169 }
0x3a8e   :  { %2866 = vrot.lane.b32.xlu0 %v5170_v63, %s5402_s5  ;;  %v3290_v63 = vld [vmem:[#allocation4 + $0xa] sm:$0x3] }
0x3a92   :  { %3162 = vrot.lane.b32.xlu0 %v4130_v14, %s5401_s27 }
0x3b00   :  { %v2867_v11 = vpop.permute.xlu0 %2866 }
0x3b01   :  { %v2869_v15 = vmul.f32 %v2867_v11, %v2864_v10 }
0x3b03   :  { %v6108_v16 = vadd.f32 %v2870_v13, %v2869_v15 }
0x3b04   :  { %v6129_v59 = vpop.permute.xlu0 %3162 }
0x3b05   :  { %2873 = vrot.lane.b32.xlu1 %v6108_v16, %s5402_s5 }
0x3b77   :  { %v2874_v17 = vpop.permute.xlu1 %2873 }
0x3b78   :  { %2876 = vst.msk [vmem:[#allocation3 + $0xc] sm:$0x3] %vm366_vm3, %v2874_v17  ;;  %4643 = vmatmul.mubr.msk.f32.vlgmr.msra.gmra.mrb[28].mxu1 %vm253_vm4, %v2874_v17 }
0x3b79   :  { %4957 = vmatpush3.bf16.msra.mxu1 %v6098_v5  ;;  %4672 = vmatprep.mubr.msk.f32.mxu1 %vm5399_vm0, %v5400_v1 }
0x3b7a   :  { %4958 = vmatprep.subr.bf16.mxu1 %v5398_v0 }
0x3b7d   :  { %4960 = vmatpush3.bf16.msra.mxu1 %v6102_v9 }
0x3b7e   :  { %4961 = vmatprep.subr.bf16.mxu1 %v5398_v0 }
0x3b80   :  { %4673 = vmatmul.mubr.f32.vlgmr.msra.gmra.mrb[30].mxu1 %v5400_v1 }
0x3b81   :  { %4963 = vmatpush3.bf16.msra.mxu1 %v6098_v5  ;;  %4683 = vmatprep.mubr.msk.f32.mxu1 %vm5399_vm0, %v5400_v1 }
0x3b82   :  { %4964 = vmatprep.subr.bf16.mxu1 %v5398_v0 }
0x3b85   :  { %4966 = vmatpush3.bf16.msra.mxu1 %v6102_v9 }
0x3b86   :  { %4973 = vmatprep.subr.bf16.mxu1 %v5398_v0 }
0x3c4b   :  { %v6127_v18 = vpop.f32.mrb[28].mxu1 }
0x3c4c   :  { %v4644_v21 = vpop.f32.mrb[29].mxu1 }
0x3c53   :  { %v3146_v22 = vpop.f32.mrb[30].mxu1 }
0x3c54   :  { %v3165_v23 = vadd.f32 %v6129_v59, %v3146_v22  ;;  %v4674_v24 = vpop.f32.mrb[31].mxu1  ;;  %v3150_v2 = vadd.f32 %v3146_v22, %v3079_v25 }
0x3c56   :  { %3167 = vrot.lane.b32.xlu1 %v3165_v23, %s5401_s27  ;;  %v4129_v26 = vmul.f32 -1.442695, %v3150_v2 }
0x3c58   :  { %5171 = vpow2.f32 %v4129_v26 }
0x3c62   :  { %v5172_v28 = vpop.eup %5171 }
0x3c63   :  { %v3154_v31 = vadd.f32 1.0, %v5172_v28 }
0x3c65   :  { %5173 = vrcp.f32 %v3154_v31 }
0x3c6f   :  { %v5174_v32 = vpop.eup %5173 }
0x3c70   :  { %v3177_v19 = vsub.f32 1.0, %v5174_v32  ;;  %v3183_v37 = vmul.f32 0.0, %v5174_v32 }
0x3cc8   :  { %v3168_v33 = vpop.permute.xlu1 %3167 }
0x3cc9   :  { %v3170_v34 = vmul.f32 %v5174_v32, %v3168_v33  ;;  %v3394_v32 = vld [vmem:[#allocation4 + $0x8] sm:$0x3] }
0x3ccb   :  { %3172 = vrot.lane.b32.xlu0 %v3170_v34, %s5401_s27 }
0x3d3d   :  { %v3173_v35 = vpop.permute.xlu0 %3172 }
0x3d3e   :  { %v3175_v7 = vadd.f32 %v3173_v35, %v3079_v25 }
0x3d40   :  { %5175 = vtanh.f32 %v3175_v7 }
0x3d4a   :  { %v5176_v36 = vpop.eup %5175 }
0x3d4b   :  { %3179 = vrot.lane.b32.xlu1 %v5176_v36, %s5402_s5 }
0x3dbd   :  { %v3180_v58 = vpop.permute.xlu1 %3179 }
0x3dbe   :  { %v3182_v38 = vmul.f32 %v3180_v58, %v3177_v19 }
0x3dc0   :  { %v6135_v39 = vadd.f32 %v3183_v37, %v3182_v38 }
0x3dc2   :  { %3188 = vrot.lane.b32.xlu0 %v6135_v39, %s5402_s5 }
0x3e34   :  { %v3189_v40 = vpop.permute.xlu0 %3188 }
0x3e35   :  { %4684 = vmatmul.mubr.msk.f32.vlgmr.msra.gmra.mrb[32].mxu1 %vm253_vm4, %v3189_v40 }
0x3e36   :  { %4975 = vmatpush3.bf16.msra.mxu1 %v6098_v5  ;;  %4705 = vmatprep.mubr.msk.f32.mxu1 %vm5399_vm0, %v5400_v1 }
0x3e37   :  { %4976 = vmatprep.subr.bf16.mxu1 %v5398_v0 }
0x3e3a   :  { %4978 = vmatpush3.bf16.msra.mxu1 %v6102_v9 }
0x3e3b   :  { %4985 = vmatprep.subr.bf16.mxu1 %v5398_v0 }
0x3f08   :  { %v3258_v41 = vpop.f32.mrb[32].mxu1 }
0x3f09   :  { %v3269_v12 = vadd.f32 %v3258_v41, %v6129_v59  ;;  %v4685_v43 = vpop.f32.mrb[33].mxu1  ;;  %v3262_v46 = vadd.f32 %v3258_v41, %v3186_v45 }
0x3f0b   :  { %3271 = vrot.lane.b32.xlu1 %v3269_v12, %s5401_s27  ;;  %v4132_v29 = vmul.f32 -1.442695, %v3262_v46 }
0x3f0d   :  { %5177 = vpow2.f32 %v4132_v29 }
0x3f17   :  { %v5178_v47 = vpop.eup %5177 }
0x3f18   :  { %v3266_v48 = vadd.f32 1.0, %v5178_v47 }
0x3f1a   :  { %5179 = vrcp.f32 %v3266_v48 }
0x3f24   :  { %v5180_v49 = vpop.eup %5179 }
0x3f25   :  { %v3281_v30 = vsub.f32 1.0, %v5180_v49  ;;  %v3287_v56 = vmul.f32 %v5180_v49, %v6135_v39 }
0x3f7d   :  { %v3272_v54 = vpop.permute.xlu1 %3271 }
0x3f7e   :  { %v3274_v51 = vmul.f32 %v5180_v49, %v3272_v54  ;;  %v3498_v54 = vld [vmem:[#allocation4 + $0x6] sm:$0x3] }
0x3f80   :  { %3276 = vrot.lane.b32.xlu0 %v3274_v51, %s5401_s27 }
0x3ff2   :  { %v3277_v52 = vpop.permute.xlu0 %3276 }
0x3ff3   :  { %v3279_v50 = vadd.f32 %v3277_v52, %v3186_v45 }
0x3ff5   :  { %5181 = vtanh.f32 %v3279_v50 }
0x3fff   :  { %v5182_v53 = vpop.eup %5181 }
0x4000   :  { %3283 = vrot.lane.b32.xlu1 %v5182_v53, %s5402_s5 }
0x4072   :  { %v3284_v42 = vpop.permute.xlu1 %3283 }
0x4073   :  { %v3286_v60 = vmul.f32 %v3284_v42, %v3281_v30 }
0x4075   :  { %v3288_v20 = vadd.f32 %v3287_v56, %v3286_v60 }
0x4077   :  { %3289 = vst.msk [vmem:[#allocation3 + $0xc] sm:$0x3] %vm1300_vm5, %v3288_v20  ;;  %3292 = vrot.lane.b32.xlu0 %v3288_v20, %s5402_s5 }
0x40e9   :  { %v3293_v57 = vpop.permute.xlu0 %3292 }
0x40ea   :  { %4695 = vmatmul.mubr.msk.f32.vlgmr.msra.gmra.mrb[26].mxu0 %vm253_vm4, %v3293_v57 }
0x40eb   :  { %4981 = vmatpush3.bf16.msra.mxu0 %v6098_v5  ;;  %4716 = vmatprep.mubr.msk.f32.mxu0 %vm5399_vm0, %v5400_v1 }
0x40ec   :  { %4982 = vmatprep.subr.bf16.mxu0 %v5398_v0 }
0x40ef   :  { %4984 = vmatpush3.bf16.msra.mxu0 %v6102_v9 }
0x40f0   :  { %4991 = vmatprep.subr.bf16.mxu0 %v5398_v0 }
0x41bd   :  { %v3362_v61 = vpop.f32.mrb[26].mxu0 }
0x41be   :  { %v3373_v44 = vadd.f32 %v3362_v61, %v6129_v59  ;;  %v4696_v62 = vpop.f32.mrb[27].mxu0  ;;  %v3366_v3 = vadd.f32 %v3362_v61, %v3290_v63 }
0x41c0   :  { %3375 = vrot.lane.b32.xlu1 %v3373_v44, %s5401_s27  ;;  %v4134_v4 = vmul.f32 -1.442695, %v3366_v3 }
0x41c2   :  { %5183 = vpow2.f32 %v4134_v4 }
0x41cc   :  { %v5184_v6 = vpop.eup %5183 }
0x41cd   :  { %v3370_v8 = vadd.f32 1.0, %v5184_v6 }
0x41cf   :  { %5185 = vrcp.f32 %v3370_v8 }
0x41d9   :  { %v5186_v10 = vpop.eup %5185 }
0x41da   :  { %v3385_v21 = vsub.f32 1.0, %v5186_v10  ;;  %v3391_v23 = vmul.f32 %v5186_v10, %v3288_v20 }
0x4232   :  { %v3376_v11 = vpop.permute.xlu1 %3375 }
0x4233   :  { %v3378_v14 = vmul.f32 %v5186_v10, %v3376_v11  ;;  %v3602_v11 = vld [vmem:[#allocation4 + $0x4] sm:$0x3] }
0x4235   :  { %3380 = vrot.lane.b32.xlu0 %v3378_v14, %s5401_s27 }
0x42a7   :  { %v3381_v13 = vpop.permute.xlu0 %3380 }
0x42a8   :  { %v3383_v15 = vadd.f32 %v3381_v13, %v3290_v63 }
0x42aa   :  { %5187 = vtanh.f32 %v3383_v15 }
0x42b4   :  { %v5188_v17 = vpop.eup %5187 }
0x42b5   :  { %3387 = vrot.lane.b32.xlu1 %v5188_v17, %s5402_s5 }
0x4327   :  { %v3388_v22 = vpop.permute.xlu1 %3387 }
0x4328   :  { %v3390_v24 = vmul.f32 %v3388_v22, %v3385_v21 }
0x432a   :  { %v3392_v25 = vadd.f32 %v3391_v23, %v3390_v24 }
0x432c   :  { %3393 = vst.msk [vmem:[#allocation3 + $0xa] sm:$0x3] %vm1300_vm5, %v3392_v25  ;;  %3396 = vrot.lane.b32.xlu0 %v3392_v25, %s5402_s5 }
0x439e   :  { %v3397_v2 = vpop.permute.xlu0 %3396 }
0x439f   :  { %4706 = vmatmul.mubr.msk.f32.vlgmr.msra.gmra.mrb[34].mxu1 %vm253_vm4, %v3397_v2 }
0x43a0   :  { %4987 = vmatpush3.bf16.msra.mxu1 %v6098_v5  ;;  %4727 = vmatprep.mubr.msk.f32.mxu1 %vm5399_vm0, %v5400_v1 }
0x43a1   :  { %4988 = vmatprep.subr.bf16.mxu1 %v5398_v0 }
0x43a4   :  { %4990 = vmatpush3.bf16.msra.mxu1 %v6102_v9 }
0x43a5   :  { %4997 = vmatprep.subr.bf16.mxu1 %v5398_v0 }
0x4472   :  { %v3466_v26 = vpop.f32.mrb[34].mxu1 }
0x4473   :  { %v3477_v28 = vadd.f32 %v3466_v26, %v6129_v59  ;;  %v4707_v31 = vpop.f32.mrb[35].mxu1  ;;  %v3470_v33 = vadd.f32 %v3466_v26, %v3394_v32 }
0x4475   :  { %3479 = vrot.lane.b32.xlu1 %v3477_v28, %s5401_s27  ;;  %v4136_v34 = vmul.f32 -1.442695, %v3470_v33 }
0x4477   :  { %5189 = vpow2.f32 %v4136_v34  ;;  %v3706_v34 = vld [vmem:[#allocation4 + $0x2] sm:$0x3] }
0x4481   :  { %v5190_v35 = vpop.eup %5189 }
0x4482   :  { %v3474_v7 = vadd.f32 1.0, %v5190_v35 }
0x4484   :  { %5191 = vrcp.f32 %v3474_v7 }
0x448e   :  { %v5192_v36 = vpop.eup %5191 }
0x448f   :  { %v3489_v41 = vsub.f32 1.0, %v5192_v36  ;;  %v3495_v43 = vmul.f32 %v5192_v36, %v3392_v25 }
0x44e7   :  { %v3480_v19 = vpop.permute.xlu1 %3479 }
0x44e8   :  { %v3482_v58 = vmul.f32 %v5192_v36, %v3480_v19 }
0x44ea   :  { %3484 = vrot.lane.b32.xlu0 %v3482_v58, %s5401_s27 }
0x455c   :  { %v3485_v37 = vpop.permute.xlu0 %3484 }
0x455d   :  { %v3487_v38 = vadd.f32 %v3485_v37, %v3394_v32 }
0x455f   :  { %5193 = vtanh.f32 %v3487_v38 }
0x4569   :  { %v5194_v40 = vpop.eup %5193 }
0x456a   :  { %3491 = vrot.lane.b32.xlu1 %v5194_v40, %s5402_s5 }
0x45dc   :  { %v3492_v12 = vpop.permute.xlu1 %3491 }
0x45dd   :  { %v3494_v45 = vmul.f32 %v3492_v12, %v3489_v41 }
0x45df   :  { %v3496_v46 = vadd.f32 %v3495_v43, %v3494_v45  ;;  %v2957_v43 = vadd.f32 %v6127_v18, %v5966_v27  ;;  %v2950_v45 = vadd.f32 %v6127_v18, %v6092_v55 }
0x45e1   :  { %3497 = vst.msk [vmem:[#allocation3 + $0x8] sm:$0x3] %vm1300_vm5, %v3496_v46  ;;  %3500 = vrot.lane.b32.xlu0 %v3496_v46, %s5402_s5 }
0x4653   :  { %v3501_v29 = vpop.permute.xlu0 %3500 }
0x4654   :  { %4717 = vmatmul.mubr.msk.f32.vlgmr.msra.gmra.mrb[28].mxu0 %vm253_vm4, %v3501_v29 }
0x4655   :  { %4993 = vmatpush3.bf16.msra.mxu0 %v6098_v5  ;;  %4738 = vmatprep.mubr.msk.f32.mxu0 %vm5399_vm0, %v5400_v1 }
0x4656   :  { %4994 = vmatprep.subr.bf16.mxu0 %v5398_v0 }
0x4659   :  { %4996 = vmatpush3.bf16.msra.mxu0 %v6102_v9 }
0x4727   :  { %v3570_v47 = vpop.f32.mrb[28].mxu0 }
0x4728   :  { %v3581_v48 = vadd.f32 %v3570_v47, %v6129_v59  ;;  %v4718_v49 = vpop.f32.mrb[29].mxu0  ;;  %v3574_v51 = vadd.f32 %v3570_v47, %v3498_v54 }
0x472a   :  { %3583 = vrot.lane.b32.xlu1 %v3581_v48, %s5401_s27  ;;  %v4138_v52 = vmul.f32 -1.442695, %v3574_v51 }
0x472c   :  { %5195 = vpow2.f32 %v4138_v52 }
0x4736   :  { %v5196_v50 = vpop.eup %5195 }
0x4737   :  { %v3578_v53 = vadd.f32 1.0, %v5196_v50 }
0x4739   :  { %5197 = vrcp.f32 %v3578_v53 }
0x4743   :  { %v5198_v30 = vpop.eup %5197 }
0x4744   :  { %v3593_v61 = vsub.f32 1.0, %v5198_v30  ;;  %v3599_v62 = vmul.f32 %v5198_v30, %v3496_v46  ;;  %v4125_v46 = vmul.f32 -1.442695, %v2950_v45 }
0x479c   :  { %v3584_v42 = vpop.permute.xlu1 %3583 }
0x479d   :  { %v3586_v56 = vmul.f32 %v5198_v30, %v3584_v42 }
0x479f   :  { %3588 = vrot.lane.b32.xlu0 %v3586_v56, %s5401_s27 }
0x4811   :  { %v3589_v60 = vpop.permute.xlu0 %3588 }
0x4812   :  { %v3591_v20 = vadd.f32 %v3589_v60, %v3498_v54 }
0x4814   :  { %5199 = vtanh.f32 %v3591_v20 }
0x481e   :  { %v5200_v57 = vpop.eup %5199 }
0x481f   :  { %3595 = vrot.lane.b32.xlu1 %v5200_v57, %s5402_s5 }
0x4891   :  { %v3596_v44 = vpop.permute.xlu1 %3595 }
0x4892   :  { %v3598_v63 = vmul.f32 %v3596_v44, %v3593_v61 }
0x4894   :  { %v3600_v3 = vadd.f32 %v3599_v62, %v3598_v63 }
0x4896   :  { %3601 = vst.msk [vmem:[#allocation3 + $0x6] sm:$0x3] %vm1300_vm5, %v3600_v3  ;;  %3604 = vrot.lane.b32.xlu0 %v3600_v3, %s5402_s5 }
0x4908   :  { %v3605_v4 = vpop.permute.xlu0 %3604 }
0x4909   :  { %4728 = vmatmul.mubr.msk.f32.vlgmr.msra.gmra.mrb[36].mxu1 %vm253_vm4, %v3605_v4 }
0x490a   :  { %4999 = vmatpush3.bf16.msra.mxu1 %v6098_v5  ;;  %4749 = vmatprep.mubr.msk.f32.mxu1 %vm5399_vm0, %v5400_v1 }
0x490b   :  { %5000 = vmatprep.subr.bf16.mxu1 %v5398_v0 }
0x490e   :  { %5002 = vmatpush3.bf16.msra.mxu1 %v6102_v9 }
0x49dc   :  { %v3674_v6 = vpop.f32.mrb[36].mxu1 }
0x49dd   :  { %v3685_v8 = vadd.f32 %v3674_v6, %v6129_v59  ;;  %v4729_v10 = vpop.f32.mrb[37].mxu1  ;;  %v3678_v14 = vadd.f32 %v3674_v6, %v3602_v11 }
0x49df   :  { %3687 = vrot.lane.b32.xlu1 %v3685_v8, %s5401_s27  ;;  %v4140_v13 = vmul.f32 -1.442695, %v3678_v14 }
0x49e1   :  { %5201 = vpow2.f32 %v4140_v13 }
0x49eb   :  { %v5202_v15 = vpop.eup %5201 }
0x49ec   :  { %v3682_v17 = vadd.f32 1.0, %v5202_v15 }
0x49ee   :  { %5203 = vrcp.f32 %v3682_v17  ;;  %v3963_v17 = vld [vmem:[%s6298_s19] sm:$0xff] }
0x49f8   :  { %v5204_v5 = vpop.eup %5203 }
0x49f9   :  { %v3697_v23 = vsub.f32 1.0, %v5204_v5  ;;  %v3703_v25 = vmul.f32 %v5204_v5, %v3600_v3 }
0x4a51   :  { %v3688_v21 = vpop.permute.xlu1 %3687 }
0x4a52   :  { %v3690_v1 = vmul.f32 %v5204_v5, %v3688_v21  ;;  %v3965_v5 = vld [vmem:[%s6298_s19 + $0x10] sm:$0xff] }
0x4a54   :  { %3692 = vrot.lane.b32.xlu0 %v3690_v1, %s5401_s27  ;;  %v3966_v1 = vld [vmem:[%s6298_s19 + $0x18] sm:$0xff] }
0x4ac6   :  { %v3693_v0 = vpop.permute.xlu0 %3692 }
0x4ac7   :  { %v3695_v9 = vadd.f32 %v3693_v0, %v3602_v11  ;;  %v5007_v0 = vpack.c.bf16 %v3966_v1, %v3965_v5 }
0x4ac9   :  { %5205 = vtanh.f32 %v3695_v9  ;;  %v3967_v9 = vld [vmem:[%s6298_s19 + $0x20] sm:$0xff] }
0x4ad3   :  { %v5206_v22 = vpop.eup %5205 }
0x4ad4   :  { %3699 = vrot.lane.b32.xlu1 %v5206_v22, %s5402_s5  ;;  %v3968_v22 = vld [vmem:[%s6298_s19 + $0x28] sm:$0xff] }
0x4b46   :  { %v3700_v24 = vpop.permute.xlu1 %3699 }
0x4b47   :  { %v3702_v2 = vmul.f32 %v3700_v24, %v3697_v23  ;;  %v5011_v23 = vpack.c.bf16 %v3968_v22, %v3967_v9  ;;  %v3969_v24 = vld [vmem:[%s6298_s19 + $0x30] sm:$0xff] }
0x4b49   :  { %v3704_v26 = vadd.f32 %v3703_v25, %v3702_v2  ;;  %v3970_v25 = vld [vmem:[%s6298_s19 + $0x38] sm:$0xff] }
0x4b4b   :  { %3705 = vst.msk [vmem:[#allocation3 + $0x4] sm:$0x3] %vm1300_vm5, %v3704_v26  ;;  %3708 = vrot.lane.b32.xlu0 %v3704_v26, %s5402_s5 }
0x4bbd   :  { %v3709_v28 = vpop.permute.xlu0 %3708 }
0x4bbe   :  { %4739 = vmatmul.mubr.msk.f32.vlgmr.msra.gmra.mrb[30].mxu0 %vm253_vm4, %v3709_v28 }
0x4c91   :  { %v3778_v31 = vpop.f32.mrb[30].mxu0 }
0x4c92   :  { %v3789_v32 = vadd.f32 %v3778_v31, %v6129_v59  ;;  %v4740_v33 = vpop.f32.mrb[31].mxu0  ;;  %v3782_v35 = vadd.f32 %v3778_v31, %v3706_v34 }
0x4c94   :  { %3791 = vrot.lane.b32.xlu1 %v3789_v32, %s5401_s27  ;;  %v4142_v7 = vmul.f32 -1.442695, %v3782_v35 }
0x4c96   :  { %5207 = vpow2.f32 %v4142_v7 }
0x4ca0   :  { %v5208_v36 = vpop.eup %5207 }
0x4ca1   :  { %v3786_v19 = vadd.f32 1.0, %v5208_v36 }
0x4ca3   :  { %5209 = vrcp.f32 %v3786_v19 }
0x4cad   :  { %v5210_v58 = vpop.eup %5209 }
0x4cae   :  { %v3801_v48 = vsub.f32 1.0, %v5210_v58  ;;  %v3807_v54 = vmul.f32 %v5210_v58, %v3704_v26  ;;  %v5015_v26 = vpack.c.bf16 %v3970_v25, %v3969_v24 }
0x4d06   :  { %v3792_v37 = vpop.permute.xlu1 %3791 }
0x4d07   :  { %v3794_v38 = vmul.f32 %v5210_v58, %v3792_v37 }
0x4d09   :  { %3796 = vrot.lane.b32.xlu0 %v3794_v38, %s5401_s27 }
0x4d7b   :  { %v3797_v40 = vpop.permute.xlu0 %3796 }
0x4d7c   :  { %v3799_v41 = vadd.f32 %v3797_v40, %v3706_v34 }
0x4d7e   :  { %5211 = vtanh.f32 %v3799_v41 }
0x4d7f   :  { %5213 = vpow2.f32 %v4125_v46 }
0x4d88   :  { %v5212_v12 = vpop.eup %5211 }
0x4d89   :  { %3803 = vrot.lane.b32.xlu1 %v5212_v12, %s5402_s5  ;;  %v5214_v29 = vpop.eup %5213 }
0x4d8a   :  { %v2954_v47 = vadd.f32 1.0, %v5214_v29 }
0x4d8c   :  { %5215 = vrcp.f32 %v2954_v47 }
0x4d8d   :  { %2959 = vrot.lane.b32.xlu1 %v2957_v43, %s5401_s27 }
0x4d96   :  { %v5216_v50 = vpop.eup %5215 }
0x4d97   :  { %v2969_v60 = vsub.f32 1.0, %v5216_v50  ;;  %v2975_v57 = vmul.f32 %v5216_v50, %v6108_v16 }
0x4dfb   :  { %v3804_v49 = vpop.permute.xlu1 %3803 }
0x4dfc   :  { %v3806_v51 = vmul.f32 %v3804_v49, %v3801_v48 }
0x4dfe   :  { %v6213_v52 = vadd.f32 %v3807_v54, %v3806_v51 }
0x4dff   :  { %v2960_v53 = vpop.permute.xlu1 %2959 }
0x4e00   :  { %3809 = vst.msk [vmem:[#allocation3 + $0x2] sm:$0x3] %vm1300_vm5, %v6213_v52  ;;  %v2962_v27 = vmul.f32 %v5216_v50, %v2960_v53  ;;  %3812 = vrot.lane.b32.xlu0 %v6213_v52, %s5402_s5 }
0x4e02   :  { %2964 = vrot.lane.b32.xlu1 %v2962_v27, %s5401_s27 }
0x4e72   :  { %v3813_v18 = vpop.permute.xlu0 %3812 }
0x4e73   :  { %4750 = vmatmul.mubr.msk.f32.vlgmr.msra.gmra.mrb[38].mxu1 %vm253_vm4, %v3813_v18 }
0x4e74   :  { %v2965_v30 = vpop.permute.xlu1 %2964 }
0x4e75   :  { %v2967_v42 = vadd.f32 %v2965_v30, %v6092_v55  ;;  %v3810_v55 = vld [vmem:[#allocation4] sm:$0x3] }
0x4e77   :  { %5217 = vtanh.f32 %v2967_v42 }
0x4e81   :  { %v5218_v56 = vpop.eup %5217 }
0x4e82   :  { %2971 = vrot.lane.b32.xlu1 %v5218_v56, %s5402_s5 }
0x4ef4   :  { %v2972_v20 = vpop.permute.xlu1 %2971 }
0x4ef5   :  { %v2974_v61 = vmul.f32 %v2972_v20, %v2969_v60  ;;  %v4145_v20 = vld [vmem:[%s6296_s17] ss:$0 sm:$0xff] }
0x4ef7   :  { %v2976_v44 = vadd.f32 %v2975_v57, %v2974_v61 }
0x4ef9   :  { %2978 = vrot.lane.b32.xlu1 %v2976_v44, %s5402_s5  ;;  %v4146_v44 = vld [vmem:[%s6297_s18] ss:$0 sm:$0xff] }
0x4f46   :  { %v3882_v62 = vpop.f32.mrb[38].mxu1 }
0x4f47   :  { %v3893_v63 = vadd.f32 %v3882_v62, %v6129_v59  ;;  %v4751_v3 = vpop.f32.mrb[39].mxu1  ;;  %v3886_v6 = vadd.f32 %v3882_v62, %v3810_v55 }
0x4f49   :  { %3895 = vrot.lane.b32.xlu0 %v3893_v63, %s5401_s27  ;;  %v4144_v8 = vmul.f32 -1.442695, %v3886_v6 }
0x4f4b   :  { %5219 = vpow2.f32 %v4144_v8 }
0x4f55   :  { %v5220_v16 = vpop.eup %5219 }
0x4f56   :  { %v3890_v10 = vadd.f32 1.0, %v5220_v16 }
0x4f58   :  { %5221 = vrcp.f32 %v3890_v10 }
0x4f62   :  { %v5222_v11 = vpop.eup %5221 }
0x4f63   :  { %v3905_v28 = vsub.f32 1.0, %v5222_v11  ;;  %v3911_v32 = vmul.f32 %v5222_v11, %v6213_v52 }
0x4f6b   :  { %v2979_v4 = vpop.permute.xlu1 %2978 }
0x4f6c   :  { %2981 = vst.msk [vmem:[#allocation3 + $0xe] sm:$0x3] %vm366_vm3, %v2979_v4 }
0x4f6d   :  { %3185 = vst.msk [vmem:[#allocation3 + $0xe] sm:$0x3] %vm1300_vm5, %v6135_v39  ;;  %v3964_v39 = vld [vmem:[%s6298_s19 + $0x8] sm:$0xff] }
0x4f6e   :  { %v5003_v21 = vpack.c.bf16 %v3964_v39, %v3963_v17 }
0x4f70   :  { %5004 = vmatprep.subr.bf16.mxu0 %v5003_v21 }
0x4f71   :  { %5006 = vmatpush3.bf16.msra.mxu0 %v5003_v21 }
0x4f72   :  { %5008 = vmatprep.subr.bf16.mxu0 %v5007_v0 }
0x4f74   :  { %v3915_v35 = vld [vmem:[#allocation3 + $0x8] sm:$0xff] }
0x4f75   :  { %5010 = vmatpush3.bf16.msra.mxu0 %v5007_v0  ;;  %v3917_v19 = vsel %vm2047_vm6, %v3915_v35, 0.0 }
0x4f76   :  { %5012 = vmatprep.subr.bf16.mxu0 %v5011_v23 }
0x4f79   :  { %5014 = vmatpush3.bf16.msra.mxu0 %v5011_v23 }
0x4f7a   :  { %5016 = vmatprep.subr.bf16.mxu0 %v5015_v26 }
0x4f7d   :  { %5018 = vmatpush3.bf16.msra.mxu0 %v5015_v26 }
0x4fbb   :  { %v3896_v14 = vpop.permute.xlu0 %3895 }
0x4fbc   :  { %v3898_v13 = vmul.f32 %v5222_v11, %v3896_v14 }
0x4fbe   :  { %3900 = vrot.lane.b32.xlu0 %v3898_v13, %s5401_s27 }
0x5030   :  { %v3901_v59 = vpop.permute.xlu0 %3900 }
0x5031   :  { %v3903_v15 = vadd.f32 %v3901_v59, %v3810_v55  ;;  %v4147_v55 = vld [vmem:[%s6299_s20] ss:$0 sm:$0xff] }
0x5033   :  { %5223 = vtanh.f32 %v3903_v15 }
0x503d   :  { %v5224_v2 = vpop.eup %5223 }
0x503e   :  { %3907 = vrot.lane.b32.xlu0 %v5224_v2, %s5402_s5 }
0x50b0   :  { %v3908_v31 = vpop.permute.xlu0 %3907 }
0x50b1   :  { %v3910_v33 = vmul.f32 %v3908_v31, %v3905_v28 }
0x50b3   :  { %v3912_v34 = vadd.f32 %v3911_v32, %v3910_v33 }
0x50b5   :  { %3913 = vst.msk [vmem:[#allocation3] sm:$0x3] %vm1300_vm5, %v3912_v34 }
0x50bc   :  { %v3914_v7 = vld [vmem:[#allocation3] sm:$0xff] }
0x50bd   :  { %v3916_v36 = vsel %vm2047_vm6, %v3914_v7, 0.0 }
0x50be   :  { %v3918_v58 = vadd.f32 %v3917_v19, %v3916_v36 }
0x50c0   :  { %v3919_v37 = vrot.slane %v3918_v58, 4 }
0x50c2   :  { %v3920_v38 = vadd.f32 %v3919_v37, %v3918_v58 }
0x50c4   :  { %v3921_v40 = vrot.slane %v3920_v38, 2 }
0x50c6   :  { %v3922_v41 = vadd.f32 %v3921_v40, %v3920_v38 }
0x50c8   :  { %v3923_v12 = vrot.slane %v3922_v41, 1 }
0x50ca   :  { %v3924_v43 = vadd.f32 %v3923_v12, %v3922_v41 }
0x50cc   :  { %v3926_v45 = vmul.f32 0.0625, %v3924_v43 }
0x50ce   :  { %v3927_v46 = vsub.f32 %v3914_v7, %v3926_v45  ;;  %v3928_v29 = vsub.f32 %v3915_v35, %v3926_v45 }
0x50d0   :  { %v3929_v47 = vmul.f32 %v3927_v46, %v3927_v46  ;;  %v3930_v48 = vmul.f32 %v3928_v29, %v3928_v29 }
0x50d2   :  { %v3931_v49 = vsel %vm2047_vm6, %v3929_v47, 0.0  ;;  %v3932_v54 = vsel %vm2047_vm6, %v3930_v48, 0.0 }
0x50d3   :  { %v3933_v51 = vadd.f32 %v3932_v54, %v3931_v49 }
0x50d5   :  { %v3934_v52 = vrot.slane %v3933_v51, 4 }
0x50d7   :  { %v3935_v50 = vadd.f32 %v3934_v52, %v3933_v51 }
0x50d9   :  { %v3936_v53 = vrot.slane %v3935_v50, 2 }
0x50db   :  { %v3937_v27 = vadd.f32 %v3936_v53, %v3935_v50 }
0x50dd   :  { %v3938_v18 = vrot.slane %v3937_v27, 1 }
0x50df   :  { %v3939_v30 = vadd.f32 %v3938_v18, %v3937_v27 }
0x50e1   :  { %v3940_v42 = vmul.f32 0.0625, %v3939_v30 }
0x50e3   :  { %v3941_v56 = vadd.f32 1e-05, %v3940_v42 }
0x50e5   :  { %5225 = vrsqrt.f32 %v3941_v56 }
0x50ef   :  { %v5226_v60 = vpop.eup %5225 }
0x50f0   :  { %v3943_v57 = vmul.f32 %v5226_v60, %v3927_v46  ;;  %v3944_v61 = vmul.f32 %v5226_v60, %v3928_v29 }
0x50f2   :  { %v3952_v62 = vmul.f32 %v4145_v20, %v3943_v57  ;;  %v3953_v63 = vmul.f32 %v4145_v20, %v3944_v61 }
0x50f4   :  { %v3961_v3 = vadd.f32 %v4146_v44, %v3952_v62  ;;  %v3962_v4 = vadd.f32 %v4146_v44, %v3953_v63 }
0x50f6   :  { %4768 = vmatprep.mubr.msk.f32.mxu0 %vm2047_vm6, %v3961_v3 }
0x50f7   :  { %4769 = vmatmul.mubr.msk.f32.vlgmr.msra.gmra.mrb[32].mxu0 %vm2047_vm6, %v3962_v4 }
0x51ca   :  { %v4770_v6 = vpop.f32.mrb[32].mxu0 }
0x51cb   :  { %v4056_v8 = vadd.f32 %v4770_v6, %v4147_v55  ;;  %v4050_v16 = vpop.f32.mrb[33].mxu0 }
0x51cc   :  { %v4051_v10 = vadd.f32 %v4147_v55, %v4050_v16 }
0x51cd   :  { %4060 = vst [vmem:[%s6300_s21 + $0x8] sm:$0xff] %v4056_v8 }
0x51ce   :  { %4059 = vst [vmem:[%s6300_s21] sm:$0xff] %v4051_v10 }
0x51cf   :  { %4065 = vsyncpa [#allocation6], 1 }
0x51d0   :  { %4066 = vsyncpa [#allocation8], 1 }
0x51d1   :  { %4067 = vsyncpa [#allocation11], 1 }
0x51d2   :  { %4068 = vsyncpa [#allocation14], 1 }

</bundles_post_ra>
